<compile_context>
chip_gen: v7x
topology: tpu7x:2x2x1
jax: 0.10.0
libtpu: 0.0.40
codegen_flags: <defaults>
</compile_context>

<pallas_src>
import functools

import numpy as np

import jax
import jax.numpy as jnp
from jax.experimental import pallas as pl
from jax.experimental.pallas import tpu as pltpu

_BN_EPS = 1e-5
_VMEM_LIMIT = 16 * 1024 * 1024   # well under v7x's 64 MiB / core


# ----------------------------------------------------------------------------
# Pallas kernels
# ----------------------------------------------------------------------------
def _front_conv_kernel(x_ref, w1_ref, s1_ref, b1_ref, w2_ref, s2_ref, b2_ref,
                       t2_ref, t1p_ref, *, H, W):
    """Fused conv1(1x1)+BN+ReLU -> conv2(3x3, pad=1, dense)+BN+ReLU, one image.

    x_ref  : (1, H*W, Cin)  bf16
    w1_ref : (Cin, oc)      bf16
    w2_ref : (9, oc, oc)    bf16   tap t = ki*3 + kj
    s*,b*  : (1, oc)        f32    folded BatchNorm scale / bias
    t2_ref : (1, H*W, oc)   bf16   conv2 output at stride 1 (caller subsamples)
    t1p_ref: (H+2, W+2, oc) f32    VMEM scratch: zero-padded conv1 output
    """
    hw = H * W
    oc = w1_ref.shape[-1]

    # ---- conv1 (1x1) + BN + ReLU: single MXU matmul, f32 accumulate ---------
    acc1 = jnp.dot(x_ref[0], w1_ref[...], preferred_element_type=jnp.float32)
    t1 = jnp.maximum(acc1 * s1_ref[...] + b1_ref[...], 0.0)

    # ---- stage conv1 output into a zero-padded VMEM scratch (halo = 1) ------
    t1p_ref[...] = jnp.zeros(t1p_ref.shape, t1p_ref.dtype)
    t1p_ref[1:H + 1, 1:W + 1, :] = t1.reshape(H, W, oc)

    # ---- conv2 (3x3, pad=1): 9 shifted matmuls accumulated in f32 -----------
    # (no im2col patches in HBM; windows are contiguous slices of the scratch)
    acc2 = jnp.zeros((hw, oc), jnp.float32)
    for ki in range(3):
        for kj in range(3):
            win = t1p_ref[ki:ki + H, kj:kj + W, :].reshape(hw, oc)
            acc2 = acc2 + jnp.dot(win.astype(jnp.bfloat16),
                                  w2_ref[ki * 3 + kj],
                                  preferred_element_type=jnp.float32)
    t2 = jnp.maximum(acc2 * s2_ref[...] + b2_ref[...], 0.0)
    t2_ref[0] = t2.astype(t2_ref.dtype)


def _tail_conv_kernel(t2_ref, xs_ref, w3_ref, s3_ref, b3_ref,
                      wsk_ref, ssk_ref, bsk_ref, o_ref):
    """Fused conv3(1x1)+BN + skip conv(1x1)+BN + add + ReLU epilogue."""
    main = jnp.dot(t2_ref[...], w3_ref[...], preferred_element_type=jnp.float32)
    main = main * s3_ref[...] + b3_ref[...]
    skip = jnp.dot(xs_ref[...], wsk_ref[...], preferred_element_type=jnp.float32)
    skip = skip * ssk_ref[...] + bsk_ref[...]
    o_ref[...] = jnp.maximum(main + skip, 0.0).astype(o_ref.dtype)


# ----------------------------------------------------------------------------
# pallas_call wrappers
# ----------------------------------------------------------------------------
def _block_front(x_rows, w1, s1, b1, w2, s2, b2, *, H, W):
    n, hw, cin = x_rows.shape
    oc = w1.shape[-1]
    assert hw == H * W and hw % 8 == 0, "H*W must be a multiple of 8"
    kernel = functools.partial(_front_conv_kernel, H=H, W=W)
    return pl.pallas_call(
        kernel,
        out_shape=jax.ShapeDtypeStruct((n, hw, oc), jnp.bfloat16),
        grid=(n,),
        in_specs=[
            pl.BlockSpec((1, hw, cin), lambda b: (b, 0, 0)),
            pl.BlockSpec((cin, oc), lambda b: (0, 0)),
            pl.BlockSpec((1, oc), lambda b: (0, 0)),
            pl.BlockSpec((1, oc), lambda b: (0, 0)),
            pl.BlockSpec((9, oc, oc), lambda b: (0, 0, 0)),
            pl.BlockSpec((1, oc), lambda b: (0, 0)),
            pl.BlockSpec((1, oc), lambda b: (0, 0)),
        ],
        out_specs=pl.BlockSpec((1, hw, oc), lambda b: (b, 0, 0)),
        scratch_shapes=[pltpu.VMEM((H + 2, W + 2, oc), jnp.float32)],
        compiler_params=pltpu.CompilerParams(
            dimension_semantics=("parallel",),
            vmem_limit_bytes=_VMEM_LIMIT,
        ),
    )(x_rows, w1, s1, b1, w2, s2, b2)


def _block_tail(t2_rows, xs_rows, w3, s3, b3, wsk, ssk, bsk):
    m, oc = t2_rows.shape
    cin = xs_rows.shape[-1]
    nout = w3.shape[-1]
    assert m % 8 == 0, "row count must be a multiple of 8 for TPU tiling"

    # Row tiling: biggest tile that still yields >= 2 grid tiles so both v7x
    # TensorCores get work; otherwise use the full extent.
    tm = m
    for cand in (256, 128, 64, 32, 16, 8):
        if m % cand == 0 and m // cand >= 2:
            tm = cand
            break
    # Output-channel tiling: lane-dense (>= 128) blocks.
    if nout % 256 == 0:
        tn = 256
    elif nout % 128 == 0:
        tn = 128
    else:
        tn = nout
    grid = (m // tm, nout // tn)

    return pl.pallas_call(
        _tail_conv_kernel,
        out_shape=jax.ShapeDtypeStruct((m, nout), jnp.float32),
        grid=grid,
        in_specs=[
            pl.BlockSpec((tm, oc), lambda i, j: (i, 0)),
            pl.BlockSpec((tm, cin), lambda i, j: (i, 0)),
            pl.BlockSpec((oc, tn), lambda i, j: (0, j)),
            pl.BlockSpec((1, tn), lambda i, j: (0, j)),
            pl.BlockSpec((1, tn), lambda i, j: (0, j)),
            pl.BlockSpec((cin, tn), lambda i, j: (0, j)),
            pl.BlockSpec((1, tn), lambda i, j: (0, j)),
            pl.BlockSpec((1, tn), lambda i, j: (0, j)),
        ],
        out_specs=pl.BlockSpec((tm, tn), lambda i, j: (i, j)),
        compiler_params=pltpu.CompilerParams(
            dimension_semantics=("parallel", "parallel"),
            vmem_limit_bytes=_VMEM_LIMIT,
        ),
    )(t2_rows, xs_rows, w3, s3, b3, wsk, ssk, bsk)


# ----------------------------------------------------------------------------
# BatchNorm folding (eval mode) and forward pass
# ----------------------------------------------------------------------------
def _fold_bn(gamma, beta, mean, var, eps=_BN_EPS):
    scale = gamma * jax.lax.rsqrt(var + eps)
    return scale, beta - mean * scale


def fpn_block_forward(params, x_nchw, *, stride=1):
    """FPNBlock.forward: (N, Cin, H, W) f32 -> (N, 4*oc, H//stride, W//stride) f32."""
    x = jnp.transpose(x_nchw, (0, 2, 3, 1)).astype(jnp.float32)   # NCHW -> NHWC
    n, h, w, cin = x.shape
    oc = params["w1"].shape[-1]
    oc4 = params["w3"].shape[-1]

    s1, b1 = _fold_bn(*params["bn1"])
    s2, b2 = _fold_bn(*params["bn2"])
    s3, b3 = _fold_bn(*params["bn3"])
    ssk, bsk = _fold_bn(*params["bnsk"])
    row = lambda v: v.reshape(1, -1).astype(jnp.float32)
    bf = lambda v: v.astype(jnp.bfloat16)

    x_bf = bf(x)

    # Kernel A: conv1 + conv2 fused (conv2 computed densely at stride 1).
    t2 = _block_front(x_bf.reshape(n, h * w, cin),
                      bf(params["w1"]), row(s1), row(b1),
                      bf(params["w2"]), row(s2), row(b2),
                      H=h, W=w).reshape(n, h, w, oc)

    if stride > 1:
        # A strided 3x3/pad-1 conv equals the dense conv subsampled at the
        # stride, so realise the stride with a plain XLA slice (exact; the
        # extra dense rows are negligible at these sizes).
        t2 = t2[:, ::stride, ::stride, :]
        x_bf = x_bf[:, ::stride, ::stride, :]
    ho, wo = t2.shape[1], t2.shape[2]
    m = n * ho * wo

    # Kernel B: conv3+BN and the skip conv+BN share one fused add+ReLU epilogue.
    out = _block_tail(t2.reshape(m, oc), x_bf.reshape(m, cin),
                      bf(params["w3"]), row(s3), row(b3),
                      bf(params["wsk"]), row(ssk), row(bsk))
    out = out.reshape(n, ho, wo, oc4)
    return jnp.transpose(out, (0, 3, 1, 2))                       # NHWC -> NCHW


# ----------------------------------------------------------------------------
# Deterministic synthetic parameters (shapes per the PyTorch __init__)
# ----------------------------------------------------------------------------
def _he_normal(key, shape, fan_in):
    return jax.random.normal(key, shape, jnp.float32) * (2.0 / fan_in) ** 0.5


def _bn_init(key, c):
    k1, k2, k3, k4 = jax.random.split(key, 4)
    gamma = jax.random.uniform(k1, (c,), jnp.float32, 0.75, 1.25)
    beta = 0.05 * jax.random.normal(k2, (c,), jnp.float32)
    mean = 0.05 * jax.random.normal(k3, (c,), jnp.float32)
    var = jax.random.uniform(k4, (c,), jnp.float32, 0.8, 1.2)
    return gamma, beta, mean, var


def init_params(key, in_channels, out_channels, expansion=4):
    cin, oc = in_channels, out_channels
    oc4 = expansion * out_channels
    k = jax.random.split(key, 8)
    return {
        "w1": _he_normal(k[0], (cin, oc), cin),        # conv1: 1x1, Cin -> oc
        "bn1": _bn_init(k[1], oc),
        "w2": _he_normal(k[2], (9, oc, oc), 9 * oc),   # conv2: 3x3 taps (ki*3+kj, in, out)
        "bn2": _bn_init(k[3], oc),
        "w3": _he_normal(k[4], (oc, oc4), oc),         # conv3: 1x1, oc -> 4*oc
        "bn3": _bn_init(k[5], oc4),
        "wsk": _he_normal(k[6], (cin, oc4), cin),      # skip:  1x1 (stride), Cin -> 4*oc
        "bnsk": _bn_init(k[7], oc4),
    }


# ----------------------------------------------------------------------------
# Pure-XLA f32 reference (for correctness checking only)
# ----------------------------------------------------------------------------
def fpn_block_reference(params, x_nchw, *, stride=1):
    x = jnp.transpose(x_nchw, (0, 2, 3, 1)).astype(jnp.float32)
    cin = x.shape[-1]
    oc = params["w1"].shape[-1]
    oc4 = params["w3"].shape[-1]

    def conv(y, w_hwio, s, p):
        return jax.lax.conv_general_dilated(
            y, w_hwio, window_strides=(s, s), padding=[(p, p), (p, p)],
            dimension_numbers=("NHWC", "HWIO", "NHWC"),
            precision=jax.lax.Precision.HIGHEST)

    def bn(y, bn_params):
        scale, bias = _fold_bn(*bn_params)
        return y * scale + bias

    t = jax.nn.relu(bn(conv(x, params["w1"].reshape(1, 1, cin, oc), 1, 0), params["bn1"]))
    t = jax.nn.relu(bn(conv(t, params["w2"].reshape(3, 3, oc, oc), stride, 1), params["bn2"]))
    t = bn(conv(t, params["w3"].reshape(1, 1, oc, oc4), 1, 0), params["bn3"])
    sk = bn(conv(x, params["wsk"].reshape(1, 1, cin, oc4), stride, 0), params["bnsk"])
    return jnp.transpose(jax.nn.relu(t + sk), (0, 3, 1, 2))


# ----------------------------------------------------------------------------
if __name__ == "__main__":
    key = jax.random.PRNGKey(0)
    kp, kx = jax.random.split(key)

    in_channels, out_channels, expansion = 64, 64, 4
    n, h, w = 2, 16, 16
    params = init_params(kp, in_channels, out_channels, expansion)
    x = jax.random.normal(kx, (n, in_channels, h, w), jnp.float32)   # NCHW input

    for stride in (1, 2):
        fwd = jax.jit(functools.partial(fpn_block_forward, stride=stride))
        out = fwd(params, x)
        jax.block_until_ready(out)
        assert out.shape == (n, expansion * out_channels, h // stride, w // stride), out.shape

        ref = fpn_block_reference(params, x, stride=stride)
        # bf16 matmul operands vs f32 reference -> loose but bug-catching tolerance.
        np.testing.assert_allclose(np.asarray(out), np.asarray(ref), rtol=1e-1, atol=2e-1)

    print("KERNEL_OK")
</pallas_src>

<mosaic_0001>
module attributes {stable_mosaic.version = 11 : i64} {
  func.func @_tail_conv_kernel(%arg0: i32, %arg1: i32, %arg2: memref<256x64xbf16, #tpu.memory_space<vmem>>, %arg3: memref<256x64xbf16, #tpu.memory_space<vmem>>, %arg4: memref<64x256xbf16, #tpu.memory_space<vmem>>, %arg5: memref<1x256xf32, #tpu.memory_space<vmem>>, %arg6: memref<1x256xf32, #tpu.memory_space<vmem>>, %arg7: memref<64x256xbf16, #tpu.memory_space<vmem>>, %arg8: memref<1x256xf32, #tpu.memory_space<vmem>>, %arg9: memref<1x256xf32, #tpu.memory_space<vmem>>, %arg10: memref<256x256xf32, #tpu.memory_space<vmem>>) attributes {dimension_semantics = [#tpu.dimension_semantics<parallel>, #tpu.dimension_semantics<parallel>], iteration_bounds = array<i64: 2, 1>, scalar_prefetch = 0 : i64, scratch_operands = 0 : i64, tpu.core_type = #tpu.core_type<tc>, window_params = [{transform_indices = @transform_0, window_bounds = array<i64: 256, 64>}, {transform_indices = @transform_1, window_bounds = array<i64: 256, 64>}, {transform_indices = @transform_2, window_bounds = array<i64: 64, 256>}, {transform_indices = @transform_3, window_bounds = array<i64: 1, 256>}, {transform_indices = @transform_4, window_bounds = array<i64: 1, 256>}, {transform_indices = @transform_5, window_bounds = array<i64: 64, 256>}, {transform_indices = @transform_6, window_bounds = array<i64: 1, 256>}, {transform_indices = @transform_7, window_bounds = array<i64: 1, 256>}, {transform_indices = @transform_8, window_bounds = array<i64: 256, 256>}]} {
    %c0 = arith.constant 0 : index
    %c0_0 = arith.constant 0 : index
    %0 = vector.load %arg2[%c0, %c0_0] : memref<256x64xbf16, #tpu.memory_space<vmem>>, vector<256x64xbf16>
    %c0_1 = arith.constant 0 : index
    %c0_2 = arith.constant 0 : index
    %1 = vector.load %arg4[%c0_1, %c0_2] : memref<64x256xbf16, #tpu.memory_space<vmem>>, vector<64x256xbf16>
    %cst = arith.constant dense<0.000000e+00> : vector<256x256xf32>
    %2 = tpu.matmul %0, %1, %cst {dimension_numbers = #tpu.dot_dimension_numbers<[1], [0], [0], [1], [0, 0, 1, 1], [], []>} : vector<256x64xbf16>, vector<64x256xbf16>, vector<256x256xf32> -> vector<256x256xf32>
    %c0_3 = arith.constant 0 : index
    %c0_4 = arith.constant 0 : index
    %3 = vector.load %arg5[%c0_3, %c0_4] : memref<1x256xf32, #tpu.memory_space<vmem>>, vector<1x256xf32>
    %4 = vector.broadcast %3 : vector<1x256xf32> to vector<256x256xf32>
    %5 = arith.mulf %2, %4 : vector<256x256xf32>
    %c0_5 = arith.constant 0 : index
    %c0_6 = arith.constant 0 : index
    %6 = vector.load %arg6[%c0_5, %c0_6] : memref<1x256xf32, #tpu.memory_space<vmem>>, vector<1x256xf32>
    %7 = vector.broadcast %6 : vector<1x256xf32> to vector<256x256xf32>
    %8 = arith.addf %5, %7 : vector<256x256xf32>
    %c0_7 = arith.constant 0 : index
    %c0_8 = arith.constant 0 : index
    %9 = vector.load %arg3[%c0_7, %c0_8] : memref<256x64xbf16, #tpu.memory_space<vmem>>, vector<256x64xbf16>
    %c0_9 = arith.constant 0 : index
    %c0_10 = arith.constant 0 : index
    %10 = vector.load %arg7[%c0_9, %c0_10] : memref<64x256xbf16, #tpu.memory_space<vmem>>, vector<64x256xbf16>
    %cst_11 = arith.constant dense<0.000000e+00> : vector<256x256xf32>
    %11 = tpu.matmul %9, %10, %cst_11 {dimension_numbers = #tpu.dot_dimension_numbers<[1], [0], [0], [1], [0, 0, 1, 1], [], []>} : vector<256x64xbf16>, vector<64x256xbf16>, vector<256x256xf32> -> vector<256x256xf32>
    %c0_12 = arith.constant 0 : index
    %c0_13 = arith.constant 0 : index
    %12 = vector.load %arg8[%c0_12, %c0_13] : memref<1x256xf32, #tpu.memory_space<vmem>>, vector<1x256xf32>
    %13 = vector.broadcast %12 : vector<1x256xf32> to vector<256x256xf32>
    %14 = arith.mulf %11, %13 : vector<256x256xf32>
    %c0_14 = arith.constant 0 : index
    %c0_15 = arith.constant 0 : index
    %15 = vector.load %arg9[%c0_14, %c0_15] : memref<1x256xf32, #tpu.memory_space<vmem>>, vector<1x256xf32>
    %16 = vector.broadcast %15 : vector<1x256xf32> to vector<256x256xf32>
    %17 = arith.addf %14, %16 : vector<256x256xf32>
    %18 = arith.addf %8, %17 : vector<256x256xf32>
    %cst_16 = arith.constant 0.000000e+00 : f32
    %19 = vector.broadcast %cst_16 : f32 to vector<256x256xf32>
    %20 = arith.maximumf %18, %19 : vector<256x256xf32>
    %c0_17 = arith.constant 0 : index
    %c0_18 = arith.constant 0 : index
    %21 = vector.load %arg10[%c0_17, %c0_18] : memref<256x256xf32, #tpu.memory_space<vmem>>, vector<256x256xf32>
    tpu.vector_store %arg10[%c0_17, %c0_18], %20 {strides = array<i32>} : memref<256x256xf32, #tpu.memory_space<vmem>>, vector<256x256xf32>,
    return
  }
  func.func @transform_0(%arg0: i32, %arg1: i32) -> (i32, i32) {
    %c0_i32 = arith.constant 0 : i32
    %c0_i32_0 = arith.constant 0 : i32
    return %arg0, %c0_i32 : i32, i32
  }
  func.func @transform_1(%arg0: i32, %arg1: i32) -> (i32, i32) {
    %c0_i32 = arith.constant 0 : i32
    %c0_i32_0 = arith.constant 0 : i32
    return %arg0, %c0_i32 : i32, i32
  }
  func.func @transform_2(%arg0: i32, %arg1: i32) -> (i32, i32) {
    %c0_i32 = arith.constant 0 : i32
    %c0_i32_0 = arith.constant 0 : i32
    return %c0_i32, %arg1 : i32, i32
  }
  func.func @transform_3(%arg0: i32, %arg1: i32) -> (i32, i32) {
    %c0_i32 = arith.constant 0 : i32
    %c0_i32_0 = arith.constant 0 : i32
    return %c0_i32, %arg1 : i32, i32
  }
  func.func @transform_4(%arg0: i32, %arg1: i32) -> (i32, i32) {
    %c0_i32 = arith.constant 0 : i32
    %c0_i32_0 = arith.constant 0 : i32
    return %c0_i32, %arg1 : i32, i32
  }
  func.func @transform_5(%arg0: i32, %arg1: i32) -> (i32, i32) {
    %c0_i32 = arith.constant 0 : i32
    %c0_i32_0 = arith.constant 0 : i32
    return %c0_i32, %arg1 : i32, i32
  }
  func.func @transform_6(%arg0: i32, %arg1: i32) -> (i32, i32) {
    %c0_i32 = arith.constant 0 : i32
    %c0_i32_0 = arith.constant 0 : i32
    return %c0_i32, %arg1 : i32, i32
  }
  func.func @transform_7(%arg0: i32, %arg1: i32) -> (i32, i32) {
    %c0_i32 = arith.constant 0 : i32
    %c0_i32_0 = arith.constant 0 : i32
    return %c0_i32, %arg1 : i32, i32
  }
  func.func @transform_8(%arg0: i32, %arg1: i32) -> (i32, i32) {
    %c0_i32 = arith.constant 0 : i32
    return %arg0, %arg1 : i32, i32
  }
}

module attributes {stable_mosaic.version = 11 : i64} {
  func.func @_front_conv_kernel(%arg0: i32, %arg1: memref<1x256x64xbf16, #tpu.memory_space<vmem>>, %arg2: memref<64x64xbf16, #tpu.memory_space<vmem>>, %arg3: memref<1x64xf32, #tpu.memory_space<vmem>>, %arg4: memref<1x64xf32, #tpu.memory_space<vmem>>, %arg5: memref<9x64x64xbf16, #tpu.memory_space<vmem>>, %arg6: memref<1x64xf32, #tpu.memory_space<vmem>>, %arg7: memref<1x64xf32, #tpu.memory_space<vmem>>, %arg8: memref<1x256x64xbf16, #tpu.memory_space<vmem>>, %arg9: memref<18x18x64xf32, #tpu.memory_space<vmem>>) attributes {dimension_semantics = [#tpu.dimension_semantics<parallel>], iteration_bounds = array<i64: 2>, scalar_prefetch = 0 : i64, scratch_operands = 1 : i64, tpu.core_type = #tpu.core_type<tc>, window_params = [{transform_indices = @transform_0, window_bounds = array<i64: 1, 256, 64>}, {pipeline_mode = #tpu.pipeline_mode<synchronous>, transform_indices = @transform_1, window_bounds = array<i64: 64, 64>}, {pipeline_mode = #tpu.pipeline_mode<synchronous>, transform_indices = @transform_2, window_bounds = array<i64: 1, 64>}, {pipeline_mode = #tpu.pipeline_mode<synchronous>, transform_indices = @transform_3, window_bounds = array<i64: 1, 64>}, {pipeline_mode = #tpu.pipeline_mode<synchronous>, transform_indices = @transform_4, window_bounds = array<i64: 9, 64, 64>}, {pipeline_mode = #tpu.pipeline_mode<synchronous>, transform_indices = @transform_5, window_bounds = array<i64: 1, 64>}, {pipeline_mode = #tpu.pipeline_mode<synchronous>, transform_indices = @transform_6, window_bounds = array<i64: 1, 64>}, {transform_indices = @transform_7, window_bounds = array<i64: 1, 256, 64>}]} {
    %c0 = arith.constant 0 : index
    %c0_0 = arith.constant 0 : index
    %c0_1 = arith.constant 0 : index
    %0 = vector.load %arg1[%c0, %c0_0, %c0_1] : memref<1x256x64xbf16, #tpu.memory_space<vmem>>, vector<1x256x64xbf16>
    %1 = vector.shape_cast %0 : vector<1x256x64xbf16> to vector<256x64xbf16>
    %c0_2 = arith.constant 0 : index
    %c0_3 = arith.constant 0 : index
    %2 = vector.load %arg2[%c0_2, %c0_3] : memref<64x64xbf16, #tpu.memory_space<vmem>>, vector<64x64xbf16>
    %cst = arith.constant dense<0.000000e+00> : vector<256x64xf32>
    %3 = tpu.matmul %1, %2, %cst {dimension_numbers = #tpu.dot_dimension_numbers<[1], [0], [0], [1], [0, 0, 1, 1], [], []>} : vector<256x64xbf16>, vector<64x64xbf16>, vector<256x64xf32> -> vector<256x64xf32>
    %c0_4 = arith.constant 0 : index
    %c0_5 = arith.constant 0 : index
    %4 = vector.load %arg3[%c0_4, %c0_5] : memref<1x64xf32, #tpu.memory_space<vmem>>, vector<1x64xf32>
    %5 = vector.broadcast %4 : vector<1x64xf32> to vector<256x64xf32>
    %6 = arith.mulf %3, %5 : vector<256x64xf32>
    %c0_6 = arith.constant 0 : index
    %c0_7 = arith.constant 0 : index
    %7 = vector.load %arg4[%c0_6, %c0_7] : memref<1x64xf32, #tpu.memory_space<vmem>>, vector<1x64xf32>
    %8 = vector.broadcast %7 : vector<1x64xf32> to vector<256x64xf32>
    %9 = arith.addf %6, %8 : vector<256x64xf32>
    %cst_8 = arith.constant 0.000000e+00 : f32
    %10 = vector.broadcast %cst_8 : f32 to vector<256x64xf32>
    %11 = arith.maximumf %9, %10 : vector<256x64xf32>
    %cst_9 = arith.constant 0.000000e+00 : f32
    %12 = vector.broadcast %cst_9 : f32 to vector<18x18x64xf32>
    %c0_10 = arith.constant 0 : index
    %c0_11 = arith.constant 0 : index
    %c0_12 = arith.constant 0 : index
    %13 = vector.load %arg9[%c0_10, %c0_11, %c0_12] : memref<18x18x64xf32, #tpu.memory_space<vmem>>, vector<18x18x64xf32>
    tpu.vector_store %arg9[%c0_10, %c0_11, %c0_12], %12 {strides = array<i32>} : memref<18x18x64xf32, #tpu.memory_space<vmem>>, vector<18x18x64xf32>,
    %14 = vector.shape_cast %11 : vector<256x64xf32> to vector<16x16x64xf32>
    %c1 = arith.constant 1 : index
    %c1_13 = arith.constant 1 : index
    %c0_14 = arith.constant 0 : index
    %15 = vector.load %arg9[%c1, %c1_13, %c0_14] : memref<18x18x64xf32, #tpu.memory_space<vmem>>, vector<16x16x64xf32>
    tpu.vector_store %arg9[%c1, %c1_13, %c0_14], %14 {strides = array<i32>} : memref<18x18x64xf32, #tpu.memory_space<vmem>>, vector<16x16x64xf32>,
    %cst_15 = arith.constant 0.000000e+00 : f32
    %16 = vector.broadcast %cst_15 : f32 to vector<256x64xf32>
    %c0_16 = arith.constant 0 : index
    %c0_17 = arith.constant 0 : index
    %c0_18 = arith.constant 0 : index
    %17 = vector.load %arg9[%c0_16, %c0_17, %c0_18] : memref<18x18x64xf32, #tpu.memory_space<vmem>>, vector<16x16x64xf32>
    %18 = vector.shape_cast %17 : vector<16x16x64xf32> to vector<256x64xf32>
    %19 = arith.truncf %18 : vector<256x64xf32> to vector<256x64xbf16>
    %c0_19 = arith.constant 0 : index
    %c0_20 = arith.constant 0 : index
    %c0_21 = arith.constant 0 : index
    %20 = vector.load %arg5[%c0_19, %c0_20, %c0_21] : memref<9x64x64xbf16, #tpu.memory_space<vmem>>, vector<1x64x64xbf16>
    %21 = vector.shape_cast %20 : vector<1x64x64xbf16> to vector<64x64xbf16>
    %cst_22 = arith.constant dense<0.000000e+00> : vector<256x64xf32>
    %22 = tpu.matmul %19, %21, %cst_22 {dimension_numbers = #tpu.dot_dimension_numbers<[1], [0], [0], [1], [0, 0, 1, 1], [], []>} : vector<256x64xbf16>, vector<64x64xbf16>, vector<256x64xf32> -> vector<256x64xf32>
    %23 = arith.addf %16, %22 : vector<256x64xf32>
    %c0_23 = arith.constant 0 : index
    %c1_24 = arith.constant 1 : index
    %c0_25 = arith.constant 0 : index
    %24 = vector.load %arg9[%c0_23, %c1_24, %c0_25] : memref<18x18x64xf32, #tpu.memory_space<vmem>>, vector<16x16x64xf32>
    %25 = vector.shape_cast %24 : vector<16x16x64xf32> to vector<256x64xf32>
    %26 = arith.truncf %25 : vector<256x64xf32> to vector<256x64xbf16>
    %c1_26 = arith.constant 1 : index
    %c0_27 = arith.constant 0 : index
    %c0_28 = arith.constant 0 : index
    %27 = vector.load %arg5[%c1_26, %c0_27, %c0_28] : memref<9x64x64xbf16, #tpu.memory_space<vmem>>, vector<1x64x64xbf16>
    %28 = vector.shape_cast %27 : vector<1x64x64xbf16> to vector<64x64xbf16>
    %cst_29 = arith.constant dense<0.000000e+00> : vector<256x64xf32>
    %29 = tpu.matmul %26, %28, %cst_29 {dimension_numbers = #tpu.dot_dimension_numbers<[1], [0], [0], [1], [0, 0, 1, 1], [], []>} : vector<256x64xbf16>, vector<64x64xbf16>, vector<256x64xf32> -> vector<256x64xf32>
    %30 = arith.addf %23, %29 : vector<256x64xf32>
    %c0_30 = arith.constant 0 : index
    %c2 = arith.constant 2 : index
    %c0_31 = arith.constant 0 : index
    %31 = vector.load %arg9[%c0_30, %c2, %c0_31] : memref<18x18x64xf32, #tpu.memory_space<vmem>>, vector<16x16x64xf32>
    %32 = vector.shape_cast %31 : vector<16x16x64xf32> to vector<256x64xf32>
    %33 = arith.truncf %32 : vector<256x64xf32> to vector<256x64xbf16>
    %c2_32 = arith.constant 2 : index
    %c0_33 = arith.constant 0 : index
    %c0_34 = arith.constant 0 : index
    %34 = vector.load %arg5[%c2_32, %c0_33, %c0_34] : memref<9x64x64xbf16, #tpu.memory_space<vmem>>, vector<1x64x64xbf16>
    %35 = vector.shape_cast %34 : vector<1x64x64xbf16> to vector<64x64xbf16>
    %cst_35 = arith.constant dense<0.000000e+00> : vector<256x64xf32>
    %36 = tpu.matmul %33, %35, %cst_35 {dimension_numbers = #tpu.dot_dimension_numbers<[1], [0], [0], [1], [0, 0, 1, 1], [], []>} : vector<256x64xbf16>, vector<64x64xbf16>, vector<256x64xf32> -> vector<256x64xf32>
    %37 = arith.addf %30, %36 : vector<256x64xf32>
    %c1_36 = arith.constant 1 : index
    %c0_37 = arith.constant 0 : index
    %c0_38 = arith.constant 0 : index
    %38 = vector.load %arg9[%c1_36, %c0_37, %c0_38] : memref<18x18x64xf32, #tpu.memory_space<vmem>>, vector<16x16x64xf32>
    %39 = vector.shape_cast %38 : vector<16x16x64xf32> to vector<256x64xf32>
    %40 = arith.truncf %39 : vector<256x64xf32> to vector<256x64xbf16>
    %c3 = arith.constant 3 : index
    %c0_39 = arith.constant 0 : index
    %c0_40 = arith.constant 0 : index
    %41 = vector.load %arg5[%c3, %c0_39, %c0_40] : memref<9x64x64xbf16, #tpu.memory_space<vmem>>, vector<1x64x64xbf16>
    %42 = vector.shape_cast %41 : vector<1x64x64xbf16> to vector<64x64xbf16>
    %cst_41 = arith.constant dense<0.000000e+00> : vector<256x64xf32>
    %43 = tpu.matmul %40, %42, %cst_41 {dimension_numbers = #tpu.dot_dimension_numbers<[1], [0], [0], [1], [0, 0, 1, 1], [], []>} : vector<256x64xbf16>, vector<64x64xbf16>, vector<256x64xf32> -> vector<256x64xf32>
    %44 = arith.addf %37, %43 : vector<256x64xf32>
    %c1_42 = arith.constant 1 : index
    %c1_43 = arith.constant 1 : index
    %c0_44 = arith.constant 0 : index
    %45 = vector.load %arg9[%c1_42, %c1_43, %c0_44] : memref<18x18x64xf32, #tpu.memory_space<vmem>>, vector<16x16x64xf32>
    %46 = vector.shape_cast %45 : vector<16x16x64xf32> to vector<256x64xf32>
    %47 = arith.truncf %46 : vector<256x64xf32> to vector<256x64xbf16>
    %c4 = arith.constant 4 : index
    %c0_45 = arith.constant 0 : index
    %c0_46 = arith.constant 0 : index
    %48 = vector.load %arg5[%c4, %c0_45, %c0_46] : memref<9x64x64xbf16, #tpu.memory_space<vmem>>, vector<1x64x64xbf16>
    %49 = vector.shape_cast %48 : vector<1x64x64xbf16> to vector<64x64xbf16>
    %cst_47 = arith.constant dense<0.000000e+00> : vector<256x64xf32>
    %50 = tpu.matmul %47, %49, %cst_47 {dimension_numbers = #tpu.dot_dimension_numbers<[1], [0], [0], [1], [0, 0, 1, 1], [], []>} : vector<256x64xbf16>, vector<64x64xbf16>, vector<256x64xf32> -> vector<256x64xf32>
    %51 = arith.addf %44, %50 : vector<256x64xf32>
    %c1_48 = arith.constant 1 : index
    %c2_49 = arith.constant 2 : index
    %c0_50 = arith.constant 0 : index
    %52 = vector.load %arg9[%c1_48, %c2_49, %c0_50] : memref<18x18x64xf32, #tpu.memory_space<vmem>>, vector<16x16x64xf32>
    %53 = vector.shape_cast %52 : vector<16x16x64xf32> to vector<256x64xf32>
    %54 = arith.truncf %53 : vector<256x64xf32> to vector<256x64xbf16>
    %c5 = arith.constant 5 : index
    %c0_51 = arith.constant 0 : index
    %c0_52 = arith.constant 0 : index
    %55 = vector.load %arg5[%c5, %c0_51, %c0_52] : memref<9x64x64xbf16, #tpu.memory_space<vmem>>, vector<1x64x64xbf16>
    %56 = vector.shape_cast %55 : vector<1x64x64xbf16> to vector<64x64xbf16>
    %cst_53 = arith.constant dense<0.000000e+00> : vector<256x64xf32>
    %57 = tpu.matmul %54, %56, %cst_53 {dimension_numbers = #tpu.dot_dimension_numbers<[1], [0], [0], [1], [0, 0, 1, 1], [], []>} : vector<256x64xbf16>, vector<64x64xbf16>, vector<256x64xf32> -> vector<256x64xf32>
    %58 = arith.addf %51, %57 : vector<256x64xf32>
    %c2_54 = arith.constant 2 : index
    %c0_55 = arith.constant 0 : index
    %c0_56 = arith.constant 0 : index
    %59 = vector.load %arg9[%c2_54, %c0_55, %c0_56] : memref<18x18x64xf32, #tpu.memory_space<vmem>>, vector<16x16x64xf32>
    %60 = vector.shape_cast %59 : vector<16x16x64xf32> to vector<256x64xf32>
    %61 = arith.truncf %60 : vector<256x64xf32> to vector<256x64xbf16>
    %c6 = arith.constant 6 : index
    %c0_57 = arith.constant 0 : index
    %c0_58 = arith.constant 0 : index
    %62 = vector.load %arg5[%c6, %c0_57, %c0_58] : memref<9x64x64xbf16, #tpu.memory_space<vmem>>, vector<1x64x64xbf16>
    %63 = vector.shape_cast %62 : vector<1x64x64xbf16> to vector<64x64xbf16>
    %cst_59 = arith.constant dense<0.000000e+00> : vector<256x64xf32>
    %64 = tpu.matmul %61, %63, %cst_59 {dimension_numbers = #tpu.dot_dimension_numbers<[1], [0], [0], [1], [0, 0, 1, 1], [], []>} : vector<256x64xbf16>, vector<64x64xbf16>, vector<256x64xf32> -> vector<256x64xf32>
    %65 = arith.addf %58, %64 : vector<256x64xf32>
    %c2_60 = arith.constant 2 : index
    %c1_61 = arith.constant 1 : index
    %c0_62 = arith.constant 0 : index
    %66 = vector.load %arg9[%c2_60, %c1_61, %c0_62] : memref<18x18x64xf32, #tpu.memory_space<vmem>>, vector<16x16x64xf32>
    %67 = vector.shape_cast %66 : vector<16x16x64xf32> to vector<256x64xf32>
    %68 = arith.truncf %67 : vector<256x64xf32> to vector<256x64xbf16>
    %c7 = arith.constant 7 : index
    %c0_63 = arith.constant 0 : index
    %c0_64 = arith.constant 0 : index
    %69 = vector.load %arg5[%c7, %c0_63, %c0_64] : memref<9x64x64xbf16, #tpu.memory_space<vmem>>, vector<1x64x64xbf16>
    %70 = vector.shape_cast %69 : vector<1x64x64xbf16> to vector<64x64xbf16>
    %cst_65 = arith.constant dense<0.000000e+00> : vector<256x64xf32>
    %71 = tpu.matmul %68, %70, %cst_65 {dimension_numbers = #tpu.dot_dimension_numbers<[1], [0], [0], [1], [0, 0, 1, 1], [], []>} : vector<256x64xbf16>, vector<64x64xbf16>, vector<256x64xf32> -> vector<256x64xf32>
    %72 = arith.addf %65, %71 : vector<256x64xf32>
    %c2_66 = arith.constant 2 : index
    %c2_67 = arith.constant 2 : index
    %c0_68 = arith.constant 0 : index
    %73 = vector.load %arg9[%c2_66, %c2_67, %c0_68] : memref<18x18x64xf32, #tpu.memory_space<vmem>>, vector<16x16x64xf32>
    %74 = vector.shape_cast %73 : vector<16x16x64xf32> to vector<256x64xf32>
    %75 = arith.truncf %74 : vector<256x64xf32> to vector<256x64xbf16>
    %c8 = arith.constant 8 : index
    %c0_69 = arith.constant 0 : index
    %c0_70 = arith.constant 0 : index
    %76 = vector.load %arg5[%c8, %c0_69, %c0_70] : memref<9x64x64xbf16, #tpu.memory_space<vmem>>, vector<1x64x64xbf16>
    %77 = vector.shape_cast %76 : vector<1x64x64xbf16> to vector<64x64xbf16>
    %cst_71 = arith.constant dense<0.000000e+00> : vector<256x64xf32>
    %78 = tpu.matmul %75, %77, %cst_71 {dimension_numbers = #tpu.dot_dimension_numbers<[1], [0], [0], [1], [0, 0, 1, 1], [], []>} : vector<256x64xbf16>, vector<64x64xbf16>, vector<256x64xf32> -> vector<256x64xf32>
    %79 = arith.addf %72, %78 : vector<256x64xf32>
    %c0_72 = arith.constant 0 : index
    %c0_73 = arith.constant 0 : index
    %80 = vector.load %arg6[%c0_72, %c0_73] : memref<1x64xf32, #tpu.memory_space<vmem>>, vector<1x64xf32>
    %81 = vector.broadcast %80 : vector<1x64xf32> to vector<256x64xf32>
    %82 = arith.mulf %79, %81 : vector<256x64xf32>
    %c0_74 = arith.constant 0 : index
    %c0_75 = arith.constant 0 : index
    %83 = vector.load %arg7[%c0_74, %c0_75] : memref<1x64xf32, #tpu.memory_space<vmem>>, vector<1x64xf32>
    %84 = vector.broadcast %83 : vector<1x64xf32> to vector<256x64xf32>
    %85 = arith.addf %82, %84 : vector<256x64xf32>
    %cst_76 = arith.constant 0.000000e+00 : f32
    %86 = vector.broadcast %cst_76 : f32 to vector<256x64xf32>
    %87 = arith.maximumf %85, %86 : vector<256x64xf32>
    %88 = arith.truncf %87 : vector<256x64xf32> to vector<256x64xbf16>
    %c0_77 = arith.constant 0 : index
    %c0_78 = arith.constant 0 : index
    %c0_79 = arith.constant 0 : index
    %89 = vector.load %arg8[%c0_77, %c0_78, %c0_79] : memref<1x256x64xbf16, #tpu.memory_space<vmem>>, vector<1x256x64xbf16>
    %90 = vector.shape_cast %89 : vector<1x256x64xbf16> to vector<256x64xbf16>
    %91 = vector.shape_cast %88 : vector<256x64xbf16> to vector<1x256x64xbf16>
    tpu.vector_store %arg8[%c0_77, %c0_78, %c0_79], %91 {strides = array<i32>} : memref<1x256x64xbf16, #tpu.memory_space<vmem>>, vector<1x256x64xbf16>,
    return
  }
  func.func @transform_0(%arg0: i32) -> (i32, i32, i32) {
    %c0_i32 = arith.constant 0 : i32
    %c0_i32_0 = arith.constant 0 : i32
    %c0_i32_1 = arith.constant 0 : i32
    return %arg0, %c0_i32, %c0_i32_0 : i32, i32, i32
  }
  func.func @transform_1(%arg0: i32) -> (i32, i32) {
    %c0_i32 = arith.constant 0 : i32
    %c0_i32_0 = arith.constant 0 : i32
    %c0_i32_1 = arith.constant 0 : i32
    return %c0_i32, %c0_i32_0 : i32, i32
  }
  func.func @transform_2(%arg0: i32) -> (i32, i32) {
    %c0_i32 = arith.constant 0 : i32
    %c0_i32_0 = arith.constant 0 : i32
    %c0_i32_1 = arith.constant 0 : i32
    return %c0_i32, %c0_i32_0 : i32, i32
  }
  func.func @transform_3(%arg0: i32) -> (i32, i32) {
    %c0_i32 = arith.constant 0 : i32
    %c0_i32_0 = arith.constant 0 : i32
    %c0_i32_1 = arith.constant 0 : i32
    return %c0_i32, %c0_i32_0 : i32, i32
  }
  func.func @transform_4(%arg0: i32) -> (i32, i32, i32) {
    %c0_i32 = arith.constant 0 : i32
    %c0_i32_0 = arith.constant 0 : i32
    %c0_i32_1 = arith.constant 0 : i32
    %c0_i32_2 = arith.constant 0 : i32
    return %c0_i32, %c0_i32_0, %c0_i32_1 : i32, i32, i32
  }
  func.func @transform_5(%arg0: i32) -> (i32, i32) {
    %c0_i32 = arith.constant 0 : i32
    %c0_i32_0 = arith.constant 0 : i32
    %c0_i32_1 = arith.constant 0 : i32
    return %c0_i32, %c0_i32_0 : i32, i32
  }
  func.func @transform_6(%arg0: i32) -> (i32, i32) {
    %c0_i32 = arith.constant 0 : i32
    %c0_i32_0 = arith.constant 0 : i32
    %c0_i32_1 = arith.constant 0 : i32
    return %c0_i32, %c0_i32_0 : i32, i32
  }
  func.func @transform_7(%arg0: i32) -> (i32, i32, i32) {
    %c0_i32 = arith.constant 0 : i32
    %c0_i32_0 = arith.constant 0 : i32
    %c0_i32_1 = arith.constant 0 : i32
    return %arg0, %c0_i32, %c0_i32_0 : i32, i32, i32
  }
}

</mosaic_0001>

<bundles_post_ra>
// kernel: fpn_block_forward.3
= control target key start
LH: loop header
LB: loop body
LE: loop exit
PB: predicated region body
PF: predicated region fallthrough
CT: control target
= control target key end

     0   :  { %13 = vsyncpa [#allocation3], 0  ;;  %s2911_s0 = inlined_call_operand.vmem [shape: bf16[512,64], index: 0, kind: input, shape index: {}]   ;;  %s2912_s1 = inlined_call_operand.vmem [shape: bf16[512,64], index: 1, kind: input, shape index: {}]   ;;  %s2913_s2 = inlined_call_operand.vmem [shape: bf16[64,256], index: 2, kind: input, shape index: {}]   ;;  %s2914_s3 = inlined_call_operand.vmem [shape: f32[1,256], index: 3, kind: input, shape index: {}]   ;;  %s2915_s4 = inlined_call_operand.vmem [shape: f32[1,256], index: 4, kind: input, shape index: {}]   ;;  %s2916_s5 = inlined_call_operand.vmem [shape: bf16[64,256], index: 5, kind: input, shape index: {}]   ;;  %s2917_s6 = inlined_call_operand.vmem [shape: f32[1,256], index: 6, kind: input, shape index: {}]   ;;  %s2918_s7 = inlined_call_operand.vmem [shape: f32[1,256], index: 7, kind: input, shape index: {}]   ;;  %s2919_s8 = inlined_call_operand.hbm [shape: f32[512,256], index: 8, kind: output, shape index: {}]  }
   0x1   :  { %15 = vsyncpa [#allocation3 + $0x1], 0  ;;  %s2291_s27 = smov 0   ;;  %s2293_s28 = smov 0  }
   0x2   :  { %s2295_s29 = smov 0   ;;  %s2297_s30 = smov 0  }
   0x3   :  { %s2299_s9 = smov 0   ;;  %s2301_s10 = smov 0  }
   0x4 LB: > { %s1944_s11 = sadd.s32 4294967295, %s2240_s10   ;;  %s1945_s12 = sadd.s32 4294967294, %s2240_s10   ;;  %s2240_s10 = sphi %s2301_s10, %s21_s10   ;;  %s2236_s9 = sphi %s2299_s9, %s2926_s9   ;;  %s2232_s30 = sphi %s2297_s30, %s2925_s30   ;;  %s2228_s29 = sphi %s2295_s29, %s2924_s29   ;;  %s2224_s28 = sphi %s2293_s28, %s2923_s28   ;;  %s2220_s27 = sphi %s2291_s27, %s2922_s27  }
   0x5   : > { %s33_s13 = sadd.s32 1, %s2236_s9  ;;  %s250_s14 = sadd.s32 1, %s2228_s29 }
   0x6   : > { %p35_p0 = scmp.ge.s32.totalorder %s33_s13, 2  ;;  %p260_p1 = scmp.ne.s32.totalorder %s2228_s29, %s2224_s28 }
   0x7   : > { %p261_p2 = scmp.eq.s32.totalorder %s1944_s11, 1  ;;  %p266_p3 = scmp.ne.s32.totalorder %s2224_s28, %s2220_s27 }
   0x8   : > { %s2928_s13 = smov (%p35_p0, %s33_s13), 0  ;;  %p267_p5 = scmp.eq.s32.totalorder %s1945_s12, 1 }
   0x9   : > { %p2331_p4 = por %p261_p2, %p260_p1  ;;  %s245_s16 = ssub.s32 %s2236_s9, %s2928_s13 }
   0xa   : > { %p1954_p6 = scmp.ge.s32.totalorder %s2240_s10, 1  ;;  %p248_p7 = scmp.eq.s32.totalorder %s245_s16, 0 }
   0xb   : > { %p2338_p8 = por %p267_p5, %p266_p3  ;;  %p353_p9 = scmp.lt.s32.totalorder %s2240_s10, 3 }
   0xc   : > { %s2344_s18 = scalar_select %p248_p7, %s2228_s29, %s250_s14  }
   0xd   : > { %p354_p10 = pnand %p1954_p6, %p353_p9 }
   0xe   : > { %v2106_v0 = vld [vmem:[%s2913_s2 + $0x4] ss:$8 sps:$4 sm:$0xff] (!%p354_p10)   ;;  %s1956_s21 = sshll.u32 (!%p354_p10), %s2232_s30, 5  ;;  %v2242_v2 = vmov (!%p354_p10), 0   ;;  %v2110_v3 = vld [vmem:[%s2913_s2] ss:$8 sps:$4 sm:$0xff] (!%p354_p10)   ;;  %v869_v49 = vlaneseq (!%p354_p10) }
   0xf   : > { %357 = sbr.rel (%p354_p10) target bundleno = 390 (0x186), region = 52  ;;  %v2108_v1 = vld [vmem:[%s2916_s5 + $0x4] ss:$8 sps:$4 sm:$0xff] (!%p354_p10)   ;;  %706 = vmatprep.mubr.bf16.mxu0 (!%p354_p10), %v2242_v2  ;;  %1259 = vmatprep.mubr.bf16.mxu1 (!%p354_p10), %v2242_v2  ;;  %p419_p11 = scmp.lt.s32.totalorder (!%p354_p10), %s1956_s21, 63  ;;  %v2111_v4 = vld [vmem:[%s2916_s5] ss:$8 sps:$4 sm:$0xff] (!%p354_p10)  }
  0x10   : > { %674 = vmatprep.subr.bf16.mxu0 (!%p354_p10), %v2106_v0  ;;  %1227 = vmatprep.subr.bf16.mxu1 (!%p354_p10), %v2108_v1  ;;  %v2112_v5 = vld [vmem:[%s2913_s2 + $0x14] ss:$8 sps:$4 sm:$0xff] (!%p354_p10)   ;;  %v2116_v7 = vld [vmem:[%s2913_s2 + $0x10] ss:$8 sps:$4 sm:$0xff] (!%p354_p10)   ;;  %v2118_v9 = vld [vmem:[%s2913_s2 + $0x24] ss:$8 sps:$4 sm:$0xff] (!%p354_p10)  }
  0x11   : > { %675 = vmatpush1.bf16.msra.mxu0 (!%p354_p10), %v2110_v3  ;;  %1228 = vmatpush1.bf16.msra.mxu1 (!%p354_p10), %v2111_v4  ;;  %v2114_v6 = vld [vmem:[%s2916_s5 + $0x14] ss:$8 sps:$4 sm:$0xff] (!%p354_p10)   ;;  %v2117_v8 = vld [vmem:[%s2916_s5 + $0x10] ss:$8 sps:$4 sm:$0xff] (!%p354_p10)   ;;  %v2120_v10 = vld [vmem:[%s2916_s5 + $0x24] ss:$8 sps:$4 sm:$0xff] (!%p354_p10)  }
  0x12   : > { %676 = vmatprep.subr.bf16.mxu0 (!%p354_p10), %v2112_v5  ;;  %1229 = vmatprep.subr.bf16.mxu1 (!%p354_p10), %v2114_v6  ;;  %v2122_v11 = vld [vmem:[%s2913_s2 + $0x20] ss:$8 sps:$4 sm:$0xff] (!%p354_p10)   ;;  %v2124_v13 = vld [vmem:[%s2913_s2 + $0x34] ss:$8 sps:$4 sm:$0xff] (!%p354_p10)   ;;  %v2128_v15 = vld [vmem:[%s2913_s2 + $0x30] ss:$8 sps:$4 sm:$0xff] (!%p354_p10)  }
  0x13   : > { %v2123_v12 = vld [vmem:[%s2916_s5 + $0x20] ss:$8 sps:$4 sm:$0xff] (!%p354_p10)   ;;  %v2126_v14 = vld [vmem:[%s2916_s5 + $0x34] ss:$8 sps:$4 sm:$0xff] (!%p354_p10)   ;;  %v2129_v16 = vld [vmem:[%s2916_s5 + $0x30] ss:$8 sps:$4 sm:$0xff] (!%p354_p10)  }
  0x14   : > { %vm625_vm0 = vcmask (!%p354_p10), 523264   ;;  %v870_v50 = vshrl.u32 (!%p354_p10), %v869_v49, 7  ;;  %v867_v52 = vld [vmem:[%s2914_s3] sm:$0x3] (!%p354_p10)  ;;  %s415_s22 = sand.u32 (!%p354_p10), 1, %s2224_s28  }
  0x15   : > { %677 = vmatpush1.bf16.msra.mxu0 (!%p354_p10), %v2116_v7  ;;  %1230 = vmatpush1.bf16.msra.mxu1 (!%p354_p10), %v2117_v8  ;;  %v1420_v53 = vld [vmem:[%s2917_s6] sm:$0x3] (!%p354_p10)  ;;  %s1955_s23 = sshll.u32 (!%p354_p10), %s415_s22, 9 }
  0x16   : > { %s2930_s21 = smov (!%p419_p11, %s1956_s21), 63  ;;  %678 = vmatprep.subr.bf16.mxu0 %v2118_v9  ;;  %1231 = vmatprep.subr.bf16.mxu1 %v2120_v10  ;;  %v871_v51 = vsub.s32 0, %v870_v50  ;;  %v875_v54 = vsub.s32 1, %v870_v50  ;;  %v943_v55 = vld [vmem:[%s2915_s4] sm:$0x3]  ;;  %s2548_s24 = scalar_lea.vmem [#allocation2], %s1955_s23 }
  0x17   : > { %s1957_s11 = sshll.u32 %s2930_s21, 2  ;;  %v1496_v56 = vld [vmem:[%s2918_s7] sm:$0x3]  ;;  %s2047_s21 = sshll.u32 %s2232_s30, 13 }
  0x18   : > { %s2394_s14 = scalar_lea.vmem %s2911_s0, %s1957_s11  ;;  %s2399_s20 = scalar_lea.vmem %s2912_s1, %s1957_s11  ;;  %v2513_v57 = vrot.slane %v867_v52, %v871_v51  ;;  %v2515_v58 = vrot.slane %v1420_v53, %v871_v51  ;;  %v2517_v59 = vrot.slane %v867_v52, %v875_v54  ;;  %v2519_v60 = vrot.slane %v1420_v53, %v875_v54 }
  0x19   : > { %679 = vmatpush1.bf16.msra.mxu0 %v2122_v11  ;;  %1232 = vmatpush1.bf16.msra.mxu1 %v2123_v12  ;;  %v2130_v17 = vld [vmem:[%s2394_s14] sm:$0xff]   ;;  %v2132_v19 = vld [vmem:[%s2394_s14 + $0x8] sm:$0xff]   ;;  %v2134_v21 = vld [vmem:[%s2394_s14 + $0x10] sm:$0xff]   ;;  %v2521_v61 = vrot.slane %v943_v55, %v871_v51  ;;  %v2523_v62 = vrot.slane %v1496_v56, %v871_v51  ;;  %v2526_v1 = vrot.slane %v943_v55, %v875_v54  ;;  %s1781_s11 = sshll.u32 %s2548_s24, 4  ;;  %s2856_s12 = scalar_lea.hbm %s2919_s8, %s2047_s21  ;;  %s2858_s11 = int_to_ptr.vmem [resolvable:$true] %s1781_s11 }
  0x1a   : > { %680 = vmatprep.subr.bf16.mxu0 %v2124_v13  ;;  %1233 = vmatprep.subr.bf16.mxu1 %v2126_v14  ;;  %v2131_v18 = vld [vmem:[%s2399_s20] sm:$0xff]   ;;  %v2133_v20 = vld [vmem:[%s2399_s20 + $0x8] sm:$0xff]   ;;  %v2135_v22 = vld [vmem:[%s2399_s20 + $0x10] sm:$0xff]   ;;  %s2865_s30 = scalar_lea.sflag [#allocation3], %s415_s22  ;;  %s2162_s16 = scalar_lea.vmem %s2858_s11, 8192 }
  0x1b   : > { %v2136_v23 = vld [vmem:[%s2394_s14 + $0x18] sm:$0xff]   ;;  %v2138_v25 = vld [vmem:[%s2394_s14 + $0x20] sm:$0xff]   ;;  %v2140_v27 = vld [vmem:[%s2394_s14 + $0x28] sm:$0xff]   ;;  %p2163_p12 = scmp.ne.s32.totalorder %s2858_s11, %s2162_s16 }
  0x1c   : > { %v2137_v24 = vld [vmem:[%s2399_s20 + $0x18] sm:$0xff]   ;;  %v2139_v26 = vld [vmem:[%s2399_s20 + $0x20] sm:$0xff]   ;;  %v2141_v28 = vld [vmem:[%s2399_s20 + $0x28] sm:$0xff]  }
  0x1d   : > { %681 = vmatpush1.bf16.msra.mxu0 %v2128_v15  ;;  %1234 = vmatpush1.bf16.msra.mxu1 %v2129_v16  ;;  %v2142_v29 = vld [vmem:[%s2394_s14 + $0x30] sm:$0xff]   ;;  %v2144_v31 = vld [vmem:[%s2394_s14 + $0x38] sm:$0xff]   ;;  %v2146_v33 = vld [vmem:[%s2394_s14 + $0x40] sm:$0xff]   ;;  %p2164_p13 = pnand %p2163_p12, %p2331_p4 }
  0x1e   : > { %v2143_v30 = vld [vmem:[%s2399_s20 + $0x30] sm:$0xff]   ;;  %v2145_v32 = vld [vmem:[%s2399_s20 + $0x38] sm:$0xff]   ;;  %v2147_v34 = vld [vmem:[%s2399_s20 + $0x40] sm:$0xff]  }
  0x1f   : > { %v2148_v35 = vld [vmem:[%s2394_s14 + $0x48] sm:$0xff]   ;;  %v2150_v37 = vld [vmem:[%s2394_s14 + $0x50] sm:$0xff]   ;;  %v2152_v39 = vld [vmem:[%s2394_s14 + $0x58] sm:$0xff]   ;;  %p2165_p0 = pneg %p2164_p13 }
  0x20   : > { %1984 = vmatmul.mubr.msk.bf16.vlgmr.msra.gmra.mrb[0].mxu0 %vm625_vm0, %v2130_v17  ;;  %2024 = vmatmul.mubr.msk.bf16.vlgmr.msra.gmra.mrb[0].mxu1 %vm625_vm0, %v2131_v18  ;;  %v2149_v36 = vld [vmem:[%s2399_s20 + $0x48] sm:$0xff]   ;;  %v2151_v38 = vld [vmem:[%s2399_s20 + $0x50] sm:$0xff]   ;;  %v2153_v40 = vld [vmem:[%s2399_s20 + $0x58] sm:$0xff]  }
  0x21   : > { %716 = vmatprep.mubr.bf16.mxu0 %v2242_v2  ;;  %1269 = vmatprep.mubr.bf16.mxu1 %v2242_v2  ;;  %v2154_v41 = vld [vmem:[%s2394_s14 + $0x60] sm:$0xff]   ;;  %v2156_v43 = vld [vmem:[%s2394_s14 + $0x68] sm:$0xff]   ;;  %v2158_v45 = vld [vmem:[%s2394_s14 + $0x70] sm:$0xff]  }
  0x22   : > { %v2155_v42 = vld [vmem:[%s2399_s20 + $0x60] sm:$0xff]   ;;  %v2157_v44 = vld [vmem:[%s2399_s20 + $0x68] sm:$0xff]   ;;  %v2159_v46 = vld [vmem:[%s2399_s20 + $0x70] sm:$0xff]  }
  0x23   : > { %v2160_v47 = vld [vmem:[%s2394_s14 + $0x78] sm:$0xff]   ;;  %s2243_s14 = smov [#allocation2]  }
  0x24   : > { %v2161_v48 = vld [vmem:[%s2399_s20 + $0x78] sm:$0xff]   ;;  %s2166_s19 = sshll.u32 %s2243_s14, 4  ;;  %s2167_s19 = int_to_ptr.vmem [resolvable:$false] %s2166_s19 }
  0x25   : > { %s2168_s20 = scalar_lea.vmem %s2167_s19, 16384  ;;  %p2169_p1 = scmp.lt.s32.totalorder %s2858_s11, %s2167_s19 }
  0x26   : > { %p2170_p2 = scmp.lt.s32.totalorder %s2168_s20, %s2162_s16 }
  0x28   : > { %1985 = vmatmul.mubr.msk.bf16.gmra.mrb[4].mxu0 %vm625_vm0, %v2132_v19  ;;  %2025 = vmatmul.mubr.msk.bf16.gmra.mrb[4].mxu1 %vm625_vm0, %v2133_v20  ;;  %p2171_p3 = por %p2170_p2, %p2169_p1 }
  0x29   : > { %726 = vmatprep.mubr.bf16.mxu0 %v2242_v2  ;;  %1279 = vmatprep.mubr.bf16.mxu1 %v2242_v2 }
  0x2a   : > { %p2172_p5 = pnand %p2171_p3, %p2165_p0 }
  0x30   : > { %1986 = vmatmul.mubr.msk.bf16.gmra.mrb[8].mxu0 %vm625_vm0, %v2134_v21  ;;  %2026 = vmatmul.mubr.msk.bf16.gmra.mrb[8].mxu1 %vm625_vm0, %v2135_v22 }
  0x31   : > { %736 = vmatprep.mubr.bf16.mxu0 %v2242_v2  ;;  %1289 = vmatprep.mubr.bf16.mxu1 %v2242_v2 }
  0x38   : > { %1987 = vmatmul.mubr.msk.bf16.gmra.mrb[12].mxu0 %vm625_vm0, %v2136_v23  ;;  %2027 = vmatmul.mubr.msk.bf16.gmra.mrb[12].mxu1 %vm625_vm0, %v2137_v24 }
  0x39   : > { %746 = vmatprep.mubr.bf16.mxu0 %v2242_v2  ;;  %1299 = vmatprep.mubr.bf16.mxu1 %v2242_v2 }
  0x40   : > { %1988 = vmatmul.mubr.msk.bf16.gmra.mrb[16].mxu0 %vm625_vm0, %v2138_v25  ;;  %2028 = vmatmul.mubr.msk.bf16.gmra.mrb[16].mxu1 %vm625_vm0, %v2139_v26 }
  0x41   : > { %756 = vmatprep.mubr.bf16.mxu0 %v2242_v2  ;;  %1309 = vmatprep.mubr.bf16.mxu1 %v2242_v2 }
  0x48   : > { %1989 = vmatmul.mubr.msk.bf16.gmra.mrb[20].mxu0 %vm625_vm0, %v2140_v27  ;;  %2029 = vmatmul.mubr.msk.bf16.gmra.mrb[20].mxu1 %vm625_vm0, %v2141_v28 }
  0x49   : > { %766 = vmatprep.mubr.bf16.mxu0 %v2242_v2  ;;  %1319 = vmatprep.mubr.bf16.mxu1 %v2242_v2 }
  0x50   : > { %1990 = vmatmul.mubr.msk.bf16.gmra.mrb[24].mxu0 %vm625_vm0, %v2142_v29  ;;  %2030 = vmatmul.mubr.msk.bf16.gmra.mrb[24].mxu1 %vm625_vm0, %v2143_v30 }
  0x51   : > { %776 = vmatprep.mubr.bf16.mxu0 %v2242_v2  ;;  %1329 = vmatprep.mubr.bf16.mxu1 %v2242_v2 }
  0x58   : > { %1991 = vmatmul.mubr.msk.bf16.gmra.mrb[28].mxu0 %vm625_vm0, %v2144_v31  ;;  %2031 = vmatmul.mubr.msk.bf16.gmra.mrb[28].mxu1 %vm625_vm0, %v2145_v32 }
  0x59   : > { %786 = vmatprep.mubr.bf16.mxu0 %v2242_v2  ;;  %1339 = vmatprep.mubr.bf16.mxu1 %v2242_v2 }
  0x60   : > { %1992 = vmatmul.mubr.msk.bf16.gmra.mrb[32].mxu0 %vm625_vm0, %v2146_v33  ;;  %2032 = vmatmul.mubr.msk.bf16.gmra.mrb[32].mxu1 %vm625_vm0, %v2147_v34 }
  0x61   : > { %796 = vmatprep.mubr.bf16.mxu0 %v2242_v2  ;;  %1349 = vmatprep.mubr.bf16.mxu1 %v2242_v2 }
  0x68   : > { %1993 = vmatmul.mubr.msk.bf16.gmra.mrb[36].mxu0 %vm625_vm0, %v2148_v35  ;;  %2033 = vmatmul.mubr.msk.bf16.gmra.mrb[36].mxu1 %vm625_vm0, %v2149_v36 }
  0x69   : > { %806 = vmatprep.mubr.bf16.mxu0 %v2242_v2  ;;  %1359 = vmatprep.mubr.bf16.mxu1 %v2242_v2 }
  0x70   : > { %1994 = vmatmul.mubr.msk.bf16.gmra.mrb[40].mxu0 %vm625_vm0, %v2150_v37  ;;  %2034 = vmatmul.mubr.msk.bf16.gmra.mrb[40].mxu1 %vm625_vm0, %v2151_v38 }
  0x71   : > { %816 = vmatprep.mubr.bf16.mxu0 %v2242_v2  ;;  %1369 = vmatprep.mubr.bf16.mxu1 %v2242_v2 }
  0x78   : > { %1995 = vmatmul.mubr.msk.bf16.gmra.mrb[44].mxu0 %vm625_vm0, %v2152_v39  ;;  %2035 = vmatmul.mubr.msk.bf16.gmra.mrb[44].mxu1 %vm625_vm0, %v2153_v40 }
  0x79   : > { %826 = vmatprep.mubr.bf16.mxu0 %v2242_v2  ;;  %1379 = vmatprep.mubr.bf16.mxu1 %v2242_v2 }
  0x80   : > { %1996 = vmatmul.mubr.msk.bf16.gmra.mrb[48].mxu0 %vm625_vm0, %v2154_v41  ;;  %2036 = vmatmul.mubr.msk.bf16.gmra.mrb[48].mxu1 %vm625_vm0, %v2155_v42 }
  0x81   : > { %836 = vmatprep.mubr.bf16.mxu0 %v2242_v2  ;;  %1389 = vmatprep.mubr.bf16.mxu1 %v2242_v2 }
  0x88   : > { %1997 = vmatmul.mubr.msk.bf16.gmra.mrb[52].mxu0 %vm625_vm0, %v2156_v43  ;;  %2037 = vmatmul.mubr.msk.bf16.gmra.mrb[52].mxu1 %vm625_vm0, %v2157_v44 }
  0x89   : > { %846 = vmatprep.mubr.bf16.mxu0 %v2242_v2  ;;  %1399 = vmatprep.mubr.bf16.mxu1 %v2242_v2 }
  0x90   : > { %1998 = vmatmul.mubr.msk.bf16.gmra.mrb[56].mxu0 %vm625_vm0, %v2158_v45  ;;  %2038 = vmatmul.mubr.msk.bf16.gmra.mrb[56].mxu1 %vm625_vm0, %v2159_v46 }
  0x91   : > { %856 = vmatprep.mubr.bf16.mxu0 %v2242_v2  ;;  %1409 = vmatprep.mubr.bf16.mxu1 %v2242_v2  ;;  %v2528_v2 = vrot.slane %v1496_v56, %v875_v54 }
  0x98   : > { %1999 = vmatmul.mubr.msk.bf16.gmra.mrb[60].mxu0 %vm625_vm0, %v2160_v47  ;;  %2039 = vmatmul.mubr.msk.bf16.gmra.mrb[60].mxu1 %vm625_vm0, %v2161_v48 }
  0xf3   : > { %v708_v63 = vpop.f32.mrb[0].mxu0  ;;  %v1261_v0 = vpop.f32.mrb[0].mxu1 }
  0xf4   : > { %v879_v3 = vmul.f32 %v2513_v57, %v708_v63  ;;  %v1432_v4 = vmul.f32 %v2515_v58, %v1261_v0  ;;  %v710_v5 = vpop.f32.mrb[1].mxu0  ;;  %v1263_v6 = vpop.f32.mrb[1].mxu1 }
  0xf5   : > { %v880_v7 = vmul.f32 %v2517_v59, %v710_v5  ;;  %v1433_v8 = vmul.f32 %v2519_v60, %v1263_v6  ;;  %v712_v9 = vpop.f32.mrb[2].mxu0  ;;  %v1265_v10 = vpop.f32.mrb[2].mxu1 }
  0xf6   : > { %v955_v11 = vadd.f32 %v2521_v61, %v879_v3  ;;  %v1508_v12 = vadd.f32 %v2523_v62, %v1432_v4  ;;  %v881_v13 = vmul.f32 %v2513_v57, %v712_v9  ;;  %v1434_v14 = vmul.f32 %v2515_v58, %v1265_v10  ;;  %v714_v15 = vpop.f32.mrb[3].mxu0  ;;  %v1267_v16 = vpop.f32.mrb[3].mxu1 }
  0xf7   : > { %v956_v17 = vadd.f32 %v2526_v1, %v880_v7  ;;  %v1509_v18 = vadd.f32 %v2528_v2, %v1433_v8  ;;  %v882_v19 = vmul.f32 %v2517_v59, %v714_v15  ;;  %v1435_v20 = vmul.f32 %v2519_v60, %v1267_v16 }
  0xf8   : > { %v1572_v21 = vadd.f32 %v1508_v12, %v955_v11  ;;  %v957_v22 = vadd.f32 %v2521_v61, %v881_v13  ;;  %v1510_v23 = vadd.f32 %v2523_v62, %v1434_v14 }
  0xf9   : > { %v1573_v24 = vadd.f32 %v1509_v18, %v956_v17  ;;  %v958_v25 = vadd.f32 %v2526_v1, %v882_v19  ;;  %v1511_v26 = vadd.f32 %v2528_v2, %v1435_v20 }
  0xfa   : > { %v1636_v27 = vmax.f32 %v1572_v21, 0.0  ;;  %v1574_v28 = vadd.f32 %v1510_v23, %v957_v22 }
  0xfb   : > { %v1637_v29 = vmax.f32 %v1573_v24, 0.0  ;;  %v1575_v30 = vadd.f32 %v1511_v26, %v958_v25  ;;  %v718_v31 = vpop.f32.mrb[4].mxu0  ;;  %v1271_v32 = vpop.f32.mrb[4].mxu1 }
  0xfc   : > { %1700 = vst [vmem:[%s2548_s24] sm:$0xff] %v1636_v27  ;;  %v1638_v33 = vmax.f32 %v1574_v28, 0.0  ;;  %v883_v34 = vmul.f32 %v2513_v57, %v718_v31  ;;  %v1436_v35 = vmul.f32 %v2515_v58, %v1271_v32  ;;  %v720_v36 = vpop.f32.mrb[5].mxu0  ;;  %v1273_v37 = vpop.f32.mrb[5].mxu1 }
  0xfd   : > { %1701 = vst [vmem:[%s2548_s24 + $0x8] sm:$0xff] %v1637_v29  ;;  %v1639_v38 = vmax.f32 %v1575_v30, 0.0  ;;  %v884_v39 = vmul.f32 %v2517_v59, %v720_v36  ;;  %v1437_v40 = vmul.f32 %v2519_v60, %v1273_v37  ;;  %v722_v41 = vpop.f32.mrb[6].mxu0  ;;  %v1275_v42 = vpop.f32.mrb[6].mxu1 }
  0xfe   : > { %1702 = vst [vmem:[%s2548_s24 + $0x10] sm:$0xff] %v1638_v33  ;;  %v959_v43 = vadd.f32 %v2521_v61, %v883_v34  ;;  %v1512_v44 = vadd.f32 %v2523_v62, %v1436_v35  ;;  %v885_v45 = vmul.f32 %v2513_v57, %v722_v41  ;;  %v1438_v46 = vmul.f32 %v2515_v58, %v1275_v42  ;;  %v724_v47 = vpop.f32.mrb[7].mxu0  ;;  %v1277_v48 = vpop.f32.mrb[7].mxu1 }
  0xff   : > { %1703 = vst [vmem:[%s2548_s24 + $0x18] sm:$0xff] %v1639_v38  ;;  %v960_v49 = vadd.f32 %v2526_v1, %v884_v39  ;;  %v1513_v50 = vadd.f32 %v2528_v2, %v1437_v40  ;;  %v886_v51 = vmul.f32 %v2517_v59, %v724_v47  ;;  %v1439_v52 = vmul.f32 %v2519_v60, %v1277_v48 }
 0x100   : > { %v1576_v53 = vadd.f32 %v1512_v44, %v959_v43  ;;  %v961_v54 = vadd.f32 %v2521_v61, %v885_v45  ;;  %v1514_v55 = vadd.f32 %v2523_v62, %v1438_v46 }
 0x101   : > { %v1577_v56 = vadd.f32 %v1513_v50, %v960_v49  ;;  %v962_v63 = vadd.f32 %v2526_v1, %v886_v51  ;;  %v1515_v0 = vadd.f32 %v2528_v2, %v1439_v52 }
 0x102   : > { %v1640_v3 = vmax.f32 %v1576_v53, 0.0  ;;  %v1578_v4 = vadd.f32 %v1514_v55, %v961_v54 }
 0x103   : > { %v1641_v5 = vmax.f32 %v1577_v56, 0.0  ;;  %v1579_v6 = vadd.f32 %v1515_v0, %v962_v63  ;;  %v728_v7 = vpop.f32.mrb[8].mxu0  ;;  %v1281_v8 = vpop.f32.mrb[8].mxu1 }
 0x104   : > { %1704 = vst [vmem:[%s2548_s24 + $0x20] sm:$0xff] %v1640_v3  ;;  %v1642_v9 = vmax.f32 %v1578_v4, 0.0  ;;  %v887_v10 = vmul.f32 %v2513_v57, %v728_v7  ;;  %v1440_v11 = vmul.f32 %v2515_v58, %v1281_v8  ;;  %v730_v12 = vpop.f32.mrb[9].mxu0  ;;  %v1283_v13 = vpop.f32.mrb[9].mxu1 }
 0x105   : > { %1705 = vst [vmem:[%s2548_s24 + $0x28] sm:$0xff] %v1641_v5  ;;  %v1643_v14 = vmax.f32 %v1579_v6, 0.0  ;;  %v888_v15 = vmul.f32 %v2517_v59, %v730_v12  ;;  %v1441_v16 = vmul.f32 %v2519_v60, %v1283_v13  ;;  %v732_v17 = vpop.f32.mrb[10].mxu0  ;;  %v1285_v18 = vpop.f32.mrb[10].mxu1 }
 0x106   : > { %1706 = vst [vmem:[%s2548_s24 + $0x30] sm:$0xff] %v1642_v9  ;;  %v963_v19 = vadd.f32 %v2521_v61, %v887_v10  ;;  %v1516_v20 = vadd.f32 %v2523_v62, %v1440_v11  ;;  %v889_v21 = vmul.f32 %v2513_v57, %v732_v17  ;;  %v1442_v22 = vmul.f32 %v2515_v58, %v1285_v18  ;;  %v734_v23 = vpop.f32.mrb[11].mxu0  ;;  %v1287_v24 = vpop.f32.mrb[11].mxu1 }
 0x107   : > { %1707 = vst [vmem:[%s2548_s24 + $0x38] sm:$0xff] %v1643_v14  ;;  %v964_v25 = vadd.f32 %v2526_v1, %v888_v15  ;;  %v1517_v26 = vadd.f32 %v2528_v2, %v1441_v16  ;;  %v890_v27 = vmul.f32 %v2517_v59, %v734_v23  ;;  %v1443_v28 = vmul.f32 %v2519_v60, %v1287_v24 }
 0x108   : > { %v1580_v29 = vadd.f32 %v1516_v20, %v963_v19  ;;  %v965_v30 = vadd.f32 %v2521_v61, %v889_v21  ;;  %v1518_v31 = vadd.f32 %v2523_v62, %v1442_v22 }
 0x109   : > { %v1581_v32 = vadd.f32 %v1517_v26, %v964_v25  ;;  %v966_v33 = vadd.f32 %v2526_v1, %v890_v27  ;;  %v1519_v34 = vadd.f32 %v2528_v2, %v1443_v28 }
 0x10a   : > { %v1644_v35 = vmax.f32 %v1580_v29, 0.0  ;;  %v1582_v36 = vadd.f32 %v1518_v31, %v965_v30 }
 0x10b   : > { %v1645_v37 = vmax.f32 %v1581_v32, 0.0  ;;  %v1583_v38 = vadd.f32 %v1519_v34, %v966_v33  ;;  %v738_v39 = vpop.f32.mrb[12].mxu0  ;;  %v1291_v40 = vpop.f32.mrb[12].mxu1 }
 0x10c   : > { %1708 = vst [vmem:[%s2548_s24 + $0x40] sm:$0xff] %v1644_v35  ;;  %v1646_v41 = vmax.f32 %v1582_v36, 0.0  ;;  %v891_v42 = vmul.f32 %v2513_v57, %v738_v39  ;;  %v1444_v43 = vmul.f32 %v2515_v58, %v1291_v40  ;;  %v740_v44 = vpop.f32.mrb[13].mxu0  ;;  %v1293_v45 = vpop.f32.mrb[13].mxu1 }
 0x10d   : > { %1709 = vst [vmem:[%s2548_s24 + $0x48] sm:$0xff] %v1645_v37  ;;  %v1647_v46 = vmax.f32 %v1583_v38, 0.0  ;;  %v892_v47 = vmul.f32 %v2517_v59, %v740_v44  ;;  %v1445_v48 = vmul.f32 %v2519_v60, %v1293_v45  ;;  %v742_v49 = vpop.f32.mrb[14].mxu0  ;;  %v1295_v50 = vpop.f32.mrb[14].mxu1 }
 0x10e   : > { %1710 = vst [vmem:[%s2548_s24 + $0x50] sm:$0xff] %v1646_v41  ;;  %v967_v51 = vadd.f32 %v2521_v61, %v891_v42  ;;  %v1520_v52 = vadd.f32 %v2523_v62, %v1444_v43  ;;  %v893_v53 = vmul.f32 %v2513_v57, %v742_v49  ;;  %v1446_v54 = vmul.f32 %v2515_v58, %v1295_v50  ;;  %v744_v55 = vpop.f32.mrb[15].mxu0  ;;  %v1297_v56 = vpop.f32.mrb[15].mxu1 }
 0x10f   : > { %1711 = vst [vmem:[%s2548_s24 + $0x58] sm:$0xff] %v1647_v46  ;;  %v968_v63 = vadd.f32 %v2526_v1, %v892_v47  ;;  %v1521_v0 = vadd.f32 %v2528_v2, %v1445_v48  ;;  %v894_v3 = vmul.f32 %v2517_v59, %v744_v55  ;;  %v1447_v4 = vmul.f32 %v2519_v60, %v1297_v56 }
 0x110   : > { %v1584_v5 = vadd.f32 %v1520_v52, %v967_v51  ;;  %v969_v6 = vadd.f32 %v2521_v61, %v893_v53  ;;  %v1522_v7 = vadd.f32 %v2523_v62, %v1446_v54 }
 0x111   : > { %v1585_v8 = vadd.f32 %v1521_v0, %v968_v63  ;;  %v970_v9 = vadd.f32 %v2526_v1, %v894_v3  ;;  %v1523_v10 = vadd.f32 %v2528_v2, %v1447_v4 }
 0x112   : > { %v1648_v11 = vmax.f32 %v1584_v5, 0.0  ;;  %v1586_v12 = vadd.f32 %v1522_v7, %v969_v6 }
 0x113   : > { %v1649_v13 = vmax.f32 %v1585_v8, 0.0  ;;  %v1587_v14 = vadd.f32 %v1523_v10, %v970_v9  ;;  %v748_v15 = vpop.f32.mrb[16].mxu0  ;;  %v1301_v16 = vpop.f32.mrb[16].mxu1 }
 0x114   : > { %1712 = vst [vmem:[%s2548_s24 + $0x60] sm:$0xff] %v1648_v11  ;;  %v1650_v17 = vmax.f32 %v1586_v12, 0.0  ;;  %v895_v18 = vmul.f32 %v2513_v57, %v748_v15  ;;  %v1448_v19 = vmul.f32 %v2515_v58, %v1301_v16  ;;  %v750_v20 = vpop.f32.mrb[17].mxu0  ;;  %v1303_v21 = vpop.f32.mrb[17].mxu1 }
 0x115   : > { %1713 = vst [vmem:[%s2548_s24 + $0x68] sm:$0xff] %v1649_v13  ;;  %v1651_v22 = vmax.f32 %v1587_v14, 0.0  ;;  %v896_v23 = vmul.f32 %v2517_v59, %v750_v20  ;;  %v1449_v24 = vmul.f32 %v2519_v60, %v1303_v21  ;;  %v752_v25 = vpop.f32.mrb[18].mxu0  ;;  %v1305_v26 = vpop.f32.mrb[18].mxu1 }
 0x116   : > { %1714 = vst [vmem:[%s2548_s24 + $0x70] sm:$0xff] %v1650_v17  ;;  %v971_v27 = vadd.f32 %v2521_v61, %v895_v18  ;;  %v1524_v28 = vadd.f32 %v2523_v62, %v1448_v19  ;;  %v897_v29 = vmul.f32 %v2513_v57, %v752_v25  ;;  %v1450_v30 = vmul.f32 %v2515_v58, %v1305_v26  ;;  %v754_v31 = vpop.f32.mrb[19].mxu0  ;;  %v1307_v32 = vpop.f32.mrb[19].mxu1 }
 0x117   : > { %1715 = vst [vmem:[%s2548_s24 + $0x78] sm:$0xff] %v1651_v22  ;;  %v972_v33 = vadd.f32 %v2526_v1, %v896_v23  ;;  %v1525_v34 = vadd.f32 %v2528_v2, %v1449_v24  ;;  %v898_v35 = vmul.f32 %v2517_v59, %v754_v31  ;;  %v1451_v36 = vmul.f32 %v2519_v60, %v1307_v32 }
 0x118   : > { %v1588_v37 = vadd.f32 %v1524_v28, %v971_v27  ;;  %v973_v38 = vadd.f32 %v2521_v61, %v897_v29  ;;  %v1526_v39 = vadd.f32 %v2523_v62, %v1450_v30 }
 0x119   : > { %v1589_v40 = vadd.f32 %v1525_v34, %v972_v33  ;;  %v974_v41 = vadd.f32 %v2526_v1, %v898_v35  ;;  %v1527_v42 = vadd.f32 %v2528_v2, %v1451_v36 }
 0x11a   : > { %v1652_v43 = vmax.f32 %v1588_v37, 0.0  ;;  %v1590_v44 = vadd.f32 %v1526_v39, %v973_v38 }
 0x11b   : > { %v1653_v45 = vmax.f32 %v1589_v40, 0.0  ;;  %v1591_v46 = vadd.f32 %v1527_v42, %v974_v41  ;;  %v758_v47 = vpop.f32.mrb[20].mxu0  ;;  %v1311_v48 = vpop.f32.mrb[20].mxu1 }
 0x11c   : > { %1716 = vst [vmem:[%s2548_s24 + $0x80] sm:$0xff] %v1652_v43  ;;  %v1654_v49 = vmax.f32 %v1590_v44, 0.0  ;;  %v899_v50 = vmul.f32 %v2513_v57, %v758_v47  ;;  %v1452_v51 = vmul.f32 %v2515_v58, %v1311_v48  ;;  %v760_v52 = vpop.f32.mrb[21].mxu0  ;;  %v1313_v53 = vpop.f32.mrb[21].mxu1 }
 0x11d   : > { %1717 = vst [vmem:[%s2548_s24 + $0x88] sm:$0xff] %v1653_v45  ;;  %v1655_v54 = vmax.f32 %v1591_v46, 0.0  ;;  %v900_v55 = vmul.f32 %v2517_v59, %v760_v52  ;;  %v1453_v56 = vmul.f32 %v2519_v60, %v1313_v53  ;;  %v762_v63 = vpop.f32.mrb[22].mxu0  ;;  %v1315_v0 = vpop.f32.mrb[22].mxu1 }
 0x11e   : > { %1718 = vst [vmem:[%s2548_s24 + $0x90] sm:$0xff] %v1654_v49  ;;  %v975_v3 = vadd.f32 %v2521_v61, %v899_v50  ;;  %v1528_v4 = vadd.f32 %v2523_v62, %v1452_v51  ;;  %v901_v5 = vmul.f32 %v2513_v57, %v762_v63  ;;  %v1454_v6 = vmul.f32 %v2515_v58, %v1315_v0  ;;  %v764_v7 = vpop.f32.mrb[23].mxu0  ;;  %v1317_v8 = vpop.f32.mrb[23].mxu1 }
 0x11f   : > { %1719 = vst [vmem:[%s2548_s24 + $0x98] sm:$0xff] %v1655_v54  ;;  %v976_v9 = vadd.f32 %v2526_v1, %v900_v55  ;;  %v1529_v10 = vadd.f32 %v2528_v2, %v1453_v56  ;;  %v902_v11 = vmul.f32 %v2517_v59, %v764_v7  ;;  %v1455_v12 = vmul.f32 %v2519_v60, %v1317_v8 }
 0x120   : > { %v1592_v13 = vadd.f32 %v1528_v4, %v975_v3  ;;  %v977_v14 = vadd.f32 %v2521_v61, %v901_v5  ;;  %v1530_v15 = vadd.f32 %v2523_v62, %v1454_v6 }
 0x121   : > { %v1593_v16 = vadd.f32 %v1529_v10, %v976_v9  ;;  %v978_v17 = vadd.f32 %v2526_v1, %v902_v11  ;;  %v1531_v18 = vadd.f32 %v2528_v2, %v1455_v12 }
 0x122   : > { %v1656_v19 = vmax.f32 %v1592_v13, 0.0  ;;  %v1594_v20 = vadd.f32 %v1530_v15, %v977_v14 }
 0x123   : > { %v1657_v21 = vmax.f32 %v1593_v16, 0.0  ;;  %v1595_v22 = vadd.f32 %v1531_v18, %v978_v17  ;;  %v768_v23 = vpop.f32.mrb[24].mxu0  ;;  %v1321_v24 = vpop.f32.mrb[24].mxu1 }
 0x124   : > { %1720 = vst [vmem:[%s2548_s24 + $0xa0] sm:$0xff] %v1656_v19  ;;  %v1658_v25 = vmax.f32 %v1594_v20, 0.0  ;;  %v903_v26 = vmul.f32 %v2513_v57, %v768_v23  ;;  %v1456_v27 = vmul.f32 %v2515_v58, %v1321_v24  ;;  %v770_v28 = vpop.f32.mrb[25].mxu0  ;;  %v1323_v29 = vpop.f32.mrb[25].mxu1 }
 0x125   : > { %1721 = vst [vmem:[%s2548_s24 + $0xa8] sm:$0xff] %v1657_v21  ;;  %v1659_v30 = vmax.f32 %v1595_v22, 0.0  ;;  %v904_v31 = vmul.f32 %v2517_v59, %v770_v28  ;;  %v1457_v32 = vmul.f32 %v2519_v60, %v1323_v29  ;;  %v772_v33 = vpop.f32.mrb[26].mxu0  ;;  %v1325_v34 = vpop.f32.mrb[26].mxu1 }
 0x126   : > { %1722 = vst [vmem:[%s2548_s24 + $0xb0] sm:$0xff] %v1658_v25  ;;  %v979_v35 = vadd.f32 %v2521_v61, %v903_v26  ;;  %v1532_v36 = vadd.f32 %v2523_v62, %v1456_v27  ;;  %v905_v37 = vmul.f32 %v2513_v57, %v772_v33  ;;  %v1458_v38 = vmul.f32 %v2515_v58, %v1325_v34  ;;  %v774_v39 = vpop.f32.mrb[27].mxu0  ;;  %v1327_v40 = vpop.f32.mrb[27].mxu1 }
 0x127   : > { %1723 = vst [vmem:[%s2548_s24 + $0xb8] sm:$0xff] %v1659_v30  ;;  %v980_v41 = vadd.f32 %v2526_v1, %v904_v31  ;;  %v1533_v42 = vadd.f32 %v2528_v2, %v1457_v32  ;;  %v906_v43 = vmul.f32 %v2517_v59, %v774_v39  ;;  %v1459_v44 = vmul.f32 %v2519_v60, %v1327_v40 }
 0x128   : > { %v1596_v45 = vadd.f32 %v1532_v36, %v979_v35  ;;  %v981_v46 = vadd.f32 %v2521_v61, %v905_v37  ;;  %v1534_v47 = vadd.f32 %v2523_v62, %v1458_v38 }
 0x129   : > { %v1597_v48 = vadd.f32 %v1533_v42, %v980_v41  ;;  %v982_v49 = vadd.f32 %v2526_v1, %v906_v43  ;;  %v1535_v50 = vadd.f32 %v2528_v2, %v1459_v44 }
 0x12a   : > { %v1660_v51 = vmax.f32 %v1596_v45, 0.0  ;;  %v1598_v52 = vadd.f32 %v1534_v47, %v981_v46 }
 0x12b   : > { %v1661_v53 = vmax.f32 %v1597_v48, 0.0  ;;  %v1599_v54 = vadd.f32 %v1535_v50, %v982_v49  ;;  %v778_v55 = vpop.f32.mrb[28].mxu0  ;;  %v1331_v56 = vpop.f32.mrb[28].mxu1 }
 0x12c   : > { %1724 = vst [vmem:[%s2548_s24 + $0xc0] sm:$0xff] %v1660_v51  ;;  %v1662_v63 = vmax.f32 %v1598_v52, 0.0  ;;  %v907_v0 = vmul.f32 %v2513_v57, %v778_v55  ;;  %v1460_v3 = vmul.f32 %v2515_v58, %v1331_v56  ;;  %v780_v4 = vpop.f32.mrb[29].mxu0  ;;  %v1333_v5 = vpop.f32.mrb[29].mxu1 }
 0x12d   : > { %1725 = vst [vmem:[%s2548_s24 + $0xc8] sm:$0xff] %v1661_v53  ;;  %v1663_v6 = vmax.f32 %v1599_v54, 0.0  ;;  %v908_v7 = vmul.f32 %v2517_v59, %v780_v4  ;;  %v1461_v8 = vmul.f32 %v2519_v60, %v1333_v5  ;;  %v782_v9 = vpop.f32.mrb[30].mxu0  ;;  %v1335_v10 = vpop.f32.mrb[30].mxu1 }
 0x12e   : > { %1726 = vst [vmem:[%s2548_s24 + $0xd0] sm:$0xff] %v1662_v63  ;;  %v983_v11 = vadd.f32 %v2521_v61, %v907_v0  ;;  %v1536_v12 = vadd.f32 %v2523_v62, %v1460_v3  ;;  %v909_v13 = vmul.f32 %v2513_v57, %v782_v9  ;;  %v1462_v14 = vmul.f32 %v2515_v58, %v1335_v10  ;;  %v784_v15 = vpop.f32.mrb[31].mxu0  ;;  %v1337_v16 = vpop.f32.mrb[31].mxu1 }
 0x12f   : > { %1727 = vst [vmem:[%s2548_s24 + $0xd8] sm:$0xff] %v1663_v6  ;;  %v984_v17 = vadd.f32 %v2526_v1, %v908_v7  ;;  %v1537_v18 = vadd.f32 %v2528_v2, %v1461_v8  ;;  %v910_v19 = vmul.f32 %v2517_v59, %v784_v15  ;;  %v1463_v20 = vmul.f32 %v2519_v60, %v1337_v16 }
 0x130   : > { %v1600_v21 = vadd.f32 %v1536_v12, %v983_v11  ;;  %v985_v22 = vadd.f32 %v2521_v61, %v909_v13  ;;  %v1538_v23 = vadd.f32 %v2523_v62, %v1462_v14 }
 0x131   : > { %v1601_v24 = vadd.f32 %v1537_v18, %v984_v17  ;;  %v986_v25 = vadd.f32 %v2526_v1, %v910_v19  ;;  %v1539_v26 = vadd.f32 %v2528_v2, %v1463_v20 }
 0x132   : > { %v1664_v27 = vmax.f32 %v1600_v21, 0.0  ;;  %v1602_v28 = vadd.f32 %v1538_v23, %v985_v22 }
 0x133   : > { %v1665_v29 = vmax.f32 %v1601_v24, 0.0  ;;  %v1603_v30 = vadd.f32 %v1539_v26, %v986_v25  ;;  %v788_v31 = vpop.f32.mrb[32].mxu0  ;;  %v1341_v32 = vpop.f32.mrb[32].mxu1 }
 0x134   : > { %1728 = vst [vmem:[%s2548_s24 + $0xe0] sm:$0xff] %v1664_v27  ;;  %v1666_v33 = vmax.f32 %v1602_v28, 0.0  ;;  %v911_v34 = vmul.f32 %v2513_v57, %v788_v31  ;;  %v1464_v35 = vmul.f32 %v2515_v58, %v1341_v32  ;;  %v790_v36 = vpop.f32.mrb[33].mxu0  ;;  %v1343_v37 = vpop.f32.mrb[33].mxu1 }
 0x135   : > { %1729 = vst [vmem:[%s2548_s24 + $0xe8] sm:$0xff] %v1665_v29  ;;  %v1667_v38 = vmax.f32 %v1603_v30, 0.0  ;;  %v912_v39 = vmul.f32 %v2517_v59, %v790_v36  ;;  %v1465_v40 = vmul.f32 %v2519_v60, %v1343_v37  ;;  %v792_v41 = vpop.f32.mrb[34].mxu0  ;;  %v1345_v42 = vpop.f32.mrb[34].mxu1 }
 0x136   : > { %1730 = vst [vmem:[%s2548_s24 + $0xf0] sm:$0xff] %v1666_v33  ;;  %v987_v43 = vadd.f32 %v2521_v61, %v911_v34  ;;  %v1540_v44 = vadd.f32 %v2523_v62, %v1464_v35  ;;  %v913_v45 = vmul.f32 %v2513_v57, %v792_v41  ;;  %v1466_v46 = vmul.f32 %v2515_v58, %v1345_v42  ;;  %v794_v47 = vpop.f32.mrb[35].mxu0  ;;  %v1347_v48 = vpop.f32.mrb[35].mxu1 }
 0x137   : > { %1731 = vst [vmem:[%s2548_s24 + $0xf8] sm:$0xff] %v1667_v38  ;;  %v988_v49 = vadd.f32 %v2526_v1, %v912_v39  ;;  %v1541_v50 = vadd.f32 %v2528_v2, %v1465_v40  ;;  %v914_v51 = vmul.f32 %v2517_v59, %v794_v47  ;;  %v1467_v52 = vmul.f32 %v2519_v60, %v1347_v48 }
 0x138   : > { %v1604_v53 = vadd.f32 %v1540_v44, %v987_v43  ;;  %v989_v54 = vadd.f32 %v2521_v61, %v913_v45  ;;  %v1542_v55 = vadd.f32 %v2523_v62, %v1466_v46 }
 0x139   : > { %v1605_v56 = vadd.f32 %v1541_v50, %v988_v49  ;;  %v990_v63 = vadd.f32 %v2526_v1, %v914_v51  ;;  %v1543_v0 = vadd.f32 %v2528_v2, %v1467_v52 }
 0x13a   : > { %v1668_v3 = vmax.f32 %v1604_v53, 0.0  ;;  %v1606_v4 = vadd.f32 %v1542_v55, %v989_v54 }
 0x13b   : > { %v1669_v5 = vmax.f32 %v1605_v56, 0.0  ;;  %v1607_v6 = vadd.f32 %v1543_v0, %v990_v63  ;;  %v798_v7 = vpop.f32.mrb[36].mxu0  ;;  %v1351_v8 = vpop.f32.mrb[36].mxu1 }
 0x13c   : > { %1732 = vst [vmem:[%s2548_s24 + $0x100] sm:$0xff] %v1668_v3  ;;  %v1670_v9 = vmax.f32 %v1606_v4, 0.0  ;;  %v915_v10 = vmul.f32 %v2513_v57, %v798_v7  ;;  %v1468_v11 = vmul.f32 %v2515_v58, %v1351_v8  ;;  %v800_v12 = vpop.f32.mrb[37].mxu0  ;;  %v1353_v13 = vpop.f32.mrb[37].mxu1 }
 0x13d   : > { %1733 = vst [vmem:[%s2548_s24 + $0x108] sm:$0xff] %v1669_v5  ;;  %v1671_v14 = vmax.f32 %v1607_v6, 0.0  ;;  %v916_v15 = vmul.f32 %v2517_v59, %v800_v12  ;;  %v1469_v16 = vmul.f32 %v2519_v60, %v1353_v13  ;;  %v802_v17 = vpop.f32.mrb[38].mxu0  ;;  %v1355_v18 = vpop.f32.mrb[38].mxu1 }
 0x13e   : > { %1734 = vst [vmem:[%s2548_s24 + $0x110] sm:$0xff] %v1670_v9  ;;  %v991_v19 = vadd.f32 %v2521_v61, %v915_v10  ;;  %v1544_v20 = vadd.f32 %v2523_v62, %v1468_v11  ;;  %v917_v21 = vmul.f32 %v2513_v57, %v802_v17  ;;  %v1470_v22 = vmul.f32 %v2515_v58, %v1355_v18  ;;  %v804_v23 = vpop.f32.mrb[39].mxu0  ;;  %v1357_v24 = vpop.f32.mrb[39].mxu1 }
 0x13f   : > { %1735 = vst [vmem:[%s2548_s24 + $0x118] sm:$0xff] %v1671_v14  ;;  %v992_v25 = vadd.f32 %v2526_v1, %v916_v15  ;;  %v1545_v26 = vadd.f32 %v2528_v2, %v1469_v16  ;;  %v918_v27 = vmul.f32 %v2517_v59, %v804_v23  ;;  %v1471_v28 = vmul.f32 %v2519_v60, %v1357_v24 }
 0x140   : > { %v1608_v29 = vadd.f32 %v1544_v20, %v991_v19  ;;  %v993_v30 = vadd.f32 %v2521_v61, %v917_v21  ;;  %v1546_v31 = vadd.f32 %v2523_v62, %v1470_v22 }
 0x141   : > { %v1609_v32 = vadd.f32 %v1545_v26, %v992_v25  ;;  %v994_v33 = vadd.f32 %v2526_v1, %v918_v27  ;;  %v1547_v34 = vadd.f32 %v2528_v2, %v1471_v28 }
 0x142   : > { %v1672_v35 = vmax.f32 %v1608_v29, 0.0  ;;  %v1610_v36 = vadd.f32 %v1546_v31, %v993_v30 }
 0x143   : > { %v1673_v37 = vmax.f32 %v1609_v32, 0.0  ;;  %v1611_v38 = vadd.f32 %v1547_v34, %v994_v33  ;;  %v808_v39 = vpop.f32.mrb[40].mxu0  ;;  %v1361_v40 = vpop.f32.mrb[40].mxu1 }
 0x144   : > { %1736 = vst [vmem:[%s2548_s24 + $0x120] sm:$0xff] %v1672_v35  ;;  %v1674_v41 = vmax.f32 %v1610_v36, 0.0  ;;  %v919_v42 = vmul.f32 %v2513_v57, %v808_v39  ;;  %v1472_v43 = vmul.f32 %v2515_v58, %v1361_v40  ;;  %v810_v44 = vpop.f32.mrb[41].mxu0  ;;  %v1363_v45 = vpop.f32.mrb[41].mxu1 }
 0x145   : > { %1737 = vst [vmem:[%s2548_s24 + $0x128] sm:$0xff] %v1673_v37  ;;  %v1675_v46 = vmax.f32 %v1611_v38, 0.0  ;;  %v920_v47 = vmul.f32 %v2517_v59, %v810_v44  ;;  %v1473_v48 = vmul.f32 %v2519_v60, %v1363_v45  ;;  %v812_v49 = vpop.f32.mrb[42].mxu0  ;;  %v1365_v50 = vpop.f32.mrb[42].mxu1 }
 0x146   : > { %1738 = vst [vmem:[%s2548_s24 + $0x130] sm:$0xff] %v1674_v41  ;;  %v995_v51 = vadd.f32 %v2521_v61, %v919_v42  ;;  %v1548_v52 = vadd.f32 %v2523_v62, %v1472_v43  ;;  %v921_v53 = vmul.f32 %v2513_v57, %v812_v49  ;;  %v1474_v54 = vmul.f32 %v2515_v58, %v1365_v50  ;;  %v814_v55 = vpop.f32.mrb[43].mxu0  ;;  %v1367_v56 = vpop.f32.mrb[43].mxu1 }
 0x147   : > { %1739 = vst [vmem:[%s2548_s24 + $0x138] sm:$0xff] %v1675_v46  ;;  %v996_v63 = vadd.f32 %v2526_v1, %v920_v47  ;;  %v1549_v0 = vadd.f32 %v2528_v2, %v1473_v48  ;;  %v922_v3 = vmul.f32 %v2517_v59, %v814_v55  ;;  %v1475_v4 = vmul.f32 %v2519_v60, %v1367_v56 }
 0x148   : > { %v1612_v5 = vadd.f32 %v1548_v52, %v995_v51  ;;  %v997_v6 = vadd.f32 %v2521_v61, %v921_v53  ;;  %v1550_v7 = vadd.f32 %v2523_v62, %v1474_v54 }
 0x149   : > { %v1613_v8 = vadd.f32 %v1549_v0, %v996_v63  ;;  %v998_v9 = vadd.f32 %v2526_v1, %v922_v3  ;;  %v1551_v10 = vadd.f32 %v2528_v2, %v1475_v4 }
 0x14a   : > { %v1676_v11 = vmax.f32 %v1612_v5, 0.0  ;;  %v1614_v12 = vadd.f32 %v1550_v7, %v997_v6 }
 0x14b   : > { %v1677_v13 = vmax.f32 %v1613_v8, 0.0  ;;  %v1615_v14 = vadd.f32 %v1551_v10, %v998_v9  ;;  %v818_v15 = vpop.f32.mrb[44].mxu0  ;;  %v1371_v16 = vpop.f32.mrb[44].mxu1 }
 0x14c   : > { %1740 = vst [vmem:[%s2548_s24 + $0x140] sm:$0xff] %v1676_v11  ;;  %v1678_v17 = vmax.f32 %v1614_v12, 0.0  ;;  %v923_v18 = vmul.f32 %v2513_v57, %v818_v15  ;;  %v1476_v19 = vmul.f32 %v2515_v58, %v1371_v16  ;;  %v820_v20 = vpop.f32.mrb[45].mxu0  ;;  %v1373_v21 = vpop.f32.mrb[45].mxu1 }
 0x14d   : > { %1741 = vst [vmem:[%s2548_s24 + $0x148] sm:$0xff] %v1677_v13  ;;  %v1679_v22 = vmax.f32 %v1615_v14, 0.0  ;;  %v924_v23 = vmul.f32 %v2517_v59, %v820_v20  ;;  %v1477_v24 = vmul.f32 %v2519_v60, %v1373_v21  ;;  %v822_v25 = vpop.f32.mrb[46].mxu0  ;;  %v1375_v26 = vpop.f32.mrb[46].mxu1 }
 0x14e   : > { %1742 = vst [vmem:[%s2548_s24 + $0x150] sm:$0xff] %v1678_v17  ;;  %v999_v27 = vadd.f32 %v2521_v61, %v923_v18  ;;  %v1552_v28 = vadd.f32 %v2523_v62, %v1476_v19  ;;  %v925_v29 = vmul.f32 %v2513_v57, %v822_v25  ;;  %v1478_v30 = vmul.f32 %v2515_v58, %v1375_v26  ;;  %v824_v31 = vpop.f32.mrb[47].mxu0  ;;  %v1377_v32 = vpop.f32.mrb[47].mxu1 }
 0x14f   : > { %1743 = vst [vmem:[%s2548_s24 + $0x158] sm:$0xff] %v1679_v22  ;;  %v1000_v33 = vadd.f32 %v2526_v1, %v924_v23  ;;  %v1553_v34 = vadd.f32 %v2528_v2, %v1477_v24  ;;  %v926_v35 = vmul.f32 %v2517_v59, %v824_v31  ;;  %v1479_v36 = vmul.f32 %v2519_v60, %v1377_v32 }
 0x150   : > { %v1616_v37 = vadd.f32 %v1552_v28, %v999_v27  ;;  %v1001_v38 = vadd.f32 %v2521_v61, %v925_v29  ;;  %v1554_v39 = vadd.f32 %v2523_v62, %v1478_v30 }
 0x151   : > { %v1617_v40 = vadd.f32 %v1553_v34, %v1000_v33  ;;  %v1002_v41 = vadd.f32 %v2526_v1, %v926_v35  ;;  %v1555_v42 = vadd.f32 %v2528_v2, %v1479_v36 }
 0x152   : > { %v1680_v43 = vmax.f32 %v1616_v37, 0.0  ;;  %v1618_v44 = vadd.f32 %v1554_v39, %v1001_v38 }
 0x153   : > { %v1681_v45 = vmax.f32 %v1617_v40, 0.0  ;;  %v1619_v46 = vadd.f32 %v1555_v42, %v1002_v41  ;;  %v828_v47 = vpop.f32.mrb[48].mxu0  ;;  %v1381_v48 = vpop.f32.mrb[48].mxu1 }
 0x154   : > { %1744 = vst [vmem:[%s2548_s24 + $0x160] sm:$0xff] %v1680_v43  ;;  %v1682_v49 = vmax.f32 %v1618_v44, 0.0  ;;  %v927_v50 = vmul.f32 %v2513_v57, %v828_v47  ;;  %v1480_v51 = vmul.f32 %v2515_v58, %v1381_v48  ;;  %v830_v52 = vpop.f32.mrb[49].mxu0  ;;  %v1383_v53 = vpop.f32.mrb[49].mxu1 }
 0x155   : > { %1745 = vst [vmem:[%s2548_s24 + $0x168] sm:$0xff] %v1681_v45  ;;  %v1683_v54 = vmax.f32 %v1619_v46, 0.0  ;;  %v928_v55 = vmul.f32 %v2517_v59, %v830_v52  ;;  %v1481_v56 = vmul.f32 %v2519_v60, %v1383_v53  ;;  %v832_v63 = vpop.f32.mrb[50].mxu0  ;;  %v1385_v0 = vpop.f32.mrb[50].mxu1 }
 0x156   : > { %1746 = vst [vmem:[%s2548_s24 + $0x170] sm:$0xff] %v1682_v49  ;;  %v1003_v3 = vadd.f32 %v2521_v61, %v927_v50  ;;  %v1556_v4 = vadd.f32 %v2523_v62, %v1480_v51  ;;  %v929_v5 = vmul.f32 %v2513_v57, %v832_v63  ;;  %v1482_v6 = vmul.f32 %v2515_v58, %v1385_v0  ;;  %v834_v7 = vpop.f32.mrb[51].mxu0  ;;  %v1387_v8 = vpop.f32.mrb[51].mxu1 }
 0x157   : > { %1747 = vst [vmem:[%s2548_s24 + $0x178] sm:$0xff] %v1683_v54  ;;  %v1004_v9 = vadd.f32 %v2526_v1, %v928_v55  ;;  %v1557_v10 = vadd.f32 %v2528_v2, %v1481_v56  ;;  %v930_v11 = vmul.f32 %v2517_v59, %v834_v7  ;;  %v1483_v12 = vmul.f32 %v2519_v60, %v1387_v8 }
 0x158   : > { %v1620_v13 = vadd.f32 %v1556_v4, %v1003_v3  ;;  %v1005_v14 = vadd.f32 %v2521_v61, %v929_v5  ;;  %v1558_v15 = vadd.f32 %v2523_v62, %v1482_v6 }
 0x159   : > { %v1621_v16 = vadd.f32 %v1557_v10, %v1004_v9  ;;  %v1006_v17 = vadd.f32 %v2526_v1, %v930_v11  ;;  %v1559_v18 = vadd.f32 %v2528_v2, %v1483_v12 }
 0x15a   : > { %v1684_v19 = vmax.f32 %v1620_v13, 0.0  ;;  %v1622_v20 = vadd.f32 %v1558_v15, %v1005_v14 }
 0x15b   : > { %v1685_v21 = vmax.f32 %v1621_v16, 0.0  ;;  %v1623_v22 = vadd.f32 %v1559_v18, %v1006_v17  ;;  %v838_v23 = vpop.f32.mrb[52].mxu0  ;;  %v1391_v24 = vpop.f32.mrb[52].mxu1 }
 0x15c   : > { %1748 = vst [vmem:[%s2548_s24 + $0x180] sm:$0xff] %v1684_v19  ;;  %v1686_v25 = vmax.f32 %v1622_v20, 0.0  ;;  %v931_v26 = vmul.f32 %v2513_v57, %v838_v23  ;;  %v1484_v27 = vmul.f32 %v2515_v58, %v1391_v24  ;;  %v840_v28 = vpop.f32.mrb[53].mxu0  ;;  %v1393_v29 = vpop.f32.mrb[53].mxu1 }
 0x15d   : > { %1749 = vst [vmem:[%s2548_s24 + $0x188] sm:$0xff] %v1685_v21  ;;  %v1687_v30 = vmax.f32 %v1623_v22, 0.0  ;;  %v932_v31 = vmul.f32 %v2517_v59, %v840_v28  ;;  %v1485_v32 = vmul.f32 %v2519_v60, %v1393_v29  ;;  %v842_v33 = vpop.f32.mrb[54].mxu0  ;;  %v1395_v34 = vpop.f32.mrb[54].mxu1 }
 0x15e   : > { %1750 = vst [vmem:[%s2548_s24 + $0x190] sm:$0xff] %v1686_v25  ;;  %v1007_v35 = vadd.f32 %v2521_v61, %v931_v26  ;;  %v1560_v36 = vadd.f32 %v2523_v62, %v1484_v27  ;;  %v933_v37 = vmul.f32 %v2513_v57, %v842_v33  ;;  %v1486_v38 = vmul.f32 %v2515_v58, %v1395_v34  ;;  %v844_v39 = vpop.f32.mrb[55].mxu0  ;;  %v1397_v40 = vpop.f32.mrb[55].mxu1 }
 0x15f   : > { %1751 = vst [vmem:[%s2548_s24 + $0x198] sm:$0xff] %v1687_v30  ;;  %v1008_v41 = vadd.f32 %v2526_v1, %v932_v31  ;;  %v1561_v42 = vadd.f32 %v2528_v2, %v1485_v32  ;;  %v934_v43 = vmul.f32 %v2517_v59, %v844_v39  ;;  %v1487_v44 = vmul.f32 %v2519_v60, %v1397_v40 }
 0x160   : > { %v1624_v45 = vadd.f32 %v1560_v36, %v1007_v35  ;;  %v1009_v46 = vadd.f32 %v2521_v61, %v933_v37  ;;  %v1562_v47 = vadd.f32 %v2523_v62, %v1486_v38 }
 0x161   : > { %v1625_v48 = vadd.f32 %v1561_v42, %v1008_v41  ;;  %v1010_v49 = vadd.f32 %v2526_v1, %v934_v43  ;;  %v1563_v50 = vadd.f32 %v2528_v2, %v1487_v44 }
 0x162   : > { %v1688_v51 = vmax.f32 %v1624_v45, 0.0  ;;  %v1626_v52 = vadd.f32 %v1562_v47, %v1009_v46 }
 0x163   : > { %v1689_v53 = vmax.f32 %v1625_v48, 0.0  ;;  %v1627_v54 = vadd.f32 %v1563_v50, %v1010_v49  ;;  %v848_v55 = vpop.f32.mrb[56].mxu0  ;;  %v1401_v56 = vpop.f32.mrb[56].mxu1 }
 0x164   : > { %1752 = vst [vmem:[%s2548_s24 + $0x1a0] sm:$0xff] %v1688_v51  ;;  %v1690_v63 = vmax.f32 %v1626_v52, 0.0  ;;  %v935_v0 = vmul.f32 %v2513_v57, %v848_v55  ;;  %v1488_v3 = vmul.f32 %v2515_v58, %v1401_v56  ;;  %v850_v4 = vpop.f32.mrb[57].mxu0  ;;  %v1403_v5 = vpop.f32.mrb[57].mxu1 }
 0x165   : > { %1753 = vst [vmem:[%s2548_s24 + $0x1a8] sm:$0xff] %v1689_v53  ;;  %v1691_v6 = vmax.f32 %v1627_v54, 0.0  ;;  %v936_v7 = vmul.f32 %v2517_v59, %v850_v4  ;;  %v1489_v8 = vmul.f32 %v2519_v60, %v1403_v5  ;;  %v852_v9 = vpop.f32.mrb[58].mxu0  ;;  %v1405_v10 = vpop.f32.mrb[58].mxu1 }
 0x166   : > { %1754 = vst [vmem:[%s2548_s24 + $0x1b0] sm:$0xff] %v1690_v63  ;;  %v1011_v11 = vadd.f32 %v2521_v61, %v935_v0  ;;  %v1564_v12 = vadd.f32 %v2523_v62, %v1488_v3  ;;  %v937_v13 = vmul.f32 %v2513_v57, %v852_v9  ;;  %v1490_v14 = vmul.f32 %v2515_v58, %v1405_v10  ;;  %v854_v15 = vpop.f32.mrb[59].mxu0  ;;  %v1407_v16 = vpop.f32.mrb[59].mxu1 }
 0x167   : > { %1755 = vst [vmem:[%s2548_s24 + $0x1b8] sm:$0xff] %v1691_v6  ;;  %v1012_v17 = vadd.f32 %v2526_v1, %v936_v7  ;;  %v1565_v18 = vadd.f32 %v2528_v2, %v1489_v8  ;;  %v938_v19 = vmul.f32 %v2517_v59, %v854_v15  ;;  %v1491_v20 = vmul.f32 %v2519_v60, %v1407_v16 }
 0x168   : > { %v1628_v21 = vadd.f32 %v1564_v12, %v1011_v11  ;;  %v1013_v22 = vadd.f32 %v2521_v61, %v937_v13  ;;  %v1566_v23 = vadd.f32 %v2523_v62, %v1490_v14 }
 0x169   : > { %v1629_v24 = vadd.f32 %v1565_v18, %v1012_v17  ;;  %v1014_v25 = vadd.f32 %v2526_v1, %v938_v19  ;;  %v1567_v26 = vadd.f32 %v2528_v2, %v1491_v20 }
 0x16a   : > { %v1692_v27 = vmax.f32 %v1628_v21, 0.0  ;;  %v1630_v28 = vadd.f32 %v1566_v23, %v1013_v22 }
 0x16b   : > { %v1693_v29 = vmax.f32 %v1629_v24, 0.0  ;;  %v1631_v30 = vadd.f32 %v1567_v26, %v1014_v25  ;;  %v858_v31 = vpop.f32.mrb[60].mxu0  ;;  %v1411_v32 = vpop.f32.mrb[60].mxu1 }
 0x16c   : > { %1756 = vst [vmem:[%s2548_s24 + $0x1c0] sm:$0xff] %v1692_v27  ;;  %v1694_v33 = vmax.f32 %v1630_v28, 0.0  ;;  %v939_v34 = vmul.f32 %v2513_v57, %v858_v31  ;;  %v1492_v35 = vmul.f32 %v2515_v58, %v1411_v32  ;;  %v860_v36 = vpop.f32.mrb[61].mxu0  ;;  %v1413_v37 = vpop.f32.mrb[61].mxu1 }
 0x16d   : > { %1757 = vst [vmem:[%s2548_s24 + $0x1c8] sm:$0xff] %v1693_v29  ;;  %v1695_v38 = vmax.f32 %v1631_v30, 0.0  ;;  %v940_v39 = vmul.f32 %v2517_v59, %v860_v36  ;;  %v1493_v40 = vmul.f32 %v2519_v60, %v1413_v37  ;;  %v862_v41 = vpop.f32.mrb[62].mxu0  ;;  %v1415_v42 = vpop.f32.mrb[62].mxu1 }
 0x16e   : > { %1758 = vst [vmem:[%s2548_s24 + $0x1d0] sm:$0xff] %v1694_v33  ;;  %v1015_v43 = vadd.f32 %v2521_v61, %v939_v34  ;;  %v1568_v44 = vadd.f32 %v2523_v62, %v1492_v35  ;;  %v941_v45 = vmul.f32 %v2513_v57, %v862_v41  ;;  %v1494_v46 = vmul.f32 %v2515_v58, %v1415_v42  ;;  %v864_v47 = vpop.f32.mrb[63].mxu0  ;;  %v1417_v48 = vpop.f32.mrb[63].mxu1 }
 0x16f   : > { %1759 = vst [vmem:[%s2548_s24 + $0x1d8] sm:$0xff] %v1695_v38  ;;  %v1016_v49 = vadd.f32 %v2526_v1, %v940_v39  ;;  %v1569_v50 = vadd.f32 %v2528_v2, %v1493_v40  ;;  %v942_v51 = vmul.f32 %v2517_v59, %v864_v47  ;;  %v1495_v52 = vmul.f32 %v2519_v60, %v1417_v48 }
 0x170   : > { %v1632_v53 = vadd.f32 %v1568_v44, %v1015_v43  ;;  %v1017_v54 = vadd.f32 %v2521_v61, %v941_v45  ;;  %v1570_v57 = vadd.f32 %v2523_v62, %v1494_v46 }
 0x171   : > { %v1633_v58 = vadd.f32 %v1569_v50, %v1016_v49  ;;  %v1018_v55 = vadd.f32 %v2526_v1, %v942_v51  ;;  %v1571_v56 = vadd.f32 %v2528_v2, %v1495_v52 }
 0x172   : > { %v1696_v59 = vmax.f32 %v1632_v53, 0.0  ;;  %v1634_v63 = vadd.f32 %v1570_v57, %v1017_v54 }
 0x173   : > { %v1697_v60 = vmax.f32 %v1633_v58, 0.0  ;;  %v1635_v0 = vadd.f32 %v1571_v56, %v1018_v55 }
 0x174   : > { %1760 = vst [vmem:[%s2548_s24 + $0x1e0] sm:$0xff] %v1696_v59  ;;  %v1698_v3 = vmax.f32 %v1634_v63, 0.0 }
 0x175   : > { %1761 = vst [vmem:[%s2548_s24 + $0x1e8] sm:$0xff] %v1697_v60  ;;  %v1699_v61 = vmax.f32 %v1635_v0, 0.0 }
 0x176   : > { %1762 = vst [vmem:[%s2548_s24 + $0x1f0] sm:$0xff] %v1698_v3 }
 0x177   : > { %1763 = vst [vmem:[%s2548_s24 + $0x1f8] sm:$0xff] %v1699_v61 }
 0x178   : > { %2175 = shalt.err (!%p2172_p5)
}
 0x179   : > { %s2176_s22 = scalar_lea.hbm %s2856_s12, 8192  ;;  %s2180_s21 = scalar_lea.hbm %s2919_s8, 16384 }
 0x17a   : > { %p2177_p6 = scmp.ne.s32.totalorder %s2856_s12, %s2176_s22  ;;  %p2181_p10 = scmp.lt.u32.totalorder %s2856_s12, %s2919_s8 }
 0x17b   : > { %p2182_p11 = scmp.lt.u32.totalorder %s2180_s21, %s2176_s22  ;;  %p2184_p13 = scmp.lt.u32.totalorder %s2176_s22, %s2856_s12 }
 0x17c   : > { %p2178_p7 = pnand %p2177_p6, %p2331_p4 }
 0x17d   : > { %p2183_p12 = por %p2182_p11, %p2181_p10 }
 0x17e   : > { %p2179_p9 = pneg %p2178_p7 }
 0x17f   : > { %p2185_p0 = por %p2184_p13, %p2183_p12 }
 0x181   : > { %p2186_p1 = pnand %p2185_p0, %p2179_p9 }
 0x183   : > { %2189 = shalt.err (!%p2186_p1)
}
 0x184   : > { %s2244_s16 = smov 256   ;;  %s2245_s14 = smov 16  }
 0x185   : > { %2048 = dma.vmem_to_hbm [thread:$0]  (%p2331_p4), %s2858_s11, 8192, %s2856_s12, %s2865_s30, %s2244_s16, %s2244_s16, %s2245_s14  }
 0x186 PF: > { %p2054_p2 = scmp.ge.s32.totalorder %s2240_s10, 2  ;;  %s1796_s19 = sand.u32 1, %s2220_s27  }
 0x187   : > { %s1797_s20 = scalar_lea.sflag [#allocation3], %s1796_s19 }
 0x188   : > { %p2051_p3 = pnand %p2054_p2, %p2338_p8 }
 0x18a   : > { %2215 = dma.done.wait (!%p2051_p3), %s1797_s20, 8192  }
 0x18b   : > { %2217 = vsyncadd (!%p2051_p3), %s1797_s20, 4294959104  ;;  %s21_s10 = sadd.s32 1, %s2240_s10   ;;  %s2922_s27 = smov %s2224_s28 }
 0x18c   : > { %p18_p5 = scmp.ge.s32.totalorder %s21_s10, 4   ;;  %s2923_s28 = smov %s2228_s29 }
 0x18d   : > { %s2924_s29 = smov %s2344_s18  ;;  %s2925_s30 = smov %s2236_s9 }
 0x18e   : > { %s2926_s9 = smov %s2928_s13  ;;  %20 = sbr.rel (!%p18_p5) target bundleno = 4 (0x4), region = 108 }
 0x195   :  { %1802 = vsyncpa [#allocation3], 1 }
 0x196   :  { %1804 = vsyncpa [#allocation3 + $0x1], 1 }

// kernel: fpn_block_forward.2
= control target key start
LH: loop header
LB: loop body
LE: loop exit
PB: predicated region body
PF: predicated region fallthrough
CT: control target
= control target key end

     0   :  { %s5323_s24 = smov 0   ;;  %s6234_s0 = inlined_call_operand.vmem [shape: bf16[2,256,64], index: 0, kind: input, shape index: {}]   ;;  %s6235_s1 = inlined_call_operand.vmem [shape: bf16[64,64], index: 1, kind: input, shape index: {}]   ;;  %s6236_s2 = inlined_call_operand.vmem [shape: f32[1,64], index: 2, kind: input, shape index: {}]   ;;  %s6237_s3 = inlined_call_operand.vmem [shape: f32[1,64], index: 3, kind: input, shape index: {}]   ;;  %s6238_s4 = inlined_call_operand.vmem [shape: bf16[9,64,64], index: 4, kind: input, shape index: {}]   ;;  %s6239_s5 = inlined_call_operand.vmem [shape: f32[1,64], index: 5, kind: input, shape index: {}]   ;;  %s6240_s6 = inlined_call_operand.vmem [shape: f32[1,64], index: 6, kind: input, shape index: {}]   ;;  %s6241_s7 = inlined_call_operand.vmem [shape: bf16[2,256,64], index: 7, kind: output, shape index: {}]  }
   0x1 LB: > { %s3992_s25 = sadd.s32 4294967295, %s5280_s24   ;;  %p3996_p0 = scmp.ge.s32.totalorder %s5280_s24, 1  ;;  %s5280_s24 = sphi %s5323_s24, %s17_s24  }
   0x2   : > { %p237_p1 = scmp.lt.s32.totalorder %s5280_s24, 3 }
   0x4   : > { %p238_p2 = pnand %p3996_p0, %p237_p1 }
   0x5   : > { %v5218_v0 = vld [vmem:[%s6235_s1] sm:$0xff] (!%p238_p2)   ;;  %p269_p3 = scmp.lt.s32.totalorder (!%p238_p2), %s3992_s25, 1  ;;  %v5219_v1 = vld [vmem:[%s6235_s1 + $0x8] sm:$0xff] (!%p238_p2)   ;;  %vm424_vm0 = vcmask (!%p238_p2), 523264   ;;  %v5220_v2 = vld [vmem:[%s6235_s1 + $0x10] sm:$0xff] (!%p238_p2)   ;;  %v5282_v22 = vmov (!%p238_p2), 0.0  }
   0x6   : > { %241 = sbr.rel (%p238_p2) target bundleno = 792 (0x318), region = 48  ;;  %4553 = vmatprep.subr.bf16.mxu0 (!%p238_p2), %v5218_v0  ;;  %v5221_v4 = vld [vmem:[%s6235_s1 + $0x18] sm:$0xff] (!%p238_p2)   ;;  %v5238_v20 = vld [vmem:[%s6238_s4 + $0x20] sm:$0xff] (!%p238_p2)   ;;  %751 = vst.msk [vmem:[#allocation2 + $0x30] sm:$0xff] (!%p238_p2), %vm424_vm0, %v5282_v22  ;;  %752 = vst.msk [vmem:[#allocation2 + $0x38] sm:$0xff] (!%p238_p2), %vm424_vm0, %v5282_v22  ;;  %vm746_vm1 = vcmask (!%p238_p2), 517120  }
   0x7   : > { %4554 = vmatpush3.bf16.msra.mxu0 (!%p238_p2), %v5218_v0  ;;  %v5239_v21 = vld [vmem:[%s6238_s4 + $0x80] sm:$0xff] (!%p238_p2)   ;;  %744 = vst.msk [vmem:[#allocation2] sm:$0xff] (!%p238_p2), %vm424_vm0, %v5282_v22  ;;  %745 = vst.msk [vmem:[#allocation2 + $0x8] sm:$0xff] (!%p238_p2), %vm424_vm0, %v5282_v22  ;;  %v5240_v23 = vld [vmem:[%s6238_s4 + $0x28] sm:$0xff] (!%p238_p2)   ;;  %vm3904_vm2 = vcmask (!%p238_p2), 519168  }
   0x8   : > { %4555 = vmatprep.subr.bf16.mxu0 (!%p238_p2), %v5219_v1  ;;  %4753 = vmatprep.subr.bf16.mxu1 (!%p238_p2), %v5239_v21  ;;  %748 = vst.msk [vmem:[#allocation2 + $0x18] sm:$0xff] (!%p238_p2), %vm424_vm0, %v5282_v22  ;;  %749 = vst.msk [vmem:[#allocation2 + $0x20] sm:$0xff] (!%p238_p2), %vm424_vm0, %v5282_v22  ;;  %v5241_v24 = vld [vmem:[%s6238_s4 + $0x88] sm:$0xff] (!%p238_p2)   ;;  %v5242_v25 = vld [vmem:[%s6238_s4 + $0x30] sm:$0xff] (!%p238_p2)  }
   0x9   : > { %754 = vst.msk [vmem:[#allocation2 + $0x48] sm:$0xff] (!%p238_p2), %vm424_vm0, %v5282_v22  ;;  %755 = vst.msk [vmem:[#allocation2 + $0x50] sm:$0xff] (!%p238_p2), %vm424_vm0, %v5282_v22  ;;  %4754 = vmatpush3.bf16.msra.mxu1 (!%p238_p2), %v5239_v21  ;;  %v5243_v26 = vld [vmem:[%s6238_s4 + $0x90] sm:$0xff] (!%p238_p2)   ;;  %v5244_v27 = vld [vmem:[%s6238_s4 + $0x38] sm:$0xff] (!%p238_p2)  }
   0xa   : > { %757 = vst.msk [vmem:[#allocation2 + $0x60] sm:$0xff] (!%p238_p2), %vm424_vm0, %v5282_v22  ;;  %758 = vst.msk [vmem:[#allocation2 + $0x68] sm:$0xff] (!%p238_p2), %vm424_vm0, %v5282_v22  ;;  %4755 = vmatprep.subr.bf16.mxu1 (!%p238_p2), %v5241_v24  ;;  %v5245_v28 = vld [vmem:[%s6238_s4 + $0x98] sm:$0xff] (!%p238_p2)   ;;  %v5467_v32 = vld [vmem:[%s6238_s4 + $0xa0] sm:$0xff] (!%p238_p2)  }
   0xb   : > { %4556 = vmatpush3.bf16.msra.mxu0 (!%p238_p2), %v5219_v1  ;;  %760 = vst.msk [vmem:[#allocation2 + $0x78] sm:$0xff] (!%p238_p2), %vm424_vm0, %v5282_v22  ;;  %761 = vst.msk [vmem:[#allocation2 + $0x80] sm:$0xff] (!%p238_p2), %vm424_vm0, %v5282_v22  ;;  %v5473_v33 = vld [vmem:[%s6238_s4] sm:$0xff] (!%p238_p2)  }
   0xc   : > { %4557 = vmatprep.subr.bf16.mxu0 (!%p238_p2), %v5220_v2  ;;  %763 = vst.msk [vmem:[#allocation2 + $0x90] sm:$0xff] (!%p238_p2), %vm424_vm0, %v5282_v22  ;;  %764 = vst.msk [vmem:[#allocation2 + $0x98] sm:$0xff] (!%p238_p2), %vm424_vm0, %v5282_v22  ;;  %v5479_v34 = vld [vmem:[%s6236_s2] ss:$0 sm:$0xff] (!%p238_p2) }
   0xd   : > { %s6243_s25 = smov (!%p269_p3, %s3992_s25), 1  ;;  %766 = vst.msk [vmem:[#allocation2 + $0xa8] sm:$0xff] %vm424_vm0, %v5282_v22  ;;  %767 = vst.msk [vmem:[#allocation2 + $0xb0] sm:$0xff] %vm424_vm0, %v5282_v22  ;;  %4756 = vmatpush3.bf16.msra.mxu1 %v5241_v24  ;;  %v5484_v36 = vld [vmem:[%s6237_s3] ss:$0 sm:$0xff] }
   0xe   : > { %s4319_s9 = sshll.u32 %s6243_s25, 7  ;;  %769 = vst.msk [vmem:[#allocation2 + $0xc0] sm:$0xff] %vm424_vm0, %v5282_v22  ;;  %770 = vst.msk [vmem:[#allocation2 + $0xc8] sm:$0xff] %vm424_vm0, %v5282_v22  ;;  %4757 = vmatprep.subr.bf16.mxu1 %v5243_v26  ;;  %v888_v29 = vld [vmem:[#allocation2 + $0x1] sm:$0xff] }
   0xf   : > { %s5348_s12 = scalar_lea.vmem %s6234_s0, %s4319_s9  ;;  %4558 = vmatpush3.bf16.msra.mxu0 %v5220_v2  ;;  %772 = vst.msk [vmem:[#allocation2 + $0xd8] sm:$0xff] %vm424_vm0, %v5282_v22  ;;  %773 = vst.msk [vmem:[#allocation2 + $0xe0] sm:$0xff] %vm424_vm0, %v5282_v22  ;;  %s6083_s17 = scalar_lea.vmem %s6241_s7, %s4319_s9 }
  0x10   : > { %v5222_v3 = vld [vmem:[%s5348_s12] sm:$0xff]   ;;  %4559 = vmatprep.subr.bf16.mxu0 %v5221_v4  ;;  %v5223_v5 = vld [vmem:[%s5348_s12 + $0x8] sm:$0xff]   ;;  %v5224_v6 = vld [vmem:[%s5348_s12 + $0x10] sm:$0xff]   ;;  %775 = vst.msk [vmem:[#allocation2 + $0xf0] sm:$0xff] %vm424_vm0, %v5282_v22 }
  0x11   : > { %4561 = vmatprep.mubr.msk.bf16.mxu0 %vm424_vm0, %v5222_v3  ;;  %v5225_v7 = vld [vmem:[%s5348_s12 + $0x18] sm:$0xff]   ;;  %v5226_v8 = vld [vmem:[%s5348_s12 + $0x20] sm:$0xff]   ;;  %v5227_v9 = vld [vmem:[%s5348_s12 + $0x28] sm:$0xff]   ;;  %776 = vst.msk [vmem:[#allocation2 + $0xf8] sm:$0xff] %vm424_vm0, %v5282_v22  ;;  %4758 = vmatpush3.bf16.msra.mxu1 %v5243_v26 }
  0x12   : > { %v5228_v10 = vld [vmem:[%s5348_s12 + $0x30] sm:$0xff]   ;;  %v5229_v11 = vld [vmem:[%s5348_s12 + $0x38] sm:$0xff]   ;;  %v5230_v12 = vld [vmem:[%s5348_s12 + $0x40] sm:$0xff]   ;;  %778 = vst.msk [vmem:[#allocation2 + $0x108] sm:$0xff] %vm424_vm0, %v5282_v22  ;;  %4759 = vmatprep.subr.bf16.mxu1 %v5245_v28 }
  0x13   : > { %4560 = vmatpush3.bf16.msra.mxu0 %v5221_v4  ;;  %v5231_v13 = vld [vmem:[%s5348_s12 + $0x48] sm:$0xff]   ;;  %v5232_v14 = vld [vmem:[%s5348_s12 + $0x50] sm:$0xff]   ;;  %v5233_v15 = vld [vmem:[%s5348_s12 + $0x58] sm:$0xff]   ;;  %779 = vst.msk [vmem:[#allocation2 + $0x110] sm:$0xff] %vm424_vm0, %v5282_v22 }
  0x14   : > { %v5234_v16 = vld [vmem:[%s5348_s12 + $0x60] sm:$0xff]   ;;  %v5235_v17 = vld [vmem:[%s5348_s12 + $0x68] sm:$0xff]   ;;  %v5236_v18 = vld [vmem:[%s5348_s12 + $0x70] sm:$0xff]   ;;  %4593 = vmatprep.subr.bf16.mxu0 %v5238_v20  ;;  %781 = vst.msk [vmem:[#allocation2 + $0x120] sm:$0xff] %vm424_vm0, %v5282_v22 }
  0x15   : > { %v5237_v19 = vld [vmem:[%s5348_s12 + $0x78] sm:$0xff]   ;;  %782 = vst.msk [vmem:[#allocation2 + $0x128] sm:$0xff] %vm424_vm0, %v5282_v22  ;;  %784 = vst.msk [vmem:[#allocation2 + $0x138] sm:$0xff] %vm424_vm0, %v5282_v22  ;;  %4760 = vmatpush3.bf16.msra.mxu1 %v5245_v28  ;;  %v5252_v28 = vld [vmem:[%s6238_s4 + $0x10] sm:$0xff]  }
  0x16   : > { %4562 = vmatmul.mubr.msk.bf16.vlgmr.msra.gmra.mrb[0].mxu0 %vm424_vm0, %v5223_v5  ;;  %785 = vst.msk [vmem:[#allocation2 + $0x140] sm:$0xff] %vm424_vm0, %v5282_v22  ;;  %787 = vst.msk [vmem:[#allocation2 + $0x150] sm:$0xff] %vm424_vm0, %v5282_v22  ;;  %4793 = vmatprep.subr.bf16.mxu1 %v5467_v32 }
  0x17   : > { %4565 = vmatprep.mubr.msk.bf16.mxu0 %vm424_vm0, %v5224_v6  ;;  %4594 = vmatpush3.bf16.msra.mxu0 %v5238_v20  ;;  %788 = vst.msk [vmem:[#allocation2 + $0x158] sm:$0xff] %vm424_vm0, %v5282_v22  ;;  %790 = vst.msk [vmem:[#allocation2 + $0x168] sm:$0xff] %vm424_vm0, %v5282_v22 }
  0x18   : > { %791 = vst.msk [vmem:[#allocation2 + $0x170] sm:$0xff] %vm424_vm0, %v5282_v22  ;;  %793 = vst.msk [vmem:[#allocation2 + $0x180] sm:$0xff] %vm424_vm0, %v5282_v22  ;;  %4595 = vmatprep.subr.bf16.mxu0 %v5240_v23 }
  0x19   : > { %794 = vst.msk [vmem:[#allocation2 + $0x188] sm:$0xff] %vm424_vm0, %v5282_v22  ;;  %796 = vst.msk [vmem:[#allocation2 + $0x198] sm:$0xff] %vm424_vm0, %v5282_v22 }
  0x1a   : > { %797 = vst.msk [vmem:[#allocation2 + $0x1a0] sm:$0xff] %vm424_vm0, %v5282_v22 }
  0x1b   : > { %753 = vst.msk [vmem:[#allocation2 + $0x40] sm:$0x3] %vm746_vm1, %v5282_v22  ;;  %747 = vst.msk [vmem:[#allocation2 + $0x10] sm:$0x3] %vm746_vm1, %v5282_v22  ;;  %4596 = vmatpush3.bf16.msra.mxu0 %v5240_v23 }
  0x1c   : > { %750 = vst.msk [vmem:[#allocation2 + $0x28] sm:$0x3] %vm746_vm1, %v5282_v22  ;;  %756 = vst.msk [vmem:[#allocation2 + $0x58] sm:$0x3] %vm746_vm1, %v5282_v22  ;;  %4597 = vmatprep.subr.bf16.mxu0 %v5242_v25 }
  0x1d   : > { %759 = vst.msk [vmem:[#allocation2 + $0x70] sm:$0x3] %vm746_vm1, %v5282_v22  ;;  %762 = vst.msk [vmem:[#allocation2 + $0x88] sm:$0x3] %vm746_vm1, %v5282_v22 }
  0x1e   : > { %4566 = vmatmul.mubr.msk.bf16.gmra.mrb[4].mxu0 %vm424_vm0, %v5225_v7  ;;  %765 = vst.msk [vmem:[#allocation2 + $0xa0] sm:$0x3] %vm746_vm1, %v5282_v22  ;;  %768 = vst.msk [vmem:[#allocation2 + $0xb8] sm:$0x3] %vm746_vm1, %v5282_v22 }
  0x1f   : > { %4569 = vmatprep.mubr.msk.bf16.mxu0 %vm424_vm0, %v5226_v8  ;;  %771 = vst.msk [vmem:[#allocation2 + $0xd0] sm:$0x3] %vm746_vm1, %v5282_v22  ;;  %774 = vst.msk [vmem:[#allocation2 + $0xe8] sm:$0x3] %vm746_vm1, %v5282_v22  ;;  %4598 = vmatpush3.bf16.msra.mxu0 %v5242_v25 }
  0x20   : > { %777 = vst.msk [vmem:[#allocation2 + $0x100] sm:$0x3] %vm746_vm1, %v5282_v22  ;;  %780 = vst.msk [vmem:[#allocation2 + $0x118] sm:$0x3] %vm746_vm1, %v5282_v22  ;;  %4599 = vmatprep.subr.bf16.mxu0 %v5244_v27 }
  0x21   : > { %783 = vst.msk [vmem:[#allocation2 + $0x130] sm:$0x3] %vm746_vm1, %v5282_v22  ;;  %786 = vst.msk [vmem:[#allocation2 + $0x148] sm:$0x3] %vm746_vm1, %v5282_v22 }
  0x22   : > { %789 = vst.msk [vmem:[#allocation2 + $0x160] sm:$0x3] %vm746_vm1, %v5282_v22  ;;  %792 = vst.msk [vmem:[#allocation2 + $0x178] sm:$0x3] %vm746_vm1, %v5282_v22  ;;  %v889_v30 = vld [vmem:[#allocation2 + $0x9] sm:$0xff] }
  0x23   : > { %795 = vst.msk [vmem:[#allocation2 + $0x190] sm:$0x3] %vm746_vm1, %v5282_v22  ;;  %798 = vst.msk [vmem:[#allocation2 + $0x1a8] sm:$0x3] %vm746_vm1, %v5282_v22  ;;  %4600 = vmatpush3.bf16.msra.mxu0 %v5244_v27  ;;  %v920_v31 = vpack.c.bf16 %v889_v30, %v888_v29  ;;  %v5248_v27 = vld [vmem:[%s6238_s4 + $0xb0] sm:$0xff]  }
  0x24   : > { %4633 = vmatprep.subr.bf16.mxu0 %v5473_v33 }
  0x26   : > { %4570 = vmatmul.mubr.msk.bf16.gmra.mrb[8].mxu0 %vm424_vm0, %v5227_v9 }
  0x27   : > { %4573 = vmatprep.mubr.msk.bf16.mxu0 %vm424_vm0, %v5228_v10 }
  0x2e   : > { %4574 = vmatmul.mubr.msk.bf16.gmra.mrb[12].mxu0 %vm424_vm0, %v5229_v11 }
  0x2f   : > { %4577 = vmatprep.mubr.msk.bf16.mxu0 %vm424_vm0, %v5230_v12 }
  0x36   : > { %4578 = vmatmul.mubr.msk.bf16.gmra.mrb[16].mxu0 %vm424_vm0, %v5231_v13 }
  0x37   : > { %4581 = vmatprep.mubr.msk.bf16.mxu0 %vm424_vm0, %v5232_v14 }
  0x3e   : > { %4582 = vmatmul.mubr.msk.bf16.gmra.mrb[20].mxu0 %vm424_vm0, %v5233_v15 }
  0x3f   : > { %4585 = vmatprep.mubr.msk.bf16.mxu0 %vm424_vm0, %v5234_v16 }
  0x46   : > { %4586 = vmatmul.mubr.msk.bf16.gmra.mrb[24].mxu0 %vm424_vm0, %v5235_v17 }
  0x47   : > { %4589 = vmatprep.mubr.msk.bf16.mxu0 %vm424_vm0, %v5236_v18  ;;  %v5247_v18 = vld [vmem:[%s6238_s4 + $0xa8] sm:$0xff]  }
  0x4e   : > { %4590 = vmatmul.mubr.msk.bf16.gmra.mrb[28].mxu0 %vm424_vm0, %v5237_v19  ;;  %v5251_v19 = vld [vmem:[%s6238_s4 + $0x8] sm:$0xff]  }
  0x4f   : > { %4601 = vmatprep.mubr.msk.bf16.mxu0 %vm424_vm0, %v920_v31 }
  0xe9   : > { %v4563_v35 = vpop.f32.mrb[0].mxu0 }
  0xea   : > { %v643_v37 = vmul.f32 %v4563_v35, %v5479_v34  ;;  %v507_v38 = vpop.f32.mrb[1].mxu0 }
  0xeb   : > { %v641_v39 = vmul.f32 %v5479_v34, %v507_v38  ;;  %v4564_v40 = vpop.f32.mrb[2].mxu0 }
  0xec   : > { %v682_v41 = vadd.f32 %v5484_v36, %v643_v37  ;;  %v644_v42 = vmul.f32 %v4564_v40, %v5479_v34  ;;  %v510_v43 = vpop.f32.mrb[3].mxu0 }
  0xed   : > { %v680_v44 = vadd.f32 %v5484_v36, %v641_v39  ;;  %v642_v45 = vmul.f32 %v5479_v34, %v510_v43 }
  0xee   : > { %v714_v46 = vmax.f32 %v682_v41, 0.0  ;;  %v683_v47 = vadd.f32 %v5484_v36, %v644_v42 }
  0xef   : > { %v712_v48 = vmax.f32 %v680_v44, 0.0  ;;  %v681_v49 = vadd.f32 %v5484_v36, %v642_v45 }
  0xf0   : > { %802 = vst.msk [vmem:[#allocation2 + $0x31] sm:$0xff] %vm424_vm0, %v714_v46  ;;  %v715_v50 = vmax.f32 %v683_v47, 0.0  ;;  %v5250_v46 = vld [vmem:[%s6238_s4 + $0xb8] sm:$0xff]  }
  0xf1   : > { %800 = vst.msk [vmem:[#allocation2 + $0x19] sm:$0xff] %vm424_vm0, %v712_v48  ;;  %v713_v51 = vmax.f32 %v681_v49, 0.0  ;;  %v4567_v52 = vpop.f32.mrb[4].mxu0  ;;  %v5253_v47 = vld [vmem:[%s6238_s4 + $0x18] sm:$0xff]  }
  0xf2   : > { %803 = vst.msk [vmem:[#allocation2 + $0x39] sm:$0xff] %vm424_vm0, %v715_v50  ;;  %v647_v53 = vmul.f32 %v4567_v52, %v5479_v34  ;;  %v523_v54 = vpop.f32.mrb[5].mxu0 }
  0xf3   : > { %801 = vst.msk [vmem:[#allocation2 + $0x21] sm:$0xff] %vm424_vm0, %v713_v51  ;;  %v645_v55 = vmul.f32 %v5479_v34, %v523_v54  ;;  %v4568_v56 = vpop.f32.mrb[6].mxu0 }
  0xf4   : > { %v686_v57 = vadd.f32 %v5484_v36, %v647_v53  ;;  %v648_v58 = vmul.f32 %v4568_v56, %v5479_v34  ;;  %v526_v59 = vpop.f32.mrb[7].mxu0 }
  0xf5   : > { %v684_v60 = vadd.f32 %v5484_v36, %v645_v55  ;;  %v646_v61 = vmul.f32 %v5479_v34, %v526_v59  ;;  %v5562_v55 = vld [vmem:[%s6238_s4 + $0xc0] sm:$0xff]  }
  0xf6   : > { %v718_v62 = vmax.f32 %v686_v57, 0.0  ;;  %v687_v63 = vadd.f32 %v5484_v36, %v648_v58 }
  0xf7   : > { %v716_v0 = vmax.f32 %v684_v60, 0.0  ;;  %v685_v1 = vadd.f32 %v5484_v36, %v646_v61  ;;  %v892_v13 = vld [vmem:[#allocation2 + $0x31] sm:$0xff] }
  0xf8   : > { %806 = vst.msk [vmem:[#allocation2 + $0x61] sm:$0xff] %vm424_vm0, %v718_v62  ;;  %v719_v2 = vmax.f32 %v687_v63, 0.0  ;;  %v890_v8 = vld [vmem:[#allocation2 + $0x19] sm:$0xff] }
  0xf9   : > { %804 = vst.msk [vmem:[#allocation2 + $0x49] sm:$0xff] %vm424_vm0, %v716_v0  ;;  %v717_v3 = vmax.f32 %v685_v1, 0.0  ;;  %v4571_v4 = vpop.f32.mrb[8].mxu0  ;;  %v893_v5 = vld [vmem:[#allocation2 + $0x39] sm:$0xff] }
  0xfa   : > { %807 = vst.msk [vmem:[#allocation2 + $0x69] sm:$0xff] %vm424_vm0, %v719_v2  ;;  %v651_v6 = vmul.f32 %v4571_v4, %v5479_v34  ;;  %v539_v7 = vpop.f32.mrb[9].mxu0  ;;  %v891_v9 = vld [vmem:[#allocation2 + $0x21] sm:$0xff]  ;;  %v922_v17 = vpack.c.bf16 %v893_v5, %v892_v13 }
  0xfb   : > { %805 = vst.msk [vmem:[#allocation2 + $0x51] sm:$0xff] %vm424_vm0, %v717_v3  ;;  %v649_v10 = vmul.f32 %v5479_v34, %v539_v7  ;;  %v4572_v11 = vpop.f32.mrb[10].mxu0  ;;  %v921_v12 = vpack.c.bf16 %v891_v9, %v890_v8  ;;  %v5572_v3 = vld [vmem:[%s6238_s4 + $0x40] sm:$0xff]  }
  0xfc   : > { %v690_v14 = vadd.f32 %v5484_v36, %v651_v6  ;;  %v652_v15 = vmul.f32 %v4572_v11, %v5479_v34  ;;  %v542_v16 = vpop.f32.mrb[11].mxu0 }
  0xfd   : > { %v688_v20 = vadd.f32 %v5484_v36, %v649_v10  ;;  %v650_v21 = vmul.f32 %v5479_v34, %v542_v16  ;;  %4602 = vmatmul.mubr.msk.bf16.vlgmr.msra.gmra.mrb[32].mxu0 %vm424_vm0, %v921_v12  ;;  %4761 = vmatprep.mubr.msk.bf16.mxu1 %vm424_vm0, %v921_v12 }
  0xfe   : > { %v722_v22 = vmax.f32 %v690_v14, 0.0  ;;  %v691_v23 = vadd.f32 %v5484_v36, %v652_v15  ;;  %4605 = vmatprep.mubr.msk.bf16.mxu0 %vm424_vm0, %v922_v17  ;;  %4762 = vmatmul.mubr.msk.bf16.vlgmr.msra.gmra.mrb[0].mxu1 %vm424_vm0, %v922_v17 }
  0xff   : > { %v720_v24 = vmax.f32 %v688_v20, 0.0  ;;  %v689_v25 = vadd.f32 %v5484_v36, %v650_v21  ;;  %4794 = vmatpush3.bf16.msra.mxu1 %v5467_v32  ;;  %4634 = vmatpush3.bf16.msra.mxu0 %v5473_v33  ;;  %v896_v41 = vld [vmem:[#allocation2 + $0x61] sm:$0xff] }
 0x100   : > { %810 = vst.msk [vmem:[#allocation2 + $0x91] sm:$0xff] %vm424_vm0, %v722_v22  ;;  %v723_v26 = vmax.f32 %v691_v23, 0.0  ;;  %4795 = vmatprep.subr.bf16.mxu1 %v5247_v18  ;;  %4635 = vmatprep.subr.bf16.mxu0 %v5251_v19  ;;  %v894_v35 = vld [vmem:[#allocation2 + $0x49] sm:$0xff] }
 0x101   : > { %808 = vst.msk [vmem:[#allocation2 + $0x79] sm:$0xff] %vm424_vm0, %v720_v24  ;;  %v721_v29 = vmax.f32 %v689_v25, 0.0  ;;  %v4575_v30 = vpop.f32.mrb[12].mxu0  ;;  %v897_v31 = vld [vmem:[#allocation2 + $0x69] sm:$0xff] }
 0x102   : > { %811 = vst.msk [vmem:[#allocation2 + $0x99] sm:$0xff] %vm424_vm0, %v723_v26  ;;  %v655_v32 = vmul.f32 %v4575_v30, %v5479_v34  ;;  %v555_v33 = vpop.f32.mrb[13].mxu0  ;;  %v895_v37 = vld [vmem:[#allocation2 + $0x51] sm:$0xff]  ;;  %v924_v45 = vpack.c.bf16 %v897_v31, %v896_v41 }
 0x103   : > { %809 = vst.msk [vmem:[#allocation2 + $0x81] sm:$0xff] %vm424_vm0, %v721_v29  ;;  %v653_v38 = vmul.f32 %v5479_v34, %v555_v33  ;;  %v4576_v39 = vpop.f32.mrb[14].mxu0  ;;  %v923_v40 = vpack.c.bf16 %v895_v37, %v894_v35  ;;  %4796 = vmatpush3.bf16.msra.mxu1 %v5247_v18  ;;  %4636 = vmatpush3.bf16.msra.mxu0 %v5251_v19 }
 0x104   : > { %v694_v42 = vadd.f32 %v5484_v36, %v655_v32  ;;  %v656_v43 = vmul.f32 %v4576_v39, %v5479_v34  ;;  %v558_v44 = vpop.f32.mrb[15].mxu0  ;;  %4797 = vmatprep.subr.bf16.mxu1 %v5248_v27  ;;  %4637 = vmatprep.subr.bf16.mxu0 %v5252_v28 }
 0x105   : > { %v692_v48 = vadd.f32 %v5484_v36, %v653_v38  ;;  %v654_v49 = vmul.f32 %v5479_v34, %v558_v44  ;;  %4606 = vmatmul.mubr.msk.bf16.gmra.mrb[36].mxu0 %vm424_vm0, %v923_v40  ;;  %4765 = vmatprep.mubr.msk.bf16.mxu1 %vm424_vm0, %v923_v40 }
 0x106   : > { %v726_v50 = vmax.f32 %v694_v42, 0.0  ;;  %v695_v51 = vadd.f32 %v5484_v36, %v656_v43  ;;  %4609 = vmatprep.mubr.msk.bf16.mxu0 %vm424_vm0, %v924_v45  ;;  %4766 = vmatmul.mubr.msk.bf16.gmra.mrb[4].mxu1 %vm424_vm0, %v924_v45 }
 0x107   : > { %v724_v52 = vmax.f32 %v692_v48, 0.0  ;;  %v693_v53 = vadd.f32 %v5484_v36, %v654_v49  ;;  %4798 = vmatpush3.bf16.msra.mxu1 %v5248_v27  ;;  %4638 = vmatpush3.bf16.msra.mxu0 %v5252_v28  ;;  %v900_v2 = vld [vmem:[#allocation2 + $0x91] sm:$0xff] }
 0x108   : > { %814 = vst.msk [vmem:[#allocation2 + $0xc1] sm:$0xff] %vm424_vm0, %v726_v50  ;;  %v727_v54 = vmax.f32 %v695_v51, 0.0  ;;  %4799 = vmatprep.subr.bf16.mxu1 %v5250_v46  ;;  %4639 = vmatprep.subr.bf16.mxu0 %v5253_v47  ;;  %v898_v61 = vld [vmem:[#allocation2 + $0x79] sm:$0xff] }
 0x109   : > { %812 = vst.msk [vmem:[#allocation2 + $0xa9] sm:$0xff] %vm424_vm0, %v724_v52  ;;  %v725_v56 = vmax.f32 %v693_v53, 0.0  ;;  %v4579_v57 = vpop.f32.mrb[16].mxu0  ;;  %v901_v58 = vld [vmem:[#allocation2 + $0x99] sm:$0xff] }
 0x10a   : > { %815 = vst.msk [vmem:[#allocation2 + $0xc9] sm:$0xff] %vm424_vm0, %v727_v54  ;;  %v659_v59 = vmul.f32 %v4579_v57, %v5479_v34  ;;  %v571_v60 = vpop.f32.mrb[17].mxu0  ;;  %v899_v62 = vld [vmem:[#allocation2 + $0x81] sm:$0xff]  ;;  %v926_v7 = vpack.c.bf16 %v901_v58, %v900_v2 }
 0x10b   : > { %813 = vst.msk [vmem:[#allocation2 + $0xb1] sm:$0xff] %vm424_vm0, %v725_v56  ;;  %v657_v63 = vmul.f32 %v5479_v34, %v571_v60  ;;  %v4580_v0 = vpop.f32.mrb[18].mxu0  ;;  %v925_v1 = vpack.c.bf16 %v899_v62, %v898_v61  ;;  %4800 = vmatpush3.bf16.msra.mxu1 %v5250_v46  ;;  %4640 = vmatpush3.bf16.msra.mxu0 %v5253_v47 }
 0x10c   : > { %v698_v4 = vadd.f32 %v5484_v36, %v659_v59  ;;  %v660_v5 = vmul.f32 %v4580_v0, %v5479_v34  ;;  %v574_v6 = vpop.f32.mrb[19].mxu0  ;;  %4833 = vmatprep.subr.bf16.mxu1 %v5562_v55  ;;  %4673 = vmatprep.subr.bf16.mxu0 %v5572_v3 }
 0x10d   : > { %v696_v8 = vadd.f32 %v5484_v36, %v657_v63  ;;  %v658_v9 = vmul.f32 %v5479_v34, %v574_v6  ;;  %4610 = vmatmul.mubr.msk.bf16.gmra.mrb[40].mxu0 %vm424_vm0, %v925_v1  ;;  %4769 = vmatprep.mubr.msk.bf16.mxu1 %vm424_vm0, %v925_v1 }
 0x10e   : > { %v730_v10 = vmax.f32 %v698_v4, 0.0  ;;  %v699_v11 = vadd.f32 %v5484_v36, %v660_v5  ;;  %4613 = vmatprep.mubr.msk.bf16.mxu0 %vm424_vm0, %v926_v7  ;;  %4770 = vmatmul.mubr.msk.bf16.gmra.mrb[8].mxu1 %vm424_vm0, %v926_v7 }
 0x10f   : > { %v728_v12 = vmax.f32 %v696_v8, 0.0  ;;  %v697_v13 = vadd.f32 %v5484_v36, %v658_v9  ;;  %v904_v25 = vld [vmem:[#allocation2 + $0xc1] sm:$0xff] }
 0x110   : > { %818 = vst.msk [vmem:[#allocation2 + $0xf1] sm:$0xff] %vm424_vm0, %v730_v10  ;;  %v731_v14 = vmax.f32 %v699_v11, 0.0  ;;  %v902_v20 = vld [vmem:[#allocation2 + $0xa9] sm:$0xff] }
 0x111   : > { %816 = vst.msk [vmem:[#allocation2 + $0xd9] sm:$0xff] %vm424_vm0, %v728_v12  ;;  %v729_v15 = vmax.f32 %v697_v13, 0.0  ;;  %v4583_v16 = vpop.f32.mrb[20].mxu0  ;;  %v905_v17 = vld [vmem:[#allocation2 + $0xc9] sm:$0xff] }
 0x112   : > { %819 = vst.msk [vmem:[#allocation2 + $0xf9] sm:$0xff] %vm424_vm0, %v731_v14  ;;  %v663_v18 = vmul.f32 %v4583_v16, %v5479_v34  ;;  %v587_v19 = vpop.f32.mrb[21].mxu0  ;;  %v903_v21 = vld [vmem:[#allocation2 + $0xb1] sm:$0xff]  ;;  %v928_v29 = vpack.c.bf16 %v905_v17, %v904_v25 }
 0x113   : > { %817 = vst.msk [vmem:[#allocation2 + $0xe1] sm:$0xff] %vm424_vm0, %v729_v15  ;;  %v661_v22 = vmul.f32 %v5479_v34, %v587_v19  ;;  %v4584_v23 = vpop.f32.mrb[22].mxu0  ;;  %v927_v24 = vpack.c.bf16 %v903_v21, %v902_v20 }
 0x114   : > { %v702_v26 = vadd.f32 %v5484_v36, %v663_v18  ;;  %v664_v27 = vmul.f32 %v4584_v23, %v5479_v34  ;;  %v590_v28 = vpop.f32.mrb[23].mxu0 }
 0x115   : > { %v700_v30 = vadd.f32 %v5484_v36, %v661_v22  ;;  %v662_v31 = vmul.f32 %v5479_v34, %v590_v28  ;;  %4614 = vmatmul.mubr.msk.bf16.gmra.mrb[44].mxu0 %vm424_vm0, %v927_v24  ;;  %4773 = vmatprep.mubr.msk.bf16.mxu1 %vm424_vm0, %v927_v24 }
 0x116   : > { %v734_v32 = vmax.f32 %v702_v26, 0.0  ;;  %v703_v33 = vadd.f32 %v5484_v36, %v664_v27  ;;  %4617 = vmatprep.mubr.msk.bf16.mxu0 %vm424_vm0, %v928_v29  ;;  %4774 = vmatmul.mubr.msk.bf16.gmra.mrb[12].mxu1 %vm424_vm0, %v928_v29  ;;  %v833_v27 = vld [vmem:[#allocation2 + $0x8] sm:$0xff]  ;;  %v2377_v29 = vld [vmem:[#allocation2 + $0x1a] sm:$0xff] }
 0x117   : > { %v732_v35 = vmax.f32 %v700_v30, 0.0  ;;  %v701_v37 = vadd.f32 %v5484_v36, %v662_v31  ;;  %v908_v49 = vld [vmem:[#allocation2 + $0xf1] sm:$0xff] }
 0x118   : > { %822 = vst.msk [vmem:[#allocation2 + $0x121] sm:$0xff] %vm424_vm0, %v734_v32  ;;  %v735_v38 = vmax.f32 %v703_v33, 0.0  ;;  %v906_v44 = vld [vmem:[#allocation2 + $0xd9] sm:$0xff]  ;;  %v2378_v32 = vld [vmem:[#allocation2 + $0x22] sm:$0xff] }
 0x119   : > { %820 = vst.msk [vmem:[#allocation2 + $0x109] sm:$0xff] %vm424_vm0, %v732_v35  ;;  %v733_v39 = vmax.f32 %v701_v37, 0.0  ;;  %v4587_v40 = vpop.f32.mrb[24].mxu0  ;;  %v909_v41 = vld [vmem:[#allocation2 + $0xf9] sm:$0xff] }
 0x11a   : > { %823 = vst.msk [vmem:[#allocation2 + $0x129] sm:$0xff] %vm424_vm0, %v735_v38  ;;  %v667_v42 = vmul.f32 %v4587_v40, %v5479_v34  ;;  %v603_v43 = vpop.f32.mrb[25].mxu0  ;;  %v907_v45 = vld [vmem:[#allocation2 + $0xe1] sm:$0xff]  ;;  %v5610_v53 = vpack.c.bf16 %v909_v41, %v908_v49  ;;  %v837_v41 = vld [vmem:[#allocation2 + $0x38] sm:$0xff] }
 0x11b   : > { %821 = vst.msk [vmem:[#allocation2 + $0x111] sm:$0xff] %vm424_vm0, %v733_v39  ;;  %v665_v46 = vmul.f32 %v5479_v34, %v603_v43  ;;  %v4588_v47 = vpop.f32.mrb[26].mxu0  ;;  %v929_v48 = vpack.c.bf16 %v907_v45, %v906_v44  ;;  %v5670_v39 = vpack.c.bf16 %v2378_v32, %v2377_v29  ;;  %v835_v40 = vld [vmem:[#allocation2 + $0x20] sm:$0xff]  ;;  %v834_v44 = vld [vmem:[#allocation2 + $0x18] sm:$0xff]  ;;  %v2381_v45 = vld [vmem:[#allocation2 + $0x4a] sm:$0xff] }
 0x11c   : > { %v706_v50 = vadd.f32 %v5484_v36, %v667_v42  ;;  %v668_v51 = vmul.f32 %v4588_v47, %v5479_v34  ;;  %v606_v52 = vpop.f32.mrb[27].mxu0  ;;  %v2379_v42 = vld [vmem:[#allocation2 + $0x32] sm:$0xff]  ;;  %v2380_v43 = vld [vmem:[#allocation2 + $0x3a] sm:$0xff]  ;;  %v5677_v47 = vpack.c.bf16 %v835_v40, %v834_v44  ;;  %v2394_v29 = vld [vmem:[#allocation2 + $0xe2] sm:$0xff] }
 0x11d   : > { %v704_v54 = vadd.f32 %v5484_v36, %v665_v46  ;;  %v666_v56 = vmul.f32 %v5479_v34, %v606_v52  ;;  %4618 = vmatmul.mubr.msk.bf16.gmra.mrb[48].mxu0 %vm424_vm0, %v929_v48  ;;  %4777 = vmatprep.mubr.msk.bf16.mxu1 %vm424_vm0, %v929_v48  ;;  %v2382_v46 = vld [vmem:[#allocation2 + $0x52] sm:$0xff]  ;;  %v851_v40 = vld [vmem:[#allocation2 + $0xe0] sm:$0xff] }
 0x11e   : > { %v738_v57 = vmax.f32 %v706_v50, 0.0  ;;  %v707_v58 = vadd.f32 %v5484_v36, %v668_v51  ;;  %4621 = vmatprep.mubr.msk.bf16.mxu0 %vm424_vm0, %v5610_v53  ;;  %4778 = vmatmul.mubr.msk.bf16.gmra.mrb[16].mxu1 %vm424_vm0, %v5610_v53  ;;  %v836_v48 = vld [vmem:[#allocation2 + $0x30] sm:$0xff]  ;;  %v5681_v50 = vpack.c.bf16 %v2380_v43, %v2379_v42  ;;  %v5255_v51 = vld [vmem:[%s6238_s4 + $0xc8] sm:$0xff]   ;;  %v5688_v52 = vpack.c.bf16 %v2382_v46, %v2381_v45  ;;  %v2396_v43 = vld [vmem:[#allocation2 + $0xfa] sm:$0xff] }
 0x11f   : > { %v736_v59 = vmax.f32 %v704_v54, 0.0  ;;  %v705_v60 = vadd.f32 %v5484_v36, %v666_v56  ;;  %v912_v9 = vld [vmem:[#allocation2 + $0x121] sm:$0xff]  ;;  %v5679_v49 = vpack.c.bf16 %v837_v41, %v836_v48  ;;  %v839_v56 = vld [vmem:[#allocation2 + $0x50] sm:$0xff]  ;;  %v853_v41 = vld [vmem:[#allocation2 + $0xf8] sm:$0xff] }
 0x120   : > { %826 = vst.msk [vmem:[#allocation2 + $0x151] sm:$0xff] %vm424_vm0, %v738_v57  ;;  %v739_v61 = vmax.f32 %v707_v58, 0.0  ;;  %v910_v4 = vld [vmem:[#allocation2 + $0x109] sm:$0xff]  ;;  %v2395_v42 = vld [vmem:[#allocation2 + $0xf2] sm:$0xff] }
 0x121   : > { %824 = vst.msk [vmem:[#allocation2 + $0x139] sm:$0xff] %vm424_vm0, %v736_v59  ;;  %v737_v62 = vmax.f32 %v705_v60, 0.0  ;;  %v4591_v63 = vpop.f32.mrb[28].mxu0  ;;  %v913_v0 = vld [vmem:[#allocation2 + $0x129] sm:$0xff]  ;;  %v850_v44 = vld [vmem:[#allocation2 + $0xd8] sm:$0xff] }
 0x122   : > { %827 = vst.msk [vmem:[#allocation2 + $0x159] sm:$0xff] %vm424_vm0, %v739_v61  ;;  %v671_v1 = vmul.f32 %v4591_v63, %v5479_v34  ;;  %v619_v2 = vpop.f32.mrb[29].mxu0  ;;  %v911_v5 = vld [vmem:[#allocation2 + $0x111] sm:$0xff]  ;;  %v5632_v13 = vpack.c.bf16 %v913_v0, %v912_v9  ;;  %v5259_v54 = vld [vmem:[%s6238_s4 + $0x48] sm:$0xff]   ;;  %v5773_v48 = vpack.c.bf16 %v851_v40, %v850_v44 }
 0x123   : > { %825 = vst.msk [vmem:[#allocation2 + $0x141] sm:$0xff] %vm424_vm0, %v737_v62  ;;  %v669_v6 = vmul.f32 %v5479_v34, %v619_v2  ;;  %v4592_v7 = vpop.f32.mrb[30].mxu0  ;;  %v5628_v8 = vpack.c.bf16 %v911_v5, %v910_v4  ;;  %v5256_v57 = vld [vmem:[%s6238_s4 + $0xd0] sm:$0xff]   ;;  %v841_v59 = vld [vmem:[#allocation2 + $0x68] sm:$0xff]  ;;  %v2385_v62 = vld [vmem:[#allocation2 + $0x7a] sm:$0xff] }
 0x124   : > { %v710_v10 = vadd.f32 %v5484_v36, %v671_v1  ;;  %v672_v11 = vmul.f32 %v4592_v7, %v5479_v34  ;;  %v622_v12 = vpop.f32.mrb[31].mxu0  ;;  %v5260_v58 = vld [vmem:[%s6238_s4 + $0x50] sm:$0xff]   ;;  %v2383_v60 = vld [vmem:[#allocation2 + $0x62] sm:$0xff]  ;;  %v845_v9 = vld [vmem:[#allocation2 + $0x98] sm:$0xff] }
 0x125   : > { %v708_v14 = vadd.f32 %v5484_v36, %v669_v6  ;;  %v670_v15 = vmul.f32 %v5479_v34, %v622_v12  ;;  %4622 = vmatmul.mubr.msk.bf16.gmra.mrb[52].mxu0 %vm424_vm0, %v5628_v8  ;;  %4781 = vmatprep.mubr.msk.bf16.mxu1 %vm424_vm0, %v5628_v8  ;;  %v2384_v61 = vld [vmem:[#allocation2 + $0x6a] sm:$0xff]  ;;  %v2386_v63 = vld [vmem:[#allocation2 + $0x82] sm:$0xff]  ;;  %v5261_v6 = vld [vmem:[%s6238_s4 + $0x58] sm:$0xff]  }
 0x126   : > { %v742_v16 = vmax.f32 %v710_v10, 0.0  ;;  %v711_v17 = vadd.f32 %v5484_v36, %v672_v11  ;;  %4625 = vmatprep.mubr.msk.bf16.mxu0 %vm424_vm0, %v5632_v13  ;;  %4782 = vmatmul.mubr.msk.bf16.gmra.mrb[20].mxu1 %vm424_vm0, %v5632_v13  ;;  %v840_v1 = vld [vmem:[#allocation2 + $0x60] sm:$0xff]  ;;  %v5711_v4 = vpack.c.bf16 %v2384_v61, %v2383_v60  ;;  %v5718_v5 = vpack.c.bf16 %v2386_v63, %v2385_v62  ;;  %v2387_v11 = vld [vmem:[#allocation2 + $0x92] sm:$0xff]  ;;  %v2397_v45 = vld [vmem:[#allocation2 + $0x10a] sm:$0xff] }
 0x127   : > { %v740_v18 = vmax.f32 %v708_v14, 0.0  ;;  %v709_v19 = vadd.f32 %v5484_v36, %v670_v15  ;;  %v916_v25 = vld [vmem:[#allocation2 + $0x151] sm:$0xff]  ;;  %v832_v36 = vld [vmem:[#allocation2] sm:$0xff]  ;;  %v5709_v2 = vpack.c.bf16 %v841_v59, %v840_v1  ;;  %v857_v59 = vld [vmem:[#allocation2 + $0x128] sm:$0xff] }
 0x128   : > { %830 = vst.msk [vmem:[#allocation2 + $0x181] sm:$0xff] %vm424_vm0, %v742_v16  ;;  %v743_v34 = vmax.f32 %v711_v17, 0.0  ;;  %v914_v22 = vld [vmem:[#allocation2 + $0x139] sm:$0xff]  ;;  %v864_v33 = vpack.c.bf16 %v833_v27, %v832_v36  ;;  %v2389_v16 = vld [vmem:[#allocation2 + $0xaa] sm:$0xff]  ;;  %v2399_v60 = vld [vmem:[#allocation2 + $0x122] sm:$0xff] }
 0x129   : > { %828 = vst.msk [vmem:[#allocation2 + $0x169] sm:$0xff] %vm424_vm0, %v740_v18  ;;  %v741_v20 = vmax.f32 %v709_v19, 0.0  ;;  %v917_v21 = vld [vmem:[#allocation2 + $0x159] sm:$0xff]  ;;  %v844_v19 = vld [vmem:[#allocation2 + $0x90] sm:$0xff]  ;;  %v846_v27 = vld [vmem:[#allocation2 + $0xa8] sm:$0xff] }
 0x12a   : > { %831 = vst.msk [vmem:[#allocation2 + $0x189] sm:$0xff] %vm424_vm0, %v743_v34  ;;  %v915_v23 = vld [vmem:[#allocation2 + $0x141] sm:$0xff]  ;;  %v5652_v26 = vpack.c.bf16 %v917_v21, %v916_v25  ;;  %v842_v15 = vld [vmem:[#allocation2 + $0x78] sm:$0xff]  ;;  %v5741_v34 = vpack.c.bf16 %v845_v9, %v844_v19  ;;  %v2392_v36 = vld [vmem:[#allocation2 + $0xca] sm:$0xff] }
 0x12b   : > { %829 = vst.msk [vmem:[#allocation2 + $0x171] sm:$0xff] %vm424_vm0, %v741_v20  ;;  %v5650_v24 = vpack.c.bf16 %v915_v23, %v914_v22  ;;  %v843_v7 = vld [vmem:[#allocation2 + $0x80] sm:$0xff]  ;;  %v2390_v17 = vld [vmem:[#allocation2 + $0xb2] sm:$0xff]  ;;  %v849_v23 = vld [vmem:[#allocation2 + $0xc8] sm:$0xff] }
 0x12c   : > { %v5732_v10 = vld [vmem:[%s6238_s4 + $0xe0] sm:$0xff]   ;;  %v5739_v18 = vpack.c.bf16 %v843_v7, %v842_v15  ;;  %v5748_v21 = vpack.c.bf16 %v2390_v17, %v2389_v16  ;;  %v847_v22 = vld [vmem:[#allocation2 + $0xb0] sm:$0xff]  ;;  %v858_v17 = vld [vmem:[#allocation2 + $0x138] sm:$0xff] }
 0x12d   : > { %4626 = vmatmul.mubr.msk.bf16.gmra.mrb[56].mxu0 %vm424_vm0, %v5650_v24  ;;  %4785 = vmatprep.mubr.msk.bf16.mxu1 %vm424_vm0, %v5650_v24  ;;  %v2388_v12 = vld [vmem:[#allocation2 + $0x9a] sm:$0xff]  ;;  %v2391_v25 = vld [vmem:[#allocation2 + $0xc2] sm:$0xff]  ;;  %v2398_v46 = vld [vmem:[#allocation2 + $0x112] sm:$0xff] }
 0x12e   : > { %4629 = vmatprep.mubr.msk.bf16.mxu0 %vm424_vm0, %v5652_v26  ;;  %4786 = vmatmul.mubr.msk.bf16.gmra.mrb[24].mxu1 %vm424_vm0, %v5652_v26  ;;  %v5737_v14 = vld [vmem:[%s6238_s4 + $0x60] sm:$0xff]   ;;  %v5743_v20 = vpack.c.bf16 %v2388_v12, %v2387_v11  ;;  %v2400_v61 = vld [vmem:[#allocation2 + $0x12a] sm:$0xff]  ;;  %v861_v12 = vld [vmem:[#allocation2 + $0x158] sm:$0xff] }
 0x12f   : > { %v2085_v37 = vld [vmem:[#allocation2 + $0x181] sm:$0xff]  ;;  %v5793_v7 = vpack.c.bf16 %v2400_v61, %v2399_v60  ;;  %v2403_v15 = vld [vmem:[#allocation2 + $0x152] sm:$0xff] }
 0x130   : > { %v918_v30 = vld [vmem:[#allocation2 + $0x169] sm:$0xff]  ;;  %v2401_v62 = vld [vmem:[#allocation2 + $0x13a] sm:$0xff] }
 0x131   : > { %v2086_v28 = vld [vmem:[#allocation2 + $0x189] sm:$0xff]  ;;  %v859_v11 = vld [vmem:[#allocation2 + $0x140] sm:$0xff] }
 0x132   : > { %v919_v31 = vld [vmem:[#allocation2 + $0x171] sm:$0xff]  ;;  %v5664_v38 = vpack.c.bf16 %v2086_v28, %v2085_v37  ;;  %v2393_v28 = vld [vmem:[#allocation2 + $0xda] sm:$0xff]  ;;  %v2402_v63 = vld [vmem:[#allocation2 + $0x142] sm:$0xff] }
 0x133   : > { %v5662_v35 = vpack.c.bf16 %v919_v31, %v918_v30  ;;  %v5757_v30 = vpack.c.bf16 %v847_v22, %v846_v27  ;;  %v848_v31 = vld [vmem:[#allocation2 + $0xc0] sm:$0xff]  ;;  %v5765_v37 = vpack.c.bf16 %v2394_v29, %v2393_v28  ;;  %v5797_v9 = vpack.c.bf16 %v2402_v63, %v2401_v62  ;;  %v2405_v19 = vld [vmem:[#allocation2 + $0x16a] sm:$0xff]  ;;  %v2406_v22 = vld [vmem:[#allocation2 + $0x172] sm:$0xff] }
 0x134   : > { %v5759_v32 = vpack.c.bf16 %v849_v23, %v848_v31  ;;  %v2404_v16 = vld [vmem:[#allocation2 + $0x15a] sm:$0xff]  ;;  %v5805_v23 = vpack.c.bf16 %v859_v11, %v858_v17  ;;  %v5813_v28 = vpack.c.bf16 %v2406_v22, %v2405_v19  ;;  %v1411_v29 = vld [vmem:[#allocation2 + $0x2] sm:$0xff]  ;;  %v1412_v31 = vld [vmem:[#allocation2 + $0xa] sm:$0xff] }
 0x135   : > { %4630 = vmatmul.mubr.msk.bf16.gmra.mrb[60].mxu0 %vm424_vm0, %v5662_v35  ;;  %4789 = vmatprep.mubr.msk.bf16.mxu1 %vm424_vm0, %v5662_v35  ;;  %v5809_v27 = vpack.c.bf16 %v2404_v16, %v2403_v15  ;;  %v863_v40 = vld [vmem:[#allocation2 + $0x170] sm:$0xff]  ;;  %v1443_v44 = vpack.c.bf16 %v1412_v31, %v1411_v29  ;;  %v5270_v60 = vld [vmem:[%s6238_s4 + $0x100] sm:$0xff]   ;;  %v2729_v61 = vld [vmem:[#allocation2 + $0x188] sm:$0xff] }
 0x136   : > { %4790 = vmatmul.mubr.msk.bf16.gmra.mrb[28].mxu1 %vm424_vm0, %v5664_v38  ;;  %4641 = vmatprep.mubr.msk.bf16.mxu0 %vm424_vm0, %v864_v33  ;;  %v5761_v33 = vpack.c.bf16 %v2392_v36, %v2391_v25  ;;  %v860_v25 = vld [vmem:[#allocation2 + $0x150] sm:$0xff]  ;;  %v2730_v63 = vld [vmem:[#allocation2 + $0x198] sm:$0xff]  ;;  %v3026_v29 = vld [vmem:[#allocation2 + $0x61] sm:$0xff] }
 0x137   : > { %4801 = vmatprep.mubr.msk.bf16.mxu1 %vm424_vm0, %v5670_v39  ;;  %v5807_v36 = vpack.c.bf16 %v861_v12, %v860_v25  ;;  %v3023_v12 = vld [vmem:[#allocation2 + $0x39] sm:$0xff]  ;;  %v3022_v15 = vld [vmem:[#allocation2 + $0x31] sm:$0xff]  ;;  %v3027_v19 = vld [vmem:[#allocation2 + $0x69] sm:$0xff] }
 0x138   : > { %v3054_v16 = vpack.c.bf16 %v3023_v12, %v3022_v15  ;;  %v3025_v17 = vld [vmem:[#allocation2 + $0x51] sm:$0xff]  ;;  %v3024_v22 = vld [vmem:[#allocation2 + $0x49] sm:$0xff] }
 0x139   : > { %v3055_v25 = vpack.c.bf16 %v3025_v17, %v3024_v22  ;;  %v5271_v31 = vld [vmem:[%s6238_s4 + $0x108] sm:$0xff]   ;;  %v6069_v22 = vld [vmem:[%s6240_s6] ss:$0 sm:$0xff] }
 0x13d   : > { %4642 = vmatmul.mubr.msk.bf16.vlgmr.msra.gmra.mrb[32].mxu0 %vm424_vm0, %v5677_v47 }
 0x13e   : > { %4645 = vmatprep.mubr.msk.bf16.mxu0 %vm424_vm0, %v5679_v49  ;;  %4802 = vmatmul.mubr.msk.bf16.vlgmr.msra.gmra.mrb[0].mxu1 %vm424_vm0, %v5681_v50 }
 0x13f   : > { %4834 = vmatpush3.bf16.msra.mxu1 %v5562_v55  ;;  %4805 = vmatprep.mubr.msk.bf16.mxu1 %vm424_vm0, %v5688_v52  ;;  %v838_v55 = vld [vmem:[#allocation2 + $0x48] sm:$0xff] }
 0x140   : > { %4835 = vmatprep.subr.bf16.mxu1 %v5255_v51  ;;  %4674 = vmatpush3.bf16.msra.mxu0 %v5572_v3  ;;  %v5707_v0 = vpack.c.bf16 %v839_v56, %v838_v55  ;;  %v5258_v3 = vld [vmem:[%s6238_s4 + $0xd8] sm:$0xff]   ;;  %v5777_v56 = vpack.c.bf16 %v2396_v43, %v2395_v42  ;;  %v854_v55 = vld [vmem:[#allocation2 + $0x108] sm:$0xff] }
 0x141   : > { %4675 = vmatprep.subr.bf16.mxu0 %v5259_v54  ;;  %v2408_v42 = vld [vmem:[#allocation2 + $0x18a] sm:$0xff] }
 0x142   : > { %v862_v43 = vld [vmem:[#allocation2 + $0x168] sm:$0xff] }
 0x143   : > { %4836 = vmatpush3.bf16.msra.mxu1 %v5255_v51  ;;  %v852_v51 = vld [vmem:[#allocation2 + $0xf0] sm:$0xff] }
 0x144   : > { %4837 = vmatprep.subr.bf16.mxu1 %v5256_v57  ;;  %4676 = vmatpush3.bf16.msra.mxu0 %v5259_v54  ;;  %v5775_v54 = vpack.c.bf16 %v853_v41, %v852_v51  ;;  %v2407_v41 = vld [vmem:[#allocation2 + $0x182] sm:$0xff] }
 0x145   : > { %4646 = vmatmul.mubr.msk.bf16.gmra.mrb[36].mxu0 %vm424_vm0, %v5707_v0  ;;  %4677 = vmatprep.subr.bf16.mxu0 %v5260_v58  ;;  %v5263_v51 = vld [vmem:[%s6238_s4 + $0xe8] sm:$0xff]  }
 0x146   : > { %4649 = vmatprep.mubr.msk.bf16.mxu0 %vm424_vm0, %v5709_v2  ;;  %4806 = vmatmul.mubr.msk.bf16.gmra.mrb[4].mxu1 %vm424_vm0, %v5711_v4 }
 0x147   : > { %4809 = vmatprep.mubr.msk.bf16.mxu1 %vm424_vm0, %v5718_v5  ;;  %4838 = vmatpush3.bf16.msra.mxu1 %v5256_v57  ;;  %v5781_v57 = vpack.c.bf16 %v2398_v46, %v2397_v45  ;;  %v5821_v45 = vpack.c.bf16 %v863_v40, %v862_v43  ;;  %v5823_v46 = vpack.c.bf16 %v2408_v42, %v2407_v41  ;;  %v3029_v41 = vld [vmem:[#allocation2 + $0x81] sm:$0xff]  ;;  %v3031_v42 = vld [vmem:[#allocation2 + $0x99] sm:$0xff] }
 0x148   : > { %4839 = vmatprep.subr.bf16.mxu1 %v5258_v3  ;;  %4678 = vmatpush3.bf16.msra.mxu0 %v5260_v58  ;;  %v855_v58 = vld [vmem:[#allocation2 + $0x110] sm:$0xff]  ;;  %v3056_v40 = vpack.c.bf16 %v3027_v19, %v3026_v29  ;;  %v3028_v43 = vld [vmem:[#allocation2 + $0x79] sm:$0xff] }
 0x149   : > { %4679 = vmatprep.subr.bf16.mxu0 %v5261_v6  ;;  %v5789_v1 = vpack.c.bf16 %v855_v58, %v854_v55  ;;  %v5267_v58 = vld [vmem:[%s6238_s4 + $0x68] sm:$0xff]   ;;  %v2728_v55 = vld [vmem:[#allocation2 + $0x180] sm:$0xff] }
 0x14a   : > { %v5905_v62 = vpack.c.bf16 %v2729_v61, %v2728_v55 }
 0x14b   : > { %4840 = vmatpush3.bf16.msra.mxu1 %v5258_v3  ;;  %v856_v3 = vld [vmem:[#allocation2 + $0x120] sm:$0xff] }
 0x14c   : > { %4680 = vmatpush3.bf16.msra.mxu0 %v5261_v6  ;;  %4873 = vmatprep.subr.bf16.mxu1 %v5732_v10  ;;  %v5791_v6 = vpack.c.bf16 %v857_v59, %v856_v3  ;;  %v5268_v59 = vld [vmem:[%s6238_s4 + $0x70] sm:$0xff]   ;;  %v2731_v3 = vld [vmem:[#allocation2 + $0x1a0] sm:$0xff] }
 0x14d   : > { %4650 = vmatmul.mubr.msk.bf16.gmra.mrb[40].mxu0 %vm424_vm0, %v5739_v18  ;;  %4713 = vmatprep.subr.bf16.mxu0 %v5737_v14  ;;  %v2747_v11 = vpack.c.bf16 %v2731_v3, %v2730_v63 }
 0x14e   : > { %4653 = vmatprep.mubr.msk.bf16.mxu0 %vm424_vm0, %v5741_v34  ;;  %4810 = vmatmul.mubr.msk.bf16.gmra.mrb[8].mxu1 %vm424_vm0, %v5743_v20 }
 0x14f   : > { %4813 = vmatprep.mubr.msk.bf16.mxu1 %vm424_vm0, %v5748_v21 }
 0x155   : > { %4654 = vmatmul.mubr.msk.bf16.gmra.mrb[44].mxu0 %vm424_vm0, %v5757_v30 }
 0x156   : > { %4657 = vmatprep.mubr.msk.bf16.mxu0 %vm424_vm0, %v5759_v32  ;;  %4814 = vmatmul.mubr.msk.bf16.gmra.mrb[12].mxu1 %vm424_vm0, %v5761_v33 }
 0x157   : > { %4817 = vmatprep.mubr.msk.bf16.mxu1 %vm424_vm0, %v5765_v37 }
 0x15d   : > { %4658 = vmatmul.mubr.msk.bf16.gmra.mrb[48].mxu0 %vm424_vm0, %v5773_v48 }
 0x15e   : > { %4661 = vmatprep.mubr.msk.bf16.mxu0 %vm424_vm0, %v5775_v54  ;;  %4818 = vmatmul.mubr.msk.bf16.gmra.mrb[16].mxu1 %vm424_vm0, %v5777_v56 }
 0x15f   : > { %4821 = vmatprep.mubr.msk.bf16.mxu1 %vm424_vm0, %v5781_v57 }
 0x165   : > { %4662 = vmatmul.mubr.msk.bf16.gmra.mrb[52].mxu0 %vm424_vm0, %v5789_v1 }
 0x166   : > { %4665 = vmatprep.mubr.msk.bf16.mxu0 %vm424_vm0, %v5791_v6  ;;  %4822 = vmatmul.mubr.msk.bf16.gmra.mrb[20].mxu1 %vm424_vm0, %v5793_v7 }
 0x167   : > { %4825 = vmatprep.mubr.msk.bf16.mxu1 %vm424_vm0, %v5797_v9 }
 0x16d   : > { %4666 = vmatmul.mubr.msk.bf16.gmra.mrb[56].mxu0 %vm424_vm0, %v5805_v23 }
 0x16e   : > { %4669 = vmatprep.mubr.msk.bf16.mxu0 %vm424_vm0, %v5807_v36  ;;  %4826 = vmatmul.mubr.msk.bf16.gmra.mrb[24].mxu1 %vm424_vm0, %v5809_v27 }
 0x16f   : > { %4829 = vmatprep.mubr.msk.bf16.mxu1 %vm424_vm0, %v5813_v28 }
 0x175   : > { %4670 = vmatmul.mubr.msk.bf16.gmra.mrb[60].mxu0 %vm424_vm0, %v5821_v45 }
 0x176   : > { %4830 = vmatmul.mubr.msk.bf16.gmra.mrb[28].mxu1 %vm424_vm0, %v5823_v46  ;;  %4681 = vmatprep.mubr.msk.bf16.mxu0 %vm424_vm0, %v1443_v44  ;;  %v3057_v44 = vpack.c.bf16 %v3029_v41, %v3028_v43 }
 0x177   : > { %4841 = vmatprep.mubr.msk.bf16.mxu1 %vm424_vm0, %v5679_v49 }
 0x17d   : > { %4682 = vmatmul.mubr.msk.bf16.vlgmr.msra.gmra.mrb[32].mxu0 %vm424_vm0, %v5670_v39  ;;  %v5264_v39 = vld [vmem:[%s6238_s4 + $0xf0] sm:$0xff]  }
 0x17e   : > { %4685 = vmatprep.mubr.msk.bf16.mxu0 %vm424_vm0, %v5681_v50  ;;  %4842 = vmatmul.mubr.msk.bf16.vlgmr.msra.gmra.mrb[0].mxu1 %vm424_vm0, %v5707_v0 }
 0x17f   : > { %4874 = vmatpush3.bf16.msra.mxu1 %v5732_v10  ;;  %4845 = vmatprep.mubr.msk.bf16.mxu1 %vm424_vm0, %v5709_v2  ;;  %v5266_v10 = vld [vmem:[%s6238_s4 + $0xf8] sm:$0xff]  }
 0x180   : > { %4875 = vmatprep.subr.bf16.mxu1 %v5263_v51  ;;  %4714 = vmatpush3.bf16.msra.mxu0 %v5737_v14  ;;  %v5269_v14 = vld [vmem:[%s6238_s4 + $0x78] sm:$0xff]  }
 0x181   : > { %4715 = vmatprep.subr.bf16.mxu0 %v5267_v58 }
 0x183   : > { %4876 = vmatpush3.bf16.msra.mxu1 %v5263_v51 }
 0x184   : > { %4877 = vmatprep.subr.bf16.mxu1 %v5264_v39  ;;  %4716 = vmatpush3.bf16.msra.mxu0 %v5267_v58  ;;  %v3033_v58 = vld [vmem:[#allocation2 + $0xb1] sm:$0xff] }
 0x185   : > { %4686 = vmatmul.mubr.msk.bf16.gmra.mrb[36].mxu0 %vm424_vm0, %v5688_v52  ;;  %4717 = vmatprep.subr.bf16.mxu0 %v5268_v59 }
 0x186   : > { %4689 = vmatprep.mubr.msk.bf16.mxu0 %vm424_vm0, %v5711_v4  ;;  %4846 = vmatmul.mubr.msk.bf16.gmra.mrb[4].mxu1 %vm424_vm0, %v5739_v18 }
 0x187   : > { %4849 = vmatprep.mubr.msk.bf16.mxu1 %vm424_vm0, %v5741_v34  ;;  %4878 = vmatpush3.bf16.msra.mxu1 %v5264_v39  ;;  %v3035_v39 = vld [vmem:[#allocation2 + $0xc9] sm:$0xff] }
 0x188   : > { %4879 = vmatprep.subr.bf16.mxu1 %v5266_v10  ;;  %4718 = vmatpush3.bf16.msra.mxu0 %v5268_v59  ;;  %v3032_v59 = vld [vmem:[#allocation2 + $0xa9] sm:$0xff] }
 0x189   : > { %4719 = vmatprep.subr.bf16.mxu0 %v5269_v14 }
 0x18b   : > { %4880 = vmatpush3.bf16.msra.mxu1 %v5266_v10  ;;  %v3059_v10 = vpack.c.bf16 %v3033_v58, %v3032_v59 }
 0x18c   : > { %4720 = vmatpush3.bf16.msra.mxu0 %v5269_v14  ;;  %4913 = vmatprep.subr.bf16.mxu1 %v5270_v60  ;;  %v3034_v14 = vld [vmem:[#allocation2 + $0xc1] sm:$0xff] }
 0x18d   : > { %4690 = vmatmul.mubr.msk.bf16.gmra.mrb[40].mxu0 %vm424_vm0, %v5718_v5 }
 0x18e   : > { %4693 = vmatprep.mubr.msk.bf16.mxu0 %vm424_vm0, %v5743_v20  ;;  %4850 = vmatmul.mubr.msk.bf16.gmra.mrb[8].mxu1 %vm424_vm0, %v5757_v30 }
 0x18f   : > { %4853 = vmatprep.mubr.msk.bf16.mxu1 %vm424_vm0, %v5759_v32 }
 0x195   : > { %4694 = vmatmul.mubr.msk.bf16.gmra.mrb[44].mxu0 %vm424_vm0, %v5748_v21 }
 0x196   : > { %4697 = vmatprep.mubr.msk.bf16.mxu0 %vm424_vm0, %v5761_v33  ;;  %4854 = vmatmul.mubr.msk.bf16.gmra.mrb[12].mxu1 %vm424_vm0, %v5773_v48 }
 0x197   : > { %4857 = vmatprep.mubr.msk.bf16.mxu1 %vm424_vm0, %v5775_v54 }
 0x19d   : > { %4698 = vmatmul.mubr.msk.bf16.gmra.mrb[48].mxu0 %vm424_vm0, %v5765_v37 }
 0x19e   : > { %4701 = vmatprep.mubr.msk.bf16.mxu0 %vm424_vm0, %v5777_v56  ;;  %4858 = vmatmul.mubr.msk.bf16.gmra.mrb[16].mxu1 %vm424_vm0, %v5789_v1 }
 0x19f   : > { %4861 = vmatprep.mubr.msk.bf16.mxu1 %vm424_vm0, %v5791_v6 }
 0x1a5   : > { %4702 = vmatmul.mubr.msk.bf16.gmra.mrb[52].mxu0 %vm424_vm0, %v5781_v57 }
 0x1a6   : > { %4705 = vmatprep.mubr.msk.bf16.mxu0 %vm424_vm0, %v5793_v7  ;;  %4862 = vmatmul.mubr.msk.bf16.gmra.mrb[20].mxu1 %vm424_vm0, %v5805_v23 }
 0x1a7   : > { %4865 = vmatprep.mubr.msk.bf16.mxu1 %vm424_vm0, %v5807_v36 }
 0x1ad   : > { %4706 = vmatmul.mubr.msk.bf16.gmra.mrb[56].mxu0 %vm424_vm0, %v5797_v9 }
 0x1ae   : > { %4709 = vmatprep.mubr.msk.bf16.mxu0 %vm424_vm0, %v5809_v27  ;;  %4866 = vmatmul.mubr.msk.bf16.gmra.mrb[24].mxu1 %vm424_vm0, %v5821_v45 }
 0x1af   : > { %4869 = vmatprep.mubr.msk.bf16.mxu1 %vm424_vm0, %v5905_v62 }
 0x1b5   : > { %4710 = vmatmul.mubr.msk.bf16.gmra.mrb[60].mxu0 %vm424_vm0, %v5813_v28 }
 0x1b6   : > { %4721 = vmatprep.mubr.msk.bf16.mxu0 %vm424_vm0, %v5677_v47  ;;  %4870 = vmatmul.mubr.msk.bf16.gmra.mrb[28].mxu1 %vm424_vm0, %v2747_v11  ;;  %v5272_v47 = vld [vmem:[%s6238_s4 + $0x110] sm:$0xff]  }
 0x1b7   : > { %4881 = vmatprep.mubr.msk.bf16.mxu1 %vm424_vm0, %v3054_v16  ;;  %v6064_v16 = vld [vmem:[%s6239_s5] ss:$0 sm:$0xff] }
 0x1bd   : > { %4722 = vmatmul.mubr.msk.bf16.vlgmr.msra.gmra.mrb[32].mxu0 %vm424_vm0, %v5679_v49  ;;  %v3030_v49 = vld [vmem:[#allocation2 + $0x91] sm:$0xff] }
 0x1be   : > { %4725 = vmatprep.mubr.msk.bf16.mxu0 %vm424_vm0, %v5707_v0  ;;  %4882 = vmatmul.mubr.msk.bf16.vlgmr.msra.gmra.mrb[0].mxu1 %vm424_vm0, %v3055_v25  ;;  %v5273_v0 = vld [vmem:[%s6238_s4 + $0x118] sm:$0xff]   ;;  %v3058_v51 = vpack.c.bf16 %v3031_v42, %v3030_v49 }
 0x1bf   : > { %4914 = vmatpush3.bf16.msra.mxu1 %v5270_v60  ;;  %4885 = vmatprep.mubr.msk.bf16.mxu1 %vm424_vm0, %v3056_v40  ;;  %v3036_v60 = vld [vmem:[#allocation2 + $0xd9] sm:$0xff] }
 0x1c0   : > { %4915 = vmatprep.subr.bf16.mxu1 %v5271_v31 }
 0x1c3   : > { %4916 = vmatpush3.bf16.msra.mxu1 %v5271_v31 }
 0x1c4   : > { %4917 = vmatprep.subr.bf16.mxu1 %v5272_v47 }
 0x1c5   : > { %4726 = vmatmul.mubr.msk.bf16.gmra.mrb[36].mxu0 %vm424_vm0, %v5709_v2  ;;  %v3060_v2 = vpack.c.bf16 %v3035_v39, %v3034_v14 }
 0x1c6   : > { %4729 = vmatprep.mubr.msk.bf16.mxu0 %vm424_vm0, %v5739_v18  ;;  %4886 = vmatmul.mubr.msk.bf16.gmra.mrb[4].mxu1 %vm424_vm0, %v3057_v44  ;;  %v3037_v18 = vld [vmem:[#allocation2 + $0xe1] sm:$0xff] }
 0x1c7   : > { %4889 = vmatprep.mubr.msk.bf16.mxu1 %vm424_vm0, %v3058_v51  ;;  %4918 = vmatpush3.bf16.msra.mxu1 %v5272_v47  ;;  %v3061_v61 = vpack.c.bf16 %v3037_v18, %v3036_v60 }
 0x1c8   : > { %4919 = vmatprep.subr.bf16.mxu1 %v5273_v0 }
 0x1cb   : > { %4920 = vmatpush3.bf16.msra.mxu1 %v5273_v0 }
 0x1cd   : > { %4730 = vmatmul.mubr.msk.bf16.gmra.mrb[40].mxu0 %vm424_vm0, %v5741_v34 }
 0x1ce   : > { %4733 = vmatprep.mubr.msk.bf16.mxu0 %vm424_vm0, %v5757_v30  ;;  %4890 = vmatmul.mubr.msk.bf16.gmra.mrb[8].mxu1 %vm424_vm0, %v3059_v10 }
 0x1cf   : > { %4893 = vmatprep.mubr.msk.bf16.mxu1 %vm424_vm0, %v3060_v2 }
 0x1d5   : > { %4734 = vmatmul.mubr.msk.bf16.gmra.mrb[44].mxu0 %vm424_vm0, %v5759_v32 }
 0x1d6   : > { %4737 = vmatprep.mubr.msk.bf16.mxu0 %vm424_vm0, %v5773_v48  ;;  %4894 = vmatmul.mubr.msk.bf16.gmra.mrb[12].mxu1 %vm424_vm0, %v3061_v61 }
 0x1d7   : > { %4897 = vmatprep.mubr.msk.bf16.mxu1 %vm424_vm0, %v5610_v53  ;;  %v3052_v53 = vld [vmem:[#allocation2 + $0x199] sm:$0xff] }
 0x1dd   : > { %4738 = vmatmul.mubr.msk.bf16.gmra.mrb[48].mxu0 %vm424_vm0, %v5775_v54 }
 0x1de   : > { %4741 = vmatprep.mubr.msk.bf16.mxu0 %vm424_vm0, %v5789_v1  ;;  %4898 = vmatmul.mubr.msk.bf16.gmra.mrb[16].mxu1 %vm424_vm0, %v5628_v8  ;;  %v3053_v8 = vld [vmem:[#allocation2 + $0x1a1] sm:$0xff] }
 0x1df   : > { %4901 = vmatprep.mubr.msk.bf16.mxu1 %vm424_vm0, %v5632_v13  ;;  %v3069_v13 = vpack.c.bf16 %v3053_v8, %v3052_v53 }
 0x1e5   : > { %4742 = vmatmul.mubr.msk.bf16.gmra.mrb[52].mxu0 %vm424_vm0, %v5791_v6 }
 0x1e6   : > { %4745 = vmatprep.mubr.msk.bf16.mxu0 %vm424_vm0, %v5805_v23  ;;  %4902 = vmatmul.mubr.msk.bf16.gmra.mrb[20].mxu1 %vm424_vm0, %v5650_v24  ;;  %v3374_v24 = vld [vmem:[#allocation2 + $0x19a] sm:$0xff] }
 0x1e7   : > { %4905 = vmatprep.mubr.msk.bf16.mxu1 %vm424_vm0, %v5652_v26  ;;  %v3375_v26 = vld [vmem:[#allocation2 + $0x1a2] sm:$0xff] }
 0x1ed   : > { %4746 = vmatmul.mubr.msk.bf16.gmra.mrb[56].mxu0 %vm424_vm0, %v5807_v36 }
 0x1ee   : > { %4749 = vmatprep.mubr.msk.bf16.mxu0 %vm424_vm0, %v5821_v45  ;;  %4906 = vmatmul.mubr.msk.bf16.gmra.mrb[24].mxu1 %vm424_vm0, %v5662_v35  ;;  %v3391_v35 = vpack.c.bf16 %v3375_v26, %v3374_v24 }
 0x1ef   : > { %4909 = vmatprep.mubr.msk.bf16.mxu1 %vm424_vm0, %v5664_v38 }
 0x1f5   : > { %4750 = vmatmul.mubr.msk.bf16.gmra.mrb[60].mxu0 %vm424_vm0, %v5905_v62 }
 0x1f6   : > { %4910 = vmatmul.mubr.msk.bf16.gmra.mrb[28].mxu1 %vm424_vm0, %v3069_v13 }
 0x1f7   : > { %4921 = vmatprep.mubr.msk.bf16.mxu1 %vm424_vm0, %v5681_v50 }
 0x1fe   : > { %4922 = vmatmul.mubr.msk.bf16.vlgmr.msra.gmra.mrb[0].mxu1 %vm424_vm0, %v5688_v52 }
 0x1ff   : > { %4925 = vmatprep.mubr.msk.bf16.mxu1 %vm424_vm0, %v5711_v4 }
 0x206   : > { %4926 = vmatmul.mubr.msk.bf16.gmra.mrb[4].mxu1 %vm424_vm0, %v5718_v5 }
 0x207   : > { %4929 = vmatprep.mubr.msk.bf16.mxu1 %vm424_vm0, %v5743_v20 }
 0x20e   : > { %4930 = vmatmul.mubr.msk.bf16.gmra.mrb[8].mxu1 %vm424_vm0, %v5748_v21 }
 0x20f   : > { %4933 = vmatprep.mubr.msk.bf16.mxu1 %vm424_vm0, %v5761_v33 }
 0x216   : > { %4934 = vmatmul.mubr.msk.bf16.gmra.mrb[12].mxu1 %vm424_vm0, %v5765_v37 }
 0x217   : > { %4937 = vmatprep.mubr.msk.bf16.mxu1 %vm424_vm0, %v5777_v56 }
 0x21e   : > { %4938 = vmatmul.mubr.msk.bf16.gmra.mrb[16].mxu1 %vm424_vm0, %v5781_v57 }
 0x21f   : > { %4941 = vmatprep.mubr.msk.bf16.mxu1 %vm424_vm0, %v5793_v7 }
 0x226   : > { %4942 = vmatmul.mubr.msk.bf16.gmra.mrb[20].mxu1 %vm424_vm0, %v5797_v9 }
 0x227   : > { %4945 = vmatprep.mubr.msk.bf16.mxu1 %vm424_vm0, %v5809_v27 }
 0x22e   : > { %4946 = vmatmul.mubr.msk.bf16.gmra.mrb[24].mxu1 %vm424_vm0, %v5813_v28 }
 0x22f   : > { %4949 = vmatprep.mubr.msk.bf16.mxu1 %vm424_vm0, %v5823_v46 }
 0x236   : > { %4950 = vmatmul.mubr.msk.bf16.gmra.mrb[28].mxu1 %vm424_vm0, %v3391_v35 }
 0x290   : > { %v4723_v38 = vpop.f32.mrb[32].mxu0 }
 0x291   : > { %v1896_v50 = vpop.f32.mrb[33].mxu0 }
 0x292   : > { %v4724_v52 = vpop.f32.mrb[34].mxu0 }
 0x293   : > { %v1899_v4 = vpop.f32.mrb[35].mxu0 }
 0x298   : > { %v4727_v5 = vpop.f32.mrb[36].mxu0 }
 0x299   : > { %v1912_v34 = vpop.f32.mrb[37].mxu0 }
 0x29a   : > { %v4728_v20 = vpop.f32.mrb[38].mxu0 }
 0x29b   : > { %v6011_v21 = vpop.f32.mrb[39].mxu0 }
 0x2a0   : > { %v6013_v30 = vpop.f32.mrb[40].mxu0 }
 0x2a1   : > { %v6015_v32 = vpop.f32.mrb[41].mxu0 }
 0x2a2   : > { %v6017_v33 = vpop.f32.mrb[42].mxu0 }
 0x2a3   : > { %v6019_v37 = vpop.f32.mrb[43].mxu0 }
 0x2a8   : > { %v6021_v48 = vpop.f32.mrb[44].mxu0 }
 0x2a9   : > { %v6023_v54 = vpop.f32.mrb[45].mxu0 }
 0x2aa   : > { %v6025_v56 = vpop.f32.mrb[46].mxu0 }
 0x2ab   : > { %v6027_v57 = vpop.f32.mrb[47].mxu0 }
 0x2b0   : > { %v6029_v1 = vpop.f32.mrb[48].mxu0 }
 0x2b1   : > { %v6031_v6 = vpop.f32.mrb[49].mxu0 }
 0x2b2   : > { %v6033_v7 = vpop.f32.mrb[50].mxu0 }
 0x2b3   : > { %v6035_v9 = vpop.f32.mrb[51].mxu0 }
 0x2b8   : > { %v6037_v23 = vpop.f32.mrb[52].mxu0 }
 0x2b9   : > { %v6039_v36 = vpop.f32.mrb[53].mxu0 }
 0x2ba   : > { %v6041_v27 = vpop.f32.mrb[54].mxu0 }
 0x2bb   : > { %v6043_v28 = vpop.f32.mrb[55].mxu0 }
 0x2c0   : > { %v6045_v45 = vpop.f32.mrb[56].mxu0 }
 0x2c1   : > { %v6047_v46 = vpop.f32.mrb[57].mxu0 }
 0x2c2   : > { %v6049_v55 = vpop.f32.mrb[58].mxu0 }
 0x2c3   : > { %v6051_v62 = vpop.f32.mrb[59].mxu0 }
 0x2c8   : > { %v6053_v63 = vpop.f32.mrb[60].mxu0 }
 0x2c9   : > { %v6055_v3 = vpop.f32.mrb[61].mxu0 }
 0x2ca   : > { %v6057_v11 = vpop.f32.mrb[62].mxu0 }
 0x2cb   : > { %v6059_v12 = vpop.f32.mrb[63].mxu0 }
 0x2d1   : > { %v4923_v15 = vpop.f32.mrb[0].mxu1 }
 0x2d2   : > { %v4953_v17 = vadd.f32 %v4923_v15, %v4723_v38  ;;  %v3507_v19 = vpop.f32.mrb[1].mxu1 }
 0x2d3   : > { %v4954_v25 = vadd.f32 %v3507_v19, %v1896_v50  ;;  %v4924_v29 = vpop.f32.mrb[2].mxu1 }
 0x2d4   : > { %v3675_v31 = vmul.f32 %v4953_v17, %v6064_v16  ;;  %v4955_v40 = vadd.f32 %v4924_v29, %v4724_v52  ;;  %v3510_v47 = vpop.f32.mrb[3].mxu1 }
 0x2d5   : > { %v3673_v41 = vmul.f32 %v4954_v25, %v6064_v16  ;;  %v4956_v42 = vadd.f32 %v3510_v47, %v1899_v4 }
 0x2d6   : > { %v3714_v43 = vadd.f32 %v6069_v22, %v3675_v31  ;;  %v3676_v44 = vmul.f32 %v4955_v40, %v6064_v16 }
 0x2d7   : > { %v3712_v49 = vadd.f32 %v6069_v22, %v3673_v41  ;;  %v3674_v0 = vmul.f32 %v4956_v42, %v6064_v16 }
 0x2d8   : > { %v3746_v51 = vmax.f32 %v3714_v43, 0.0  ;;  %v3715_v58 = vadd.f32 %v6069_v22, %v3676_v44 }
 0x2d9   : > { %v3744_v39 = vmax.f32 %v3712_v49, 0.0  ;;  %v3713_v59 = vadd.f32 %v6069_v22, %v3674_v0  ;;  %v4927_v10 = vpop.f32.mrb[4].mxu1 }
 0x2da   : > { %v4323_v14 = vpack.c.bf16 %v3746_v51, %v3746_v51  ;;  %v3747_v2 = vmax.f32 %v3715_v58, 0.0  ;;  %v4957_v18 = vadd.f32 %v4927_v10, %v4727_v5  ;;  %v3523_v60 = vpop.f32.mrb[5].mxu1 }
 0x2db   : > { %v4321_v61 = vpack.c.bf16 %v3744_v39, %v3744_v39  ;;  %v3745_v53 = vmax.f32 %v3713_v59, 0.0  ;;  %v4958_v8 = vadd.f32 %v3523_v60, %v1912_v34  ;;  %v4928_v13 = vpop.f32.mrb[6].mxu1 }
 0x2dc   : > { %3907 = vst.msk [vmem:[%s6083_s17 + $0x8] sm:$0xf] %vm3904_vm2, %v4323_v14  ;;  %v4324_v24 = vpack.c.bf16 %v3747_v2, %v3747_v2  ;;  %v3679_v26 = vmul.f32 %v4957_v18, %v6064_v16  ;;  %v4959_v35 = vadd.f32 %v4928_v13, %v4728_v20  ;;  %v3526_v38 = vpop.f32.mrb[7].mxu1 }
 0x2dd   : > { %3905 = vst.msk [vmem:[%s6083_s17] sm:$0xf] %vm3904_vm2, %v4321_v61  ;;  %v4322_v50 = vpack.c.bf16 %v3745_v53, %v3745_v53  ;;  %v3677_v52 = vmul.f32 %v4958_v8, %v6064_v16  ;;  %v4960_v4 = vadd.f32 %v3526_v38, %v6011_v21 }
 0x2de   : > { %3908 = vst.msk [vmem:[%s6083_s17 + $0xc] sm:$0xf] %vm3904_vm2, %v4324_v24  ;;  %v3718_v5 = vadd.f32 %v6069_v22, %v3679_v26  ;;  %v3680_v34 = vmul.f32 %v4959_v35, %v6064_v16 }
 0x2df   : > { %3906 = vst.msk [vmem:[%s6083_s17 + $0x4] sm:$0xf] %vm3904_vm2, %v4322_v50  ;;  %v3716_v15 = vadd.f32 %v6069_v22, %v3677_v52  ;;  %v3678_v20 = vmul.f32 %v4960_v4, %v6064_v16 }
 0x2e0   : > { %v3750_v17 = vmax.f32 %v3718_v5, 0.0  ;;  %v3719_v19 = vadd.f32 %v6069_v22, %v3680_v34 }
 0x2e1   : > { %v3748_v25 = vmax.f32 %v3716_v15, 0.0  ;;  %v3717_v21 = vadd.f32 %v6069_v22, %v3678_v20  ;;  %v4931_v29 = vpop.f32.mrb[8].mxu1 }
 0x2e2   : > { %v4327_v31 = vpack.c.bf16 %v3750_v17, %v3750_v17  ;;  %v3751_v40 = vmax.f32 %v3719_v19, 0.0  ;;  %v4961_v47 = vadd.f32 %v4931_v29, %v6013_v30  ;;  %v3539_v41 = vpop.f32.mrb[9].mxu1 }
 0x2e3   : > { %v4325_v42 = vpack.c.bf16 %v3748_v25, %v3748_v25  ;;  %v3749_v43 = vmax.f32 %v3717_v21, 0.0  ;;  %v4962_v44 = vadd.f32 %v3539_v41, %v6015_v32  ;;  %v4932_v49 = vpop.f32.mrb[10].mxu1 }
 0x2e4   : > { %3911 = vst.msk [vmem:[%s6083_s17 + $0x18] sm:$0xf] %vm3904_vm2, %v4327_v31  ;;  %v4328_v0 = vpack.c.bf16 %v3751_v40, %v3751_v40  ;;  %v3683_v51 = vmul.f32 %v4961_v47, %v6064_v16  ;;  %v4963_v58 = vadd.f32 %v4932_v49, %v6017_v33  ;;  %v3542_v39 = vpop.f32.mrb[11].mxu1 }
 0x2e5   : > { %3909 = vst.msk [vmem:[%s6083_s17 + $0x10] sm:$0xf] %vm3904_vm2, %v4325_v42  ;;  %v4326_v59 = vpack.c.bf16 %v3749_v43, %v3749_v43  ;;  %v3681_v30 = vmul.f32 %v4962_v44, %v6064_v16  ;;  %v4964_v10 = vadd.f32 %v3542_v39, %v6019_v37 }
 0x2e6   : > { %3912 = vst.msk [vmem:[%s6083_s17 + $0x1c] sm:$0xf] %vm3904_vm2, %v4328_v0  ;;  %v3722_v32 = vadd.f32 %v6069_v22, %v3683_v51  ;;  %v3684_v14 = vmul.f32 %v4963_v58, %v6064_v16 }
 0x2e7   : > { %3910 = vst.msk [vmem:[%s6083_s17 + $0x14] sm:$0xf] %vm3904_vm2, %v4326_v59  ;;  %v3720_v2 = vadd.f32 %v6069_v22, %v3681_v30  ;;  %v3682_v33 = vmul.f32 %v4964_v10, %v6064_v16 }
 0x2e8   : > { %v3754_v18 = vmax.f32 %v3722_v32, 0.0  ;;  %v3723_v60 = vadd.f32 %v6069_v22, %v3684_v14 }
 0x2e9   : > { %v3752_v61 = vmax.f32 %v3720_v2, 0.0  ;;  %v3721_v37 = vadd.f32 %v6069_v22, %v3682_v33  ;;  %v4935_v53 = vpop.f32.mrb[12].mxu1 }
 0x2ea   : > { %v4331_v8 = vpack.c.bf16 %v3754_v18, %v3754_v18  ;;  %v3755_v13 = vmax.f32 %v3723_v60, 0.0  ;;  %v4965_v24 = vadd.f32 %v4935_v53, %v6021_v48  ;;  %v3555_v26 = vpop.f32.mrb[13].mxu1 }
 0x2eb   : > { %v4329_v35 = vpack.c.bf16 %v3752_v61, %v3752_v61  ;;  %v3753_v38 = vmax.f32 %v3721_v37, 0.0  ;;  %v4966_v50 = vadd.f32 %v3555_v26, %v6023_v54  ;;  %v4936_v52 = vpop.f32.mrb[14].mxu1 }
 0x2ec   : > { %3915 = vst.msk [vmem:[%s6083_s17 + $0x28] sm:$0xf] %vm3904_vm2, %v4331_v8  ;;  %v4332_v4 = vpack.c.bf16 %v3755_v13, %v3755_v13  ;;  %v3687_v5 = vmul.f32 %v4965_v24, %v6064_v16  ;;  %v4967_v34 = vadd.f32 %v4936_v52, %v6025_v56  ;;  %v3558_v15 = vpop.f32.mrb[15].mxu1 }
 0x2ed   : > { %3913 = vst.msk [vmem:[%s6083_s17 + $0x20] sm:$0xf] %vm3904_vm2, %v4329_v35  ;;  %v4330_v20 = vpack.c.bf16 %v3753_v38, %v3753_v38  ;;  %v3685_v48 = vmul.f32 %v4966_v50, %v6064_v16  ;;  %v4968_v17 = vadd.f32 %v3558_v15, %v6027_v57 }
 0x2ee   : > { %3916 = vst.msk [vmem:[%s6083_s17 + $0x2c] sm:$0xf] %vm3904_vm2, %v4332_v4  ;;  %v3726_v54 = vadd.f32 %v6069_v22, %v3687_v5  ;;  %v3688_v19 = vmul.f32 %v4967_v34, %v6064_v16 }
 0x2ef   : > { %3914 = vst.msk [vmem:[%s6083_s17 + $0x24] sm:$0xf] %vm3904_vm2, %v4330_v20  ;;  %v3724_v25 = vadd.f32 %v6069_v22, %v3685_v48  ;;  %v3686_v56 = vmul.f32 %v4968_v17, %v6064_v16 }
 0x2f0   : > { %v3758_v21 = vmax.f32 %v3726_v54, 0.0  ;;  %v3727_v29 = vadd.f32 %v6069_v22, %v3688_v19 }
 0x2f1   : > { %v3756_v31 = vmax.f32 %v3724_v25, 0.0  ;;  %v3725_v57 = vadd.f32 %v6069_v22, %v3686_v56  ;;  %v4939_v40 = vpop.f32.mrb[16].mxu1 }
 0x2f2   : > { %v4335_v47 = vpack.c.bf16 %v3758_v21, %v3758_v21  ;;  %v3759_v41 = vmax.f32 %v3727_v29, 0.0  ;;  %v4969_v42 = vadd.f32 %v4939_v40, %v6029_v1  ;;  %v3571_v43 = vpop.f32.mrb[17].mxu1 }
 0x2f3   : > { %v4333_v44 = vpack.c.bf16 %v3756_v31, %v3756_v31  ;;  %v3757_v49 = vmax.f32 %v3725_v57, 0.0  ;;  %v4970_v0 = vadd.f32 %v3571_v43, %v6031_v6  ;;  %v4940_v51 = vpop.f32.mrb[18].mxu1 }
 0x2f4   : > { %3919 = vst.msk [vmem:[%s6083_s17 + $0x38] sm:$0xf] %vm3904_vm2, %v4335_v47  ;;  %v4336_v58 = vpack.c.bf16 %v3759_v41, %v3759_v41  ;;  %v3691_v39 = vmul.f32 %v4969_v42, %v6064_v16  ;;  %v4971_v59 = vadd.f32 %v4940_v51, %v6033_v7  ;;  %v3574_v30 = vpop.f32.mrb[19].mxu1 }
 0x2f5   : > { %3917 = vst.msk [vmem:[%s6083_s17 + $0x30] sm:$0xf] %vm3904_vm2, %v4333_v44  ;;  %v4334_v10 = vpack.c.bf16 %v3757_v49, %v3757_v49  ;;  %v3689_v1 = vmul.f32 %v4970_v0, %v6064_v16  ;;  %v4972_v32 = vadd.f32 %v3574_v30, %v6035_v9 }
 0x2f6   : > { %3920 = vst.msk [vmem:[%s6083_s17 + $0x3c] sm:$0xf] %vm3904_vm2, %v4336_v58  ;;  %v3730_v6 = vadd.f32 %v6069_v22, %v3691_v39  ;;  %v3692_v14 = vmul.f32 %v4971_v59, %v6064_v16 }
 0x2f7   : > { %3918 = vst.msk [vmem:[%s6083_s17 + $0x34] sm:$0xf] %vm3904_vm2, %v4334_v10  ;;  %v3728_v2 = vadd.f32 %v6069_v22, %v3689_v1  ;;  %v3690_v7 = vmul.f32 %v4972_v32, %v6064_v16 }
 0x2f8   : > { %v3762_v33 = vmax.f32 %v3730_v6, 0.0  ;;  %v3731_v18 = vadd.f32 %v6069_v22, %v3692_v14 }
 0x2f9   : > { %v3760_v60 = vmax.f32 %v3728_v2, 0.0  ;;  %v3729_v9 = vadd.f32 %v6069_v22, %v3690_v7  ;;  %v4943_v61 = vpop.f32.mrb[20].mxu1 }
 0x2fa   : > { %v4339_v37 = vpack.c.bf16 %v3762_v33, %v3762_v33  ;;  %v3763_v53 = vmax.f32 %v3731_v18, 0.0  ;;  %v4973_v8 = vadd.f32 %v4943_v61, %v6037_v23  ;;  %v3587_v13 = vpop.f32.mrb[21].mxu1 }
 0x2fb   : > { %v4337_v24 = vpack.c.bf16 %v3760_v60, %v3760_v60  ;;  %v3761_v26 = vmax.f32 %v3729_v9, 0.0  ;;  %v4974_v35 = vadd.f32 %v3587_v13, %v6039_v36  ;;  %v4944_v38 = vpop.f32.mrb[22].mxu1 }
 0x2fc   : > { %3923 = vst.msk [vmem:[%s6083_s17 + $0x48] sm:$0xf] %vm3904_vm2, %v4339_v37  ;;  %v4340_v50 = vpack.c.bf16 %v3763_v53, %v3763_v53  ;;  %v3695_v52 = vmul.f32 %v4973_v8, %v6064_v16  ;;  %v4975_v4 = vadd.f32 %v4944_v38, %v6041_v27  ;;  %v3590_v5 = vpop.f32.mrb[23].mxu1 }
 0x2fd   : > { %3921 = vst.msk [vmem:[%s6083_s17 + $0x40] sm:$0xf] %vm3904_vm2, %v4337_v24  ;;  %v4338_v34 = vpack.c.bf16 %v3761_v26, %v3761_v26  ;;  %v3693_v23 = vmul.f32 %v4974_v35, %v6064_v16  ;;  %v4976_v15 = vadd.f32 %v3590_v5, %v6043_v28 }
 0x2fe   : > { %3924 = vst.msk [vmem:[%s6083_s17 + $0x4c] sm:$0xf] %vm3904_vm2, %v4340_v50  ;;  %v3734_v36 = vadd.f32 %v6069_v22, %v3695_v52  ;;  %v3696_v20 = vmul.f32 %v4975_v4, %v6064_v16 }
 0x2ff   : > { %3922 = vst.msk [vmem:[%s6083_s17 + $0x44] sm:$0xf] %vm3904_vm2, %v4338_v34  ;;  %v3732_v48 = vadd.f32 %v6069_v22, %v3693_v23  ;;  %v3694_v27 = vmul.f32 %v4976_v15, %v6064_v16 }
 0x300   : > { %v3766_v17 = vmax.f32 %v3734_v36, 0.0  ;;  %v3735_v54 = vadd.f32 %v6069_v22, %v3696_v20 }
 0x301   : > { %v3764_v19 = vmax.f32 %v3732_v48, 0.0  ;;  %v3733_v28 = vadd.f32 %v6069_v22, %v3694_v27  ;;  %v4947_v25 = vpop.f32.mrb[24].mxu1 }
 0x302   : > { %v4343_v56 = vpack.c.bf16 %v3766_v17, %v3766_v17  ;;  %v3767_v21 = vmax.f32 %v3735_v54, 0.0  ;;  %v4977_v29 = vadd.f32 %v4947_v25, %v6045_v45  ;;  %v3603_v31 = vpop.f32.mrb[25].mxu1 }
 0x303   : > { %v4341_v57 = vpack.c.bf16 %v3764_v19, %v3764_v19  ;;  %v3765_v40 = vmax.f32 %v3733_v28, 0.0  ;;  %v4978_v47 = vadd.f32 %v3603_v31, %v6047_v46  ;;  %v4948_v41 = vpop.f32.mrb[26].mxu1 }
 0x304   : > { %3927 = vst.msk [vmem:[%s6083_s17 + $0x58] sm:$0xf] %vm3904_vm2, %v4343_v56  ;;  %v4344_v42 = vpack.c.bf16 %v3767_v21, %v3767_v21  ;;  %v3699_v43 = vmul.f32 %v4977_v29, %v6064_v16  ;;  %v4979_v44 = vadd.f32 %v4948_v41, %v6049_v55  ;;  %v3606_v49 = vpop.f32.mrb[27].mxu1 }
 0x305   : > { %3925 = vst.msk [vmem:[%s6083_s17 + $0x50] sm:$0xf] %vm3904_vm2, %v4341_v57  ;;  %v4342_v0 = vpack.c.bf16 %v3765_v40, %v3765_v40  ;;  %v3697_v45 = vmul.f32 %v4978_v47, %v6064_v16  ;;  %v4980_v51 = vadd.f32 %v3606_v49, %v6051_v62 }
 0x306   : > { %3928 = vst.msk [vmem:[%s6083_s17 + $0x5c] sm:$0xf] %vm3904_vm2, %v4344_v42  ;;  %v3738_v46 = vadd.f32 %v6069_v22, %v3699_v43  ;;  %v3700_v58 = vmul.f32 %v4979_v44, %v6064_v16 }
 0x307   : > { %3926 = vst.msk [vmem:[%s6083_s17 + $0x54] sm:$0xf] %vm3904_vm2, %v4342_v0  ;;  %v3736_v39 = vadd.f32 %v6069_v22, %v3697_v45  ;;  %v3698_v55 = vmul.f32 %v4980_v51, %v6064_v16 }
 0x308   : > { %v3770_v59 = vmax.f32 %v3738_v46, 0.0  ;;  %v3739_v30 = vadd.f32 %v6069_v22, %v3700_v58 }
 0x309   : > { %v3768_v10 = vmax.f32 %v3736_v39, 0.0  ;;  %v3737_v62 = vadd.f32 %v6069_v22, %v3698_v55  ;;  %v4951_v1 = vpop.f32.mrb[28].mxu1 }
 0x30a   : > { %v4347_v32 = vpack.c.bf16 %v3770_v59, %v3770_v59  ;;  %v3771_v6 = vmax.f32 %v3739_v30, 0.0  ;;  %v4981_v14 = vadd.f32 %v4951_v1, %v6053_v63  ;;  %v3619_v2 = vpop.f32.mrb[29].mxu1 }
 0x30b   : > { %v4345_v7 = vpack.c.bf16 %v3768_v10, %v3768_v10  ;;  %v3769_v33 = vmax.f32 %v3737_v62, 0.0  ;;  %v4982_v18 = vadd.f32 %v3619_v2, %v6055_v3  ;;  %v4952_v60 = vpop.f32.mrb[30].mxu1 }
 0x30c   : > { %3931 = vst.msk [vmem:[%s6083_s17 + $0x68] sm:$0xf] %vm3904_vm2, %v4347_v32  ;;  %v4348_v9 = vpack.c.bf16 %v3771_v6, %v3771_v6  ;;  %v3703_v61 = vmul.f32 %v4981_v14, %v6064_v16  ;;  %v4983_v37 = vadd.f32 %v4952_v60, %v6057_v11  ;;  %v3622_v53 = vpop.f32.mrb[31].mxu1 }
 0x30d   : > { %3929 = vst.msk [vmem:[%s6083_s17 + $0x60] sm:$0xf] %vm3904_vm2, %v4345_v7  ;;  %v4346_v8 = vpack.c.bf16 %v3769_v33, %v3769_v33  ;;  %v3701_v63 = vmul.f32 %v4982_v18, %v6064_v16  ;;  %v4984_v13 = vadd.f32 %v3622_v53, %v6059_v12 }
 0x30e   : > { %3932 = vst.msk [vmem:[%s6083_s17 + $0x6c] sm:$0xf] %vm3904_vm2, %v4348_v9  ;;  %v3742_v3 = vadd.f32 %v6069_v22, %v3703_v61  ;;  %v3704_v24 = vmul.f32 %v4983_v37, %v6064_v16 }
 0x30f   : > { %3930 = vst.msk [vmem:[%s6083_s17 + $0x64] sm:$0xf] %vm3904_vm2, %v4346_v8  ;;  %v3740_v11 = vadd.f32 %v6069_v22, %v3701_v63  ;;  %v3702_v26 = vmul.f32 %v4984_v13, %v6064_v16 }
 0x310   : > { %v3774_v35 = vmax.f32 %v3742_v3, 0.0  ;;  %v3743_v38 = vadd.f32 %v6069_v22, %v3704_v24 }
 0x311   : > { %v3772_v50 = vmax.f32 %v3740_v11, 0.0  ;;  %v3741_v12 = vadd.f32 %v6069_v22, %v3702_v26 }
 0x312   : > { %v4351_v52 = vpack.c.bf16 %v3774_v35, %v3774_v35  ;;  %v3775_v4 = vmax.f32 %v3743_v38, 0.0 }
 0x313   : > { %v4349_v5 = vpack.c.bf16 %v3772_v50, %v3772_v50  ;;  %v3773_v34 = vmax.f32 %v3741_v12, 0.0 }
 0x314   : > { %3935 = vst.msk [vmem:[%s6083_s17 + $0x78] sm:$0xf] %vm3904_vm2, %v4351_v52  ;;  %v4352_v23 = vpack.c.bf16 %v3775_v4, %v3775_v4 }
 0x315   : > { %3933 = vst.msk [vmem:[%s6083_s17 + $0x70] sm:$0xf] %vm3904_vm2, %v4349_v5  ;;  %v4350_v15 = vpack.c.bf16 %v3773_v34, %v3773_v34 }
 0x316   : > { %3936 = vst.msk [vmem:[%s6083_s17 + $0x7c] sm:$0xf] %vm3904_vm2, %v4352_v23 }
 0x317   : > { %3934 = vst.msk [vmem:[%s6083_s17 + $0x74] sm:$0xf] %vm3904_vm2, %v4350_v15 }
 0x318 PF: > { %s17_s24 = sadd.s32 1, %s5280_s24  }
 0x319   : > { %p14_p4 = scmp.ge.s32.totalorder %s17_s24, 4  }
 0x31b   :  { %16 = sbr.rel (!%p14_p4) target bundleno = 1 (0x1), region = 88 }

</bundles_post_ra>
